<compile_context>
chip_gen: v7x
topology: tpu7x:2x2x1
jax: 0.10.0
libtpu: 0.0.40
codegen_flags: <defaults>
</compile_context>

<pallas_src>
import jax
import jax.numpy as jnp
from jax import lax
from jax.experimental import pallas as pl
from jax.experimental.pallas import tpu as pltpu

LANE = 128


def _round_up(v, m):
    return ((v + m - 1) // m) * m


def _pad2d(x, rows, cols):
    r, c = x.shape
    return jnp.pad(x, ((0, rows - r), (0, cols - c)))


def _vmem_limit_bytes():
    """Generation-aware VMEM budget (v7x: 64 MiB physical; v5e/v6e: 128 MiB)."""
    cap = 64 * 1024 * 1024  # conservative default = v7x per-TC physical
    try:
        info = pltpu.get_tpu_info()
        cap = int(getattr(info, "vmem_capacity_bytes", cap))
    except Exception:
        pass
    return (cap * 3) // 4


def _fused_fits(n_pad, f_pad, h_pad, c_pad, vmem_limit):
    """Rough VMEM footprint of the fused single-launch kernel (with 2x headroom)."""
    resident = (n_pad * n_pad * 2                     # A_hat bf16 (dominant)
                + n_pad * f_pad * 2                   # X bf16
                + f_pad * h_pad * 2 + h_pad * c_pad * 2
                + 4 * (h_pad + c_pad)                 # biases f32
                + n_pad * c_pad * 4)                  # output f32
    temps = (n_pad * h_pad * (4 + 2)                  # xw1 / h (f32 + bf16 cast)
             + n_pad * c_pad * (4 + 2) * 2)           # hw2 / z (+ casts)
    return 2 * (resident + temps) < vmem_limit


# ---------------- fused single-launch kernel (A resident in VMEM) ------------
def make_fused_kernel(num_classes):
    def fused_kernel(a_ref, x_ref, w1_ref, b1_ref, w2_ref, b2_ref, out_ref):
        a = a_ref[...]                                      # bf16, read once
        # conv1: transform + aggregation + bias + relu
        xw1 = jnp.dot(x_ref[...], w1_ref[...],
                      preferred_element_type=jnp.float32).astype(jnp.bfloat16)
        h = jnp.maximum(
            jnp.dot(a, xw1, preferred_element_type=jnp.float32) + b1_ref[...],
            0.0)
        # dropout -> identity (eval mode)
        # conv2: transform + aggregation + bias
        hw2 = jnp.dot(h.astype(jnp.bfloat16), w2_ref[...],
                      preferred_element_type=jnp.float32).astype(jnp.bfloat16)
        z = jnp.dot(a, hw2, preferred_element_type=jnp.float32) + b2_ref[...]
        # masked log_softmax over the first num_classes lanes (padded lanes -> 0)
        lane = lax.broadcasted_iota(jnp.int32, z.shape, 1)
        valid = lane < num_classes
        zm = jnp.where(valid, z, -1e30)
        m = jnp.max(zm, axis=1, keepdims=True)
        e = jnp.where(valid, jnp.exp(z - m), 0.0)
        s = jnp.sum(e, axis=1, keepdims=True)
        out_ref[...] = jnp.where(valid, z - m - jnp.log(s), 0.0)

    return fused_kernel


# ---------------- tiled fallback kernels (large N) ----------------------------
def layer1_agg_kernel(a_ref, xw_ref, b1_ref, w2_ref, out_ref, acc_ref):
    """acc += A_blk @ XW1_blk; finalize: h = relu(acc + b1); out = h @ W2 (bf16)."""
    k = pl.program_id(1)

    @pl.when(k == 0)
    def _init():
        acc_ref[...] = jnp.zeros_like(acc_ref)

    acc_ref[...] += jnp.dot(
        a_ref[...], xw_ref[...], preferred_element_type=jnp.float32)

    @pl.when(k == pl.num_programs(1) - 1)
    def _finalize():
        h = jnp.maximum(acc_ref[...] + b1_ref[...], 0.0)
        # dropout -> identity (eval mode)
        hw2 = jnp.dot(h.astype(w2_ref.dtype), w2_ref[...],
                      preferred_element_type=jnp.float32)
        out_ref[...] = hw2.astype(out_ref.dtype)


def make_layer2_agg_kernel(num_classes):
    def layer2_agg_kernel(a_ref, hw_ref, b2_ref, out_ref, acc_ref):
        """acc += A_blk @ HW2_blk; finalize: masked log_softmax(acc + b2)."""
        k = pl.program_id(1)

        @pl.when(k == 0)
        def _init():
            acc_ref[...] = jnp.zeros_like(acc_ref)

        acc_ref[...] += jnp.dot(
            a_ref[...], hw_ref[...], preferred_element_type=jnp.float32)

        @pl.when(k == pl.num_programs(1) - 1)
        def _finalize():
            z = acc_ref[...] + b2_ref[...]               # padded lanes are exactly 0
            lane = lax.broadcasted_iota(jnp.int32, z.shape, 1)
            valid = lane < num_classes
            zm = jnp.where(valid, z, -1e30)
            m = jnp.max(zm, axis=1, keepdims=True)
            e = jnp.where(valid, jnp.exp(z - m), 0.0)
            s = jnp.sum(e, axis=1, keepdims=True)
            out_ref[...] = jnp.where(valid, z - m - jnp.log(s), 0.0)

    return layer2_agg_kernel


# ------------------------------ wrapper ---------------------------------------
def gcn_forward(a_hat, x, w1, b1, w2, b2, *, block=512, force_tiled=False):
    n, f_in = x.shape
    hidden = w1.shape[1]
    num_classes = w2.shape[1]
    assert block % LANE == 0

    f_pad = _round_up(f_in, LANE)
    h_pad = _round_up(hidden, LANE)
    c_pad = _round_up(num_classes, LANE)
    vmem_limit = _vmem_limit_bytes()

    # Shared padded operands (exact zero padding); bf16 MXU operands, f32 biases.
    w1_p = _pad2d(w1, f_pad, h_pad).astype(jnp.bfloat16)
    w2_p = _pad2d(w2, h_pad, c_pad).astype(jnp.bfloat16)
    b1_p = _pad2d(b1.reshape(1, -1).astype(jnp.float32), 1, h_pad)
    b2_p = _pad2d(b2.reshape(1, -1).astype(jnp.float32), 1, c_pad)

    # -------- fused path: single launch, A read from HBM exactly once --------
    n_pad_f = _round_up(n, LANE)
    if not force_tiled and _fused_fits(n_pad_f, f_pad, h_pad, c_pad, vmem_limit):
        a_p = _pad2d(a_hat, n_pad_f, n_pad_f).astype(jnp.bfloat16)
        x_p = _pad2d(x, n_pad_f, f_pad).astype(jnp.bfloat16)
        out_p = pl.pallas_call(
            make_fused_kernel(num_classes),
            out_shape=jax.ShapeDtypeStruct((n_pad_f, c_pad), jnp.float32),
            compiler_params=pltpu.CompilerParams(vmem_limit_bytes=vmem_limit),
        )(a_p, x_p, w1_p, b1_p, w2_p, b2_p)
        return out_p[:n, :num_classes]

    # -------- tiled fallback (large N): two aggregation kernels --------------
    n_pad = _round_up(n, block)          # single block for rows & reduction axis
    gm = gk = n_pad // block
    a_p = _pad2d(a_hat, n_pad, n_pad).astype(jnp.bfloat16)
    # XW1 = X @ W1 is a tiny [N,128]x[128,128] matmul: compute ONCE with plain XLA
    # (no dedicated launch), keep bf16 for the MXU aggregation.
    xw1 = _pad2d(jnp.dot(x.astype(jnp.float32), w1.astype(jnp.float32)),
                 n_pad, h_pad).astype(jnp.bfloat16)

    par_arb = pltpu.CompilerParams(
        dimension_semantics=("parallel", "arbitrary"),
        vmem_limit_bytes=vmem_limit)

    # kernel A: HW2 = relu(A @ XW1 + b1) @ W2
    hw2 = pl.pallas_call(
        layer1_agg_kernel,
        out_shape=jax.ShapeDtypeStruct((n_pad, c_pad), jnp.bfloat16),
        grid=(gm, gk),
        in_specs=[pl.BlockSpec((block, block), lambda i, k: (i, k)),
                  pl.BlockSpec((block, h_pad), lambda i, k: (k, 0)),
                  pl.BlockSpec((1, h_pad), lambda i, k: (0, 0)),
                  pl.BlockSpec((h_pad, c_pad), lambda i, k: (0, 0))],
        out_specs=pl.BlockSpec((block, c_pad), lambda i, k: (i, 0)),
        scratch_shapes=[pltpu.VMEM((block, h_pad), jnp.float32)],
        compiler_params=par_arb,
    )(a_p, xw1, b1_p, w2_p)

    # kernel B: out = log_softmax(A @ HW2 + b2)
    out_p = pl.pallas_call(
        make_layer2_agg_kernel(num_classes),
        out_shape=jax.ShapeDtypeStruct((n_pad, c_pad), jnp.float32),
        grid=(gm, gk),
        in_specs=[pl.BlockSpec((block, block), lambda i, k: (i, k)),
                  pl.BlockSpec((block, c_pad), lambda i, k: (k, 0)),
                  pl.BlockSpec((1, c_pad), lambda i, k: (0, 0))],
        out_specs=pl.BlockSpec((block, c_pad), lambda i, k: (i, 0)),
        scratch_shapes=[pltpu.VMEM((block, c_pad), jnp.float32)],
        compiler_params=par_arb,
    )(a_p, hw2, b2_p)

    return out_p[:n, :num_classes]


# ------------------------------ JAX glue -------------------------------------
def build_gcn_adjacency(edge_index, edge_weight, num_nodes):
    """Dense normalized adjacency matching PyG gcn_norm (add self-loops, sym norm)."""
    row = edge_index[0]
    col = edge_index[1]
    loop = jnp.arange(num_nodes, dtype=edge_index.dtype)
    row = jnp.concatenate([row, loop])
    col = jnp.concatenate([col, loop])
    ew = jnp.concatenate([edge_weight, jnp.ones((num_nodes,), jnp.float32)])

    deg = jnp.zeros((num_nodes,), jnp.float32).at[col].add(ew)
    dinv = jnp.where(deg > 0, 1.0 / jnp.sqrt(deg), 0.0)
    norm = dinv[row] * ew * dinv[col]

    # message passing: out[col] += norm * xW[row]  ->  A[col, row] = norm
    a = jnp.zeros((num_nodes, num_nodes), jnp.float32).at[col, row].add(norm)
    return a


def reference_forward(a_hat, x, w1, b1, w2, b2):
    h = jnp.maximum(a_hat @ (x @ w1) + b1[None, :], 0.0)
    z = a_hat @ (h @ w2) + b2[None, :]
    return jax.nn.log_softmax(z, axis=1)


# -------------------------------- main ---------------------------------------
if __name__ == "__main__":
    key = jax.random.PRNGKey(0)

    # Synthetic graph consistent with load_data():
    #   num_features = 3 continuous (bandwidth, delay, variance) + 8 bool flags = 11
    N = 512        # nodes
    F_IN = 11      # data.num_features
    H = 16         # hidden (conv1 out)
    C = 2          # classes (conv2 out)
    E = 2048       # edges

    k_feat, k_edge, k_w, k_w1, k_w2 = jax.random.split(key, 5)
    x = jax.random.uniform(k_feat, (N, F_IN), dtype=jnp.float32)
    edge_index = jax.random.randint(k_edge, (2, E), 0, N, dtype=jnp.int32)
    edge_weight = jax.random.uniform(k_w, (E,), dtype=jnp.float32) * 0.5 + 0.25

    # Deterministic parameter init (GCNConv: glorot weights, zero bias)
    def glorot(k, shape):
        lim = jnp.sqrt(6.0 / (shape[0] + shape[1]))
        return jax.random.uniform(k, shape, jnp.float32, -lim, lim)

    w1 = glorot(k_w1, (F_IN, H))
    b1 = jnp.zeros((H,), jnp.float32)
    w2 = glorot(k_w2, (H, C))
    b2 = jnp.zeros((C,), jnp.float32)

    a_hat = build_gcn_adjacency(edge_index, edge_weight, N)
    ref = reference_forward(a_hat, x, w1, b1, w2, b2)

    # Fused single-launch path (A resident in VMEM) — the expected path at this size.
    out_fused = gcn_forward(a_hat, x, w1, b1, w2, b2)
    out_fused = jax.block_until_ready(out_fused)
    assert out_fused.shape == (N, C)
    assert jnp.allclose(out_fused, ref, atol=2e-2, rtol=2e-2), (
        float(jnp.max(jnp.abs(out_fused - ref))))

    # Tiled fallback path (exercised with a small block so grid=(2,2) is covered).
    out_tiled = gcn_forward(a_hat, x, w1, b1, w2, b2, block=256, force_tiled=True)
    out_tiled = jax.block_until_ready(out_tiled)
    assert out_tiled.shape == (N, C)
    assert jnp.allclose(out_tiled, ref, atol=2e-2, rtol=2e-2), (
        float(jnp.max(jnp.abs(out_tiled - ref))))

    print("KERNEL_OK")
</pallas_src>

<mosaic_0001>
module attributes {stable_mosaic.version = 11 : i64} {
  func.func @fused_kernel(%arg0: memref<512x512xbf16, #tpu.memory_space<vmem>>, %arg1: memref<512x128xbf16, #tpu.memory_space<vmem>>, %arg2: memref<128x128xbf16, #tpu.memory_space<vmem>>, %arg3: memref<1x128xf32, #tpu.memory_space<vmem>>, %arg4: memref<128x128xbf16, #tpu.memory_space<vmem>>, %arg5: memref<1x128xf32, #tpu.memory_space<vmem>>, %arg6: memref<512x128xf32, #tpu.memory_space<vmem>>) attributes {dimension_semantics = [], scalar_prefetch = 0 : i64, scratch_operands = 0 : i64, tpu.core_type = #tpu.core_type<tc>} {
    %c0 = arith.constant 0 : index
    %c0_0 = arith.constant 0 : index
    %0 = vector.load %arg0[%c0, %c0_0] : memref<512x512xbf16, #tpu.memory_space<vmem>>, vector<512x512xbf16>
    %c0_1 = arith.constant 0 : index
    %c0_2 = arith.constant 0 : index
    %1 = vector.load %arg1[%c0_1, %c0_2] : memref<512x128xbf16, #tpu.memory_space<vmem>>, vector<512x128xbf16>
    %c0_3 = arith.constant 0 : index
    %c0_4 = arith.constant 0 : index
    %2 = vector.load %arg2[%c0_3, %c0_4] : memref<128x128xbf16, #tpu.memory_space<vmem>>, vector<128x128xbf16>
    %cst = arith.constant dense<0.000000e+00> : vector<512x128xf32>
    %3 = tpu.matmul %1, %2, %cst {dimension_numbers = #tpu.dot_dimension_numbers<[1], [0], [0], [1], [0, 0, 1, 1], [], []>} : vector<512x128xbf16>, vector<128x128xbf16>, vector<512x128xf32> -> vector<512x128xf32>
    %4 = arith.truncf %3 : vector<512x128xf32> to vector<512x128xbf16>
    %cst_5 = arith.constant dense<0.000000e+00> : vector<512x128xf32>
    %5 = tpu.matmul %0, %4, %cst_5 {dimension_numbers = #tpu.dot_dimension_numbers<[1], [0], [0], [1], [0, 0, 1, 1], [], []>} : vector<512x512xbf16>, vector<512x128xbf16>, vector<512x128xf32> -> vector<512x128xf32>
    %c0_6 = arith.constant 0 : index
    %c0_7 = arith.constant 0 : index
    %6 = vector.load %arg3[%c0_6, %c0_7] : memref<1x128xf32, #tpu.memory_space<vmem>>, vector<1x128xf32>
    %7 = vector.broadcast %6 : vector<1x128xf32> to vector<512x128xf32>
    %8 = arith.addf %5, %7 : vector<512x128xf32>
    %cst_8 = arith.constant 0.000000e+00 : f32
    %9 = vector.broadcast %cst_8 : f32 to vector<512x128xf32>
    %10 = arith.maximumf %8, %9 : vector<512x128xf32>
    %11 = arith.truncf %10 : vector<512x128xf32> to vector<512x128xbf16>
    %c0_9 = arith.constant 0 : index
    %c0_10 = arith.constant 0 : index
    %12 = vector.load %arg4[%c0_9, %c0_10] : memref<128x128xbf16, #tpu.memory_space<vmem>>, vector<128x128xbf16>
    %cst_11 = arith.constant dense<0.000000e+00> : vector<512x128xf32>
    %13 = tpu.matmul %11, %12, %cst_11 {dimension_numbers = #tpu.dot_dimension_numbers<[1], [0], [0], [1], [0, 0, 1, 1], [], []>} : vector<512x128xbf16>, vector<128x128xbf16>, vector<512x128xf32> -> vector<512x128xf32>
    %14 = arith.truncf %13 : vector<512x128xf32> to vector<512x128xbf16>
    %cst_12 = arith.constant dense<0.000000e+00> : vector<512x128xf32>
    %15 = tpu.matmul %0, %14, %cst_12 {dimension_numbers = #tpu.dot_dimension_numbers<[1], [0], [0], [1], [0, 0, 1, 1], [], []>} : vector<512x512xbf16>, vector<512x128xbf16>, vector<512x128xf32> -> vector<512x128xf32>
    %c0_13 = arith.constant 0 : index
    %c0_14 = arith.constant 0 : index
    %16 = vector.load %arg5[%c0_13, %c0_14] : memref<1x128xf32, #tpu.memory_space<vmem>>, vector<1x128xf32>
    %17 = vector.broadcast %16 : vector<1x128xf32> to vector<512x128xf32>
    %18 = arith.addf %15, %17 : vector<512x128xf32>
    %19 = tpu.iota {dimensions = array<i32: 1>} : vector<512x128xi32>
    %c2_i32 = arith.constant 2 : i32
    %20 = vector.broadcast %c2_i32 : i32 to vector<512x128xi32>
    %21 = arith.cmpi slt, %19, %20 : vector<512x128xi32>
    %cst_15 = arith.constant -1.000000e+30 : f32
    %22 = vector.broadcast %cst_15 : f32 to vector<512x128xf32>
    %23 = arith.select %21, %18, %22 : vector<512x128xi1>, vector<512x128xf32>
    %cst_16 = arith.constant dense<0xFF800000> : vector<512xf32>
    %24 = vector.multi_reduction <maximumf>, %23, %cst_16 [1] : vector<512x128xf32> to vector<512xf32>
    %25 = vector.shape_cast %24 : vector<512xf32> to vector<512x1xf32>
    %26 = vector.broadcast %25 : vector<512x1xf32> to vector<512x128xf32>
    %27 = arith.subf %18, %26 : vector<512x128xf32>
    %28 = math.exp %27 : vector<512x128xf32>
    %cst_17 = arith.constant 0.000000e+00 : f32
    %29 = vector.broadcast %cst_17 : f32 to vector<512x128xf32>
    %30 = arith.select %21, %28, %29 : vector<512x128xi1>, vector<512x128xf32>
    %cst_18 = arith.constant dense<0.000000e+00> : vector<512xf32>
    %31 = vector.multi_reduction <add>, %30, %cst_18 [1] : vector<512x128xf32> to vector<512xf32>
    %32 = vector.shape_cast %31 : vector<512xf32> to vector<512x1xf32>
    %33 = vector.broadcast %25 : vector<512x1xf32> to vector<512x128xf32>
    %34 = arith.subf %18, %33 : vector<512x128xf32>
    %35 = math.log %32 : vector<512x1xf32>
    %36 = vector.broadcast %35 : vector<512x1xf32> to vector<512x128xf32>
    %37 = arith.subf %34, %36 : vector<512x128xf32>
    %cst_19 = arith.constant 0.000000e+00 : f32
    %38 = vector.broadcast %cst_19 : f32 to vector<512x128xf32>
    %39 = arith.select %21, %37, %38 : vector<512x128xi1>, vector<512x128xf32>
    %c0_20 = arith.constant 0 : index
    %c0_21 = arith.constant 0 : index
    %40 = vector.load %arg6[%c0_20, %c0_21] : memref<512x128xf32, #tpu.memory_space<vmem>>, vector<512x128xf32>
    tpu.vector_store %arg6[%c0_20, %c0_21], %39 {strides = array<i32>} : memref<512x128xf32, #tpu.memory_space<vmem>>, vector<512x128xf32>,
    return
  }
}

</mosaic_0001>

<bundles_post_ra>
// kernel: tpu_custom_call.1
= control target key start
LH: loop header
LB: loop body
LE: loop exit
PB: predicated region body
PF: predicated region fallthrough
CT: control target
= control target key end

     0   :  { %11 = vsyncpa [#allocation3], 0  ;;  %s6838_s0 = inlined_call_operand.hbm [shape: bf16[512,512], index: 0, kind: input, shape index: {}]   ;;  %s6839_s1 = inlined_call_operand.hbm [shape: bf16[512,128], index: 1, kind: input, shape index: {}]   ;;  %s6840_s2 = inlined_call_operand.hbm [shape: bf16[128,128], index: 2, kind: input, shape index: {}]   ;;  %s6841_s3 = inlined_call_operand.vmem [shape: f32[1,128], index: 3, kind: input, shape index: {}]   ;;  %s6842_s4 = inlined_call_operand.hbm [shape: bf16[128,128], index: 4, kind: input, shape index: {}]   ;;  %s6843_s5 = inlined_call_operand.vmem [shape: f32[1,128], index: 5, kind: input, shape index: {}]   ;;  %s6844_s6 = inlined_call_operand.hbm [shape: f32[512,128], index: 6, kind: output, shape index: {}]  }
   0x1   :  { %12 = vsyncpa [#allocation6], 0 }
   0x2   :  { %13 = vsyncpa [#allocation9], 0 }
   0x3   :  { %14 = vsyncpa [#allocation4], 0  ;;  %s5614_s21 = smov [#allocation5]   ;;  %s5496_s25 = scalar_lea.hbm %s6839_s1, 4096 }
   0x4   :  { %s32_s22 = sshll.u32 %s5614_s21, 4  ;;  %p5497_p0 = scmp.ne.s32.totalorder %s6839_s1, %s5496_s25  ;;  %s33_s22 = int_to_ptr.vmem [resolvable:$true] %s32_s22 }
   0x5   :  { %p5500_p1 = scmp.lt.u32.totalorder %s5496_s25, %s6839_s1 }
   0x7   :  { %p5502_p2 = pnand %p5500_p1, %p5497_p0 }
   0x9   :  { %5505 = shalt.err (!%p5502_p2)
}
   0xa   :  { %s5506_s30 = scalar_lea.vmem %s33_s22, 4096  ;;  %p5511_p4 = scmp.lt.s32.totalorder %s33_s22, %s33_s22 }
   0xb   :  { %p5507_p3 = scmp.ne.s32.totalorder %s33_s22, %s5506_s30  ;;  %p5512_p5 = scmp.lt.s32.totalorder %s5506_s30, %s5506_s30 }
   0xd   :  { %p5513_p6 = por %p5512_p5, %p5511_p4 }
   0xf   :  { %p5514_p7 = pnand %p5513_p6, %p5507_p3 }
  0x11   :  { %5517 = shalt.err (!%p5514_p7)
}
  0x12   :  { %s5615_s7 = smov 64   ;;  %s5616_s8 = smov 4  }
  0x13   :  { %38 = dma.hbm_to_vmem [thread:$0]  %s6839_s1, 4096, %s33_s22, [#allocation6], %s5615_s7, %s5615_s7, %s5616_s8  }
  0x14   :  { %s5617_s11 = smov [#allocation2]   ;;  %s5518_s15 = scalar_lea.hbm %s6838_s0, 16384 }
  0x15   :  { %s20_s12 = sshll.u32 %s5617_s11, 4  ;;  %p5519_p8 = scmp.ne.s32.totalorder %s6838_s0, %s5518_s15  ;;  %s21_s12 = int_to_ptr.vmem [resolvable:$true] %s20_s12 }
  0x16   :  { %p5522_p9 = scmp.lt.u32.totalorder %s5518_s15, %s6838_s0 }
  0x18   :  { %p5524_p10 = pnand %p5522_p9, %p5519_p8 }
  0x1a   :  { %5527 = shalt.err (!%p5524_p10)
}
  0x1b   :  { %s5528_s20 = scalar_lea.vmem %s21_s12, 16384  ;;  %p5533_p12 = scmp.lt.s32.totalorder %s21_s12, %s21_s12 }
  0x1c   :  { %p5529_p11 = scmp.ne.s32.totalorder %s21_s12, %s5528_s20  ;;  %p5534_p13 = scmp.lt.s32.totalorder %s5528_s20, %s5528_s20 }
  0x1e   :  { %p5535_p0 = por %p5534_p13, %p5533_p12 }
  0x20   :  { %p5536_p1 = pnand %p5535_p0, %p5529_p11 }
  0x22   :  { %5539 = shalt.err (!%p5536_p1)
}
  0x23   :  { %s5618_s1 = smov 256   ;;  %s5619_s21 = smov 16  }
  0x24   :  { %26 = dma.hbm_to_vmem [thread:$0]  %s6838_s0, 16384, %s21_s12, [#allocation3], %s5618_s1, %s5618_s1, %s5619_s21  }
  0x25   :  { %s5620_s24 = smov [#allocation7]   ;;  %s5621_s26 = smov [#allocation8]  }
  0x26   :  { %s44_s25 = sshll.u32 %s5620_s24, 4  ;;  %s58_s27 = sshll.u32 %s5621_s26, 4  ;;  %s45_s25 = int_to_ptr.vmem [resolvable:$true] %s44_s25  ;;  %s5688_s27 = int_to_ptr.vmem [resolvable:$true] %s58_s27 }
  0x27   :  { %s5540_s30 = scalar_lea.hbm %s6840_s2, 1024 }
  0x28   :  { %p5541_p2 = scmp.ne.s32.totalorder %s6840_s2, %s5540_s30  ;;  %p5544_p3 = scmp.lt.u32.totalorder %s5540_s30, %s6840_s2 }
  0x2a   :  { %p5546_p4 = pnand %p5544_p3, %p5541_p2 }
  0x2c   :  { %5549 = shalt.err (!%p5546_p4)
}
  0x2d   :  { %s5550_s0 = scalar_lea.vmem %s45_s25, 1024  ;;  %p5555_p6 = scmp.lt.s32.totalorder %s45_s25, %s45_s25 }
  0x2e   :  { %p5551_p5 = scmp.ne.s32.totalorder %s45_s25, %s5550_s0  ;;  %p5556_p7 = scmp.lt.s32.totalorder %s5550_s0, %s5550_s0 }
  0x30   :  { %p5557_p8 = por %p5556_p7, %p5555_p6 }
  0x32   :  { %p5558_p9 = pnand %p5557_p8, %p5551_p5 }
  0x34   :  { %5561 = shalt.err (!%p5558_p9)
}
  0x35   :  { %50 = dma.hbm_to_vmem [thread:$0]  %s6840_s2, 1024, %s45_s25, [#allocation6], %s5615_s7, %s5615_s7, %s5616_s8  }
  0x36   :  { %s5562_s17 = scalar_lea.hbm %s6842_s4, 1024 }
  0x37   :  { %p5563_p10 = scmp.ne.s32.totalorder %s6842_s4, %s5562_s17  ;;  %p5566_p11 = scmp.lt.u32.totalorder %s5562_s17, %s6842_s4 }
  0x39   :  { %p5568_p12 = pnand %p5566_p11, %p5563_p10 }
  0x3b   :  { %5571 = shalt.err (!%p5568_p12)
}
  0x3c   :  { %s5572_s21 = scalar_lea.vmem %s5688_s27, 1024  ;;  %p5577_p0 = scmp.lt.s32.totalorder %s5688_s27, %s5688_s27 }
  0x3d   :  { %p5573_p13 = scmp.ne.s32.totalorder %s5688_s27, %s5572_s21  ;;  %p5578_p1 = scmp.lt.s32.totalorder %s5572_s21, %s5572_s21 }
  0x3f   :  { %p5579_p2 = por %p5578_p1, %p5577_p0 }
  0x41   :  { %p5580_p3 = pnand %p5579_p2, %p5573_p13 }
  0x43   :  { %5583 = shalt.err (!%p5580_p3)
}
  0x44   :  { %64 = dma.hbm_to_vmem [thread:$0]  %s6842_s4, 1024, %s5688_s27, [#allocation9], %s5615_s7, %s5615_s7, %s5616_s8  }
  0x45   :  { %5606 = dma.done.wait [#allocation3], 16384  }
  0x46   :  { %5607 = vsyncadd [#allocation3], 4294950912 }
  0x47   :  { %5608 = dma.done.wait [#allocation6], 5120  }
  0x48   :  { %5609 = vsyncadd [#allocation6], 4294962176 }
  0x49   :  { %5610 = dma.done.wait [#allocation9], 1024  }
  0x4a   :  { %5611 = vsyncadd [#allocation9], 4294966272  ;;  %v4872_v0 = vld [vmem:[#allocation7] sm:$0xff]   ;;  %v4873_v1 = vld [vmem:[#allocation7 + $0x8] sm:$0xff]   ;;  %v5622_v32 = vmov 0  }
  0x4b   :  { %4316 = vmatprep.subr.bf16.mxu1 %v4872_v0  ;;  %v4874_v2 = vld [vmem:[#allocation7 + $0x10] sm:$0xff]   ;;  %v4875_v3 = vld [vmem:[#allocation7 + $0x18] sm:$0xff]   ;;  %v4880_v4 = vld [vmem:[#allocation5] sm:$0xff]  }
  0x4c   :  { %4317 = vmatpush3.bf16.msra.mxu1 %v4872_v0  ;;  %4332 = vmatprep.mubr.bf16.mxu1 %v4880_v4  ;;  %v4876_v5 = vld [vmem:[#allocation7 + $0x20] sm:$0xff]   ;;  %v4877_v6 = vld [vmem:[#allocation7 + $0x28] sm:$0xff]   ;;  %v4878_v7 = vld [vmem:[#allocation7 + $0x30] sm:$0xff]  }
  0x4d   :  { %4318 = vmatprep.subr.bf16.mxu1 %v4873_v1  ;;  %v4879_v8 = vld [vmem:[#allocation7 + $0x38] sm:$0xff]   ;;  %v4881_v9 = vld [vmem:[#allocation5 + $0x8] sm:$0xff]   ;;  %v4882_v10 = vld [vmem:[#allocation5 + $0x10] sm:$0xff]  }
  0x4e   :  { %v4883_v11 = vld [vmem:[#allocation5 + $0x18] sm:$0xff]   ;;  %v4884_v12 = vld [vmem:[#allocation5 + $0x20] sm:$0xff]   ;;  %v4885_v13 = vld [vmem:[#allocation5 + $0x28] sm:$0xff]  }
  0x4f   :  { %v4886_v14 = vld [vmem:[#allocation5 + $0x30] sm:$0xff]   ;;  %v4887_v15 = vld [vmem:[#allocation5 + $0x38] sm:$0xff]   ;;  %v4888_v16 = vld [vmem:[#allocation5 + $0x40] sm:$0xff]  }
  0x50   :  { %4319 = vmatpush3.bf16.msra.mxu1 %v4873_v1  ;;  %v4889_v17 = vld [vmem:[#allocation5 + $0x48] sm:$0xff]   ;;  %v4890_v18 = vld [vmem:[#allocation5 + $0x50] sm:$0xff]   ;;  %v4891_v19 = vld [vmem:[#allocation5 + $0x58] sm:$0xff]  }
  0x51   :  { %4320 = vmatprep.subr.bf16.mxu1 %v4874_v2  ;;  %v4892_v20 = vld [vmem:[#allocation5 + $0x60] sm:$0xff]   ;;  %v4893_v21 = vld [vmem:[#allocation5 + $0x68] sm:$0xff]   ;;  %v4894_v22 = vld [vmem:[#allocation5 + $0x70] sm:$0xff]  }
  0x52   :  { %v4895_v23 = vld [vmem:[#allocation5 + $0x78] sm:$0xff]   ;;  %v4896_v24 = vld [vmem:[#allocation5 + $0x80] sm:$0xff]   ;;  %v4897_v25 = vld [vmem:[#allocation5 + $0x88] sm:$0xff]  }
  0x53   :  { %v4898_v26 = vld [vmem:[#allocation5 + $0x90] sm:$0xff]   ;;  %v4899_v27 = vld [vmem:[#allocation5 + $0x98] sm:$0xff]   ;;  %v4900_v28 = vld [vmem:[#allocation5 + $0xa0] sm:$0xff]  }
  0x54   :  { %4321 = vmatpush3.bf16.msra.mxu1 %v4874_v2  ;;  %v4901_v29 = vld [vmem:[#allocation5 + $0xa8] sm:$0xff]   ;;  %v4902_v30 = vld [vmem:[#allocation5 + $0xb0] sm:$0xff]   ;;  %v4903_v31 = vld [vmem:[#allocation5 + $0xb8] sm:$0xff]  }
  0x55   :  { %4322 = vmatprep.subr.bf16.mxu1 %v4875_v3  ;;  %v4904_v33 = vld [vmem:[#allocation5 + $0xc0] sm:$0xff]   ;;  %v4905_v34 = vld [vmem:[#allocation5 + $0xc8] sm:$0xff]   ;;  %v4906_v35 = vld [vmem:[#allocation5 + $0xd0] sm:$0xff]  }
  0x56   :  { %v4907_v36 = vld [vmem:[#allocation5 + $0xd8] sm:$0xff]   ;;  %v4908_v37 = vld [vmem:[#allocation5 + $0xe0] sm:$0xff]   ;;  %v4909_v38 = vld [vmem:[#allocation5 + $0xe8] sm:$0xff]  }
  0x57   :  { %v4910_v39 = vld [vmem:[#allocation5 + $0xf0] sm:$0xff]   ;;  %v4911_v40 = vld [vmem:[#allocation5 + $0xf8] sm:$0xff]  }
  0x58   :  { %4323 = vmatpush3.bf16.msra.mxu1 %v4875_v3  ;;  %v4914_v41 = vld [vmem:[#allocation2 + $0x4] ss:$16 sps:$4 sm:$0xff]  }
  0x59   :  { %4324 = vmatprep.subr.bf16.mxu1 %v4876_v5 }
  0x5c   :  { %4325 = vmatpush3.bf16.msra.mxu1 %v4876_v5 }
  0x5d   :  { %4326 = vmatprep.subr.bf16.mxu1 %v4877_v6 }
  0x60   :  { %4327 = vmatpush3.bf16.msra.mxu1 %v4877_v6 }
  0x61   :  { %4328 = vmatprep.subr.bf16.mxu1 %v4878_v7 }
  0x64   :  { %4329 = vmatpush3.bf16.msra.mxu1 %v4878_v7 }
  0x65   :  { %4330 = vmatprep.subr.bf16.mxu1 %v4879_v8 }
  0x68   :  { %4331 = vmatpush3.bf16.msra.mxu1 %v4879_v8 }
  0x69   :  { %1496 = vmatprep.subr.bf16.mxu1 %v5622_v32 }
  0x6b   :  { %4333 = vmatmul.mubr.bf16.vlgmr.msra.gmra.mrb[0].mxu1 %v4881_v9 }
  0x6c   :  { %4336 = vmatprep.mubr.bf16.mxu1 %v4882_v10 }
  0x73   :  { %4337 = vmatmul.mubr.bf16.gmra.mrb[4].mxu1 %v4883_v11 }
  0x74   :  { %4340 = vmatprep.mubr.bf16.mxu1 %v4884_v12 }
  0x7b   :  { %4341 = vmatmul.mubr.bf16.gmra.mrb[8].mxu1 %v4885_v13 }
  0x7c   :  { %4344 = vmatprep.mubr.bf16.mxu1 %v4886_v14 }
  0x83   :  { %4345 = vmatmul.mubr.bf16.gmra.mrb[12].mxu1 %v4887_v15 }
  0x84   :  { %4348 = vmatprep.mubr.bf16.mxu1 %v4888_v16 }
  0x8b   :  { %4349 = vmatmul.mubr.bf16.gmra.mrb[16].mxu1 %v4889_v17 }
  0x8c   :  { %4352 = vmatprep.mubr.bf16.mxu1 %v4890_v18 }
  0x93   :  { %4353 = vmatmul.mubr.bf16.gmra.mrb[20].mxu1 %v4891_v19 }
  0x94   :  { %4356 = vmatprep.mubr.bf16.mxu1 %v4892_v20 }
  0x9b   :  { %4357 = vmatmul.mubr.bf16.gmra.mrb[24].mxu1 %v4893_v21 }
  0x9c   :  { %4360 = vmatprep.mubr.bf16.mxu1 %v4894_v22 }
  0xa3   :  { %4361 = vmatmul.mubr.bf16.gmra.mrb[28].mxu1 %v4895_v23 }
  0xa4   :  { %4364 = vmatprep.mubr.bf16.mxu1 %v4896_v24 }
  0xab   :  { %4365 = vmatmul.mubr.bf16.gmra.mrb[32].mxu1 %v4897_v25 }
  0xac   :  { %4368 = vmatprep.mubr.bf16.mxu1 %v4898_v26 }
  0xb3   :  { %4369 = vmatmul.mubr.bf16.gmra.mrb[36].mxu1 %v4899_v27  ;;  %v4912_v27 = vld [vmem:[#allocation2] ss:$16 sps:$4 sm:$0xff]  }
  0xb4   :  { %4372 = vmatprep.mubr.bf16.mxu1 %v4900_v28 }
  0xbb   :  { %4373 = vmatmul.mubr.bf16.gmra.mrb[40].mxu1 %v4901_v29  ;;  %v4915_v29 = vld [vmem:[#allocation2 + $0x24] ss:$16 sps:$4 sm:$0xff]  }
  0xbc   :  { %4376 = vmatprep.mubr.bf16.mxu1 %v4902_v30 }
  0xc3   :  { %4377 = vmatmul.mubr.bf16.gmra.mrb[44].mxu1 %v4903_v31 }
  0xc4   :  { %4380 = vmatprep.mubr.bf16.mxu1 %v4904_v33 }
  0xcb   :  { %4381 = vmatmul.mubr.bf16.gmra.mrb[48].mxu1 %v4905_v34 }
  0xcc   :  { %4384 = vmatprep.mubr.bf16.mxu1 %v4906_v35 }
  0xd3   :  { %4385 = vmatmul.mubr.bf16.gmra.mrb[52].mxu1 %v4907_v36  ;;  %v4917_v36 = vld [vmem:[#allocation2 + $0x20] ss:$16 sps:$4 sm:$0xff]  }
  0xd4   :  { %4388 = vmatprep.mubr.bf16.mxu1 %v4908_v37 }
  0xdb   :  { %4389 = vmatmul.mubr.bf16.gmra.mrb[56].mxu1 %v4909_v38  ;;  %v4918_v38 = vld [vmem:[#allocation2 + $0x44] ss:$16 sps:$4 sm:$0xff]  }
  0xdc   :  { %4392 = vmatprep.mubr.bf16.mxu1 %v4910_v39 }
  0xe3   :  { %4393 = vmatmul.mubr.bf16.gmra.mrb[60].mxu1 %v4911_v40 }
  0xe4   :  { %1528 = vmatprep.mubr.bf16.mxu1 %v4914_v41 }
 0x13e   :  { %v4334_v42 = vpop.f32.mrb[0].mxu1 }
 0x13f   :  { %v562_v43 = vpop.f32.mrb[1].mxu1 }
 0x140   :  { %v4335_v44 = vpop.f32.mrb[2].mxu1 }
 0x141   :  { %v818_v45 = vpack.c.bf16 %v4335_v44, %v4334_v42  ;;  %v565_v46 = vpop.f32.mrb[3].mxu1  ;;  %v4920_v44 = vld [vmem:[#allocation2 + $0x40] ss:$16 sps:$4 sm:$0xff]  }
 0x142   :  { %v817_v47 = vpack.c.bf16 %v565_v46, %v562_v43  ;;  %v4921_v46 = vld [vmem:[#allocation2 + $0x64] ss:$16 sps:$4 sm:$0xff]  }
 0x144   :  { %1497 = vmatpush1.bf16.msra.mxu1 %v817_v47 }
 0x145   :  { %1498 = vmatprep.subr.bf16.mxu1 %v5622_v32 }
 0x146   :  { %v4338_v48 = vpop.f32.mrb[4].mxu1 }
 0x147   :  { %v578_v49 = vpop.f32.mrb[5].mxu1 }
 0x148   :  { %v4339_v50 = vpop.f32.mrb[6].mxu1  ;;  %1499 = vmatpush1.bf16.msra.mxu1 %v818_v45 }
 0x149   :  { %v820_v51 = vpack.c.bf16 %v4339_v50, %v4338_v48  ;;  %v581_v52 = vpop.f32.mrb[7].mxu1  ;;  %1500 = vmatprep.subr.bf16.mxu1 %v5622_v32 }
 0x14a   :  { %v819_v53 = vpack.c.bf16 %v581_v52, %v578_v49  ;;  %v4924_v52 = vld [vmem:[#allocation2 + $0x84] ss:$16 sps:$4 sm:$0xff]  }
 0x14c   :  { %1501 = vmatpush1.bf16.msra.mxu1 %v819_v53 }
 0x14d   :  { %1502 = vmatprep.subr.bf16.mxu1 %v5622_v32 }
 0x14e   :  { %v4342_v54 = vpop.f32.mrb[8].mxu1 }
 0x14f   :  { %v594_v55 = vpop.f32.mrb[9].mxu1 }
 0x150   :  { %v4343_v56 = vpop.f32.mrb[10].mxu1  ;;  %1503 = vmatpush1.bf16.msra.mxu1 %v820_v51  ;;  %v4923_v51 = vld [vmem:[#allocation2 + $0x60] ss:$16 sps:$4 sm:$0xff]  }
 0x151   :  { %v822_v57 = vpack.c.bf16 %v4343_v56, %v4342_v54  ;;  %v597_v58 = vpop.f32.mrb[11].mxu1  ;;  %1504 = vmatprep.subr.bf16.mxu1 %v5622_v32 }
 0x152   :  { %v821_v59 = vpack.c.bf16 %v597_v58, %v594_v55 }
 0x154   :  { %1505 = vmatpush1.bf16.msra.mxu1 %v821_v59  ;;  %v4926_v59 = vld [vmem:[#allocation2 + $0x80] ss:$16 sps:$4 sm:$0xff]  }
 0x155   :  { %1506 = vmatprep.subr.bf16.mxu1 %v5622_v32 }
 0x156   :  { %v4346_v60 = vpop.f32.mrb[12].mxu1 }
 0x157   :  { %v610_v61 = vpop.f32.mrb[13].mxu1 }
 0x158   :  { %v4347_v62 = vpop.f32.mrb[14].mxu1  ;;  %1507 = vmatpush1.bf16.msra.mxu1 %v822_v57 }
 0x159   :  { %v824_v63 = vpack.c.bf16 %v4347_v62, %v4346_v60  ;;  %v613_v0 = vpop.f32.mrb[15].mxu1  ;;  %1508 = vmatprep.subr.bf16.mxu1 %v5622_v32  ;;  %v4927_v60 = vld [vmem:[#allocation2 + $0xa4] ss:$16 sps:$4 sm:$0xff]  }
 0x15a   :  { %v823_v1 = vpack.c.bf16 %v613_v0, %v610_v61  ;;  %v4929_v61 = vld [vmem:[#allocation2 + $0xa0] ss:$16 sps:$4 sm:$0xff]   ;;  %v4930_v62 = vld [vmem:[#allocation2 + $0xc4] ss:$16 sps:$4 sm:$0xff]  }
 0x15c   :  { %1509 = vmatpush1.bf16.msra.mxu1 %v823_v1  ;;  %v4933_v1 = vld [vmem:[#allocation2 + $0xe4] ss:$16 sps:$4 sm:$0xff]  }
 0x15d   :  { %1510 = vmatprep.subr.bf16.mxu1 %v5622_v32 }
 0x15e   :  { %v4350_v2 = vpop.f32.mrb[16].mxu1 }
 0x15f   :  { %v626_v3 = vpop.f32.mrb[17].mxu1 }
 0x160   :  { %v4351_v4 = vpop.f32.mrb[18].mxu1  ;;  %1511 = vmatpush1.bf16.msra.mxu1 %v824_v63  ;;  %v4932_v63 = vld [vmem:[#allocation2 + $0xc0] ss:$16 sps:$4 sm:$0xff]  }
 0x161   :  { %v826_v5 = vpack.c.bf16 %v4351_v4, %v4350_v2  ;;  %v629_v6 = vpop.f32.mrb[19].mxu1  ;;  %1512 = vmatprep.subr.bf16.mxu1 %v5622_v32 }
 0x162   :  { %v825_v7 = vpack.c.bf16 %v629_v6, %v626_v3 }
 0x164   :  { %1513 = vmatpush1.bf16.msra.mxu1 %v825_v7  ;;  %v4935_v7 = vld [vmem:[#allocation2 + $0xe0] ss:$16 sps:$4 sm:$0xff]  }
 0x165   :  { %1514 = vmatprep.subr.bf16.mxu1 %v5622_v32 }
 0x166   :  { %v4354_v8 = vpop.f32.mrb[20].mxu1 }
 0x167   :  { %v642_v9 = vpop.f32.mrb[21].mxu1 }
 0x168   :  { %v4355_v10 = vpop.f32.mrb[22].mxu1  ;;  %1515 = vmatpush1.bf16.msra.mxu1 %v826_v5 }
 0x169   :  { %v828_v11 = vpack.c.bf16 %v4355_v10, %v4354_v8  ;;  %v645_v12 = vpop.f32.mrb[23].mxu1  ;;  %1516 = vmatprep.subr.bf16.mxu1 %v5622_v32 }
 0x16a   :  { %v827_v13 = vpack.c.bf16 %v645_v12, %v642_v9  ;;  %v4936_v9 = vld [vmem:[#allocation2 + $0x104] ss:$16 sps:$4 sm:$0xff]  }
 0x16c   :  { %1517 = vmatpush1.bf16.msra.mxu1 %v827_v13 }
 0x16d   :  { %1518 = vmatprep.subr.bf16.mxu1 %v5622_v32 }
 0x16e   :  { %v4358_v14 = vpop.f32.mrb[24].mxu1 }
 0x16f   :  { %v658_v15 = vpop.f32.mrb[25].mxu1 }
 0x170   :  { %v4359_v16 = vpop.f32.mrb[26].mxu1  ;;  %1519 = vmatpush1.bf16.msra.mxu1 %v828_v11 }
 0x171   :  { %v830_v17 = vpack.c.bf16 %v4359_v16, %v4358_v14  ;;  %v661_v18 = vpop.f32.mrb[27].mxu1  ;;  %1520 = vmatprep.subr.bf16.mxu1 %v5622_v32  ;;  %v4938_v14 = vld [vmem:[#allocation2 + $0x100] ss:$16 sps:$4 sm:$0xff]  }
 0x172   :  { %v829_v19 = vpack.c.bf16 %v661_v18, %v658_v15 }
 0x174   :  { %1521 = vmatpush1.bf16.msra.mxu1 %v829_v19 }
 0x175   :  { %1522 = vmatprep.subr.bf16.mxu1 %v5622_v32 }
 0x176   :  { %v4362_v20 = vpop.f32.mrb[28].mxu1 }
 0x177   :  { %v674_v21 = vpop.f32.mrb[29].mxu1 }
 0x178   :  { %v4363_v22 = vpop.f32.mrb[30].mxu1  ;;  %1523 = vmatpush1.bf16.msra.mxu1 %v830_v17  ;;  %v4939_v17 = vld [vmem:[#allocation2 + $0x124] ss:$16 sps:$4 sm:$0xff]  }
 0x179   :  { %v832_v23 = vpack.c.bf16 %v4363_v22, %v4362_v20  ;;  %v677_v24 = vpop.f32.mrb[31].mxu1  ;;  %1524 = vmatprep.subr.bf16.mxu1 %v5622_v32  ;;  %v4941_v22 = vld [vmem:[#allocation2 + $0x120] ss:$16 sps:$4 sm:$0xff]  }
 0x17a   :  { %v831_v25 = vpack.c.bf16 %v677_v24, %v674_v21 }
 0x17c   :  { %1525 = vmatpush1.bf16.msra.mxu1 %v831_v25  ;;  %v4942_v25 = vld [vmem:[#allocation2 + $0x144] ss:$16 sps:$4 sm:$0xff]  }
 0x17d   :  { %1526 = vmatprep.subr.bf16.mxu1 %v5622_v32 }
 0x17e   :  { %v4366_v26 = vpop.f32.mrb[32].mxu1 }
 0x17f   :  { %v690_v28 = vpop.f32.mrb[33].mxu1 }
 0x180   :  { %1527 = vmatpush1.bf16.msra.mxu1 %v832_v23  ;;  %v4367_v30 = vpop.f32.mrb[34].mxu1 }
 0x181   :  { %v834_v31 = vpack.c.bf16 %v4367_v30, %v4366_v26  ;;  %v693_v33 = vpop.f32.mrb[35].mxu1  ;;  %1785 = vmatprep.subr.bf16.mxu1 %v5622_v32  ;;  %v4944_v30 = vld [vmem:[#allocation2 + $0x140] ss:$16 sps:$4 sm:$0xff]  }
 0x182   :  { %v833_v34 = vpack.c.bf16 %v693_v33, %v690_v28  ;;  %v4945_v33 = vld [vmem:[#allocation2 + $0x164] ss:$16 sps:$4 sm:$0xff]  }
 0x183   :  { %1529 = vmatmul.mubr.bf16.vlgmr.msra.gmra.mrb[64].mxu1 %v4912_v27 }
 0x184   :  { %1536 = vmatprep.mubr.bf16.mxu1 %v4915_v29  ;;  %1786 = vmatpush1.bf16.msra.mxu1 %v833_v34  ;;  %v4947_v34 = vld [vmem:[#allocation2 + $0x160] ss:$16 sps:$4 sm:$0xff]  }
 0x185   :  { %1787 = vmatprep.subr.bf16.mxu1 %v5622_v32 }
 0x186   :  { %v4370_v35 = vpop.f32.mrb[36].mxu1 }
 0x187   :  { %v706_v37 = vpop.f32.mrb[37].mxu1 }
 0x188   :  { %1788 = vmatpush1.bf16.msra.mxu1 %v834_v31  ;;  %v4371_v39 = vpop.f32.mrb[38].mxu1 }
 0x189   :  { %v836_v40 = vpack.c.bf16 %v4371_v39, %v4370_v35  ;;  %v709_v41 = vpop.f32.mrb[39].mxu1  ;;  %1789 = vmatprep.subr.bf16.mxu1 %v5622_v32  ;;  %v4948_v35 = vld [vmem:[#allocation2 + $0x184] ss:$16 sps:$4 sm:$0xff]  }
 0x18a   :  { %v835_v42 = vpack.c.bf16 %v709_v41, %v706_v37  ;;  %v4951_v37 = vld [vmem:[#allocation2 + $0x1a4] ss:$16 sps:$4 sm:$0xff]  }
 0x18b   :  { %1537 = vmatmul.mubr.bf16.gmra.mrb[68].mxu1 %v4917_v36  ;;  %v4950_v36 = vld [vmem:[#allocation2 + $0x180] ss:$16 sps:$4 sm:$0xff]   ;;  %v4954_v39 = vld [vmem:[#allocation2 + $0x1c4] ss:$16 sps:$4 sm:$0xff]  }
 0x18c   :  { %1544 = vmatprep.mubr.bf16.mxu1 %v4918_v38  ;;  %1790 = vmatpush1.bf16.msra.mxu1 %v835_v42  ;;  %v4953_v38 = vld [vmem:[#allocation2 + $0x1a0] ss:$16 sps:$4 sm:$0xff]   ;;  %v4957_v41 = vld [vmem:[#allocation2 + $0x1e4] ss:$16 sps:$4 sm:$0xff]  }
 0x18d   :  { %1791 = vmatprep.subr.bf16.mxu1 %v5622_v32  ;;  %v4959_v42 = vld [vmem:[#allocation2 + $0x1e0] ss:$16 sps:$4 sm:$0xff]  }
 0x18e   :  { %v4374_v43 = vpop.f32.mrb[40].mxu1 }
 0x18f   :  { %v722_v45 = vpop.f32.mrb[41].mxu1 }
 0x190   :  { %1792 = vmatpush1.bf16.msra.mxu1 %v836_v40  ;;  %v4375_v47 = vpop.f32.mrb[42].mxu1  ;;  %v4956_v40 = vld [vmem:[#allocation2 + $0x1c0] ss:$16 sps:$4 sm:$0xff]  }
 0x191   :  { %v838_v48 = vpack.c.bf16 %v4375_v47, %v4374_v43  ;;  %v725_v49 = vpop.f32.mrb[43].mxu1  ;;  %1793 = vmatprep.subr.bf16.mxu1 %v5622_v32  ;;  %v4960_v43 = vld [vmem:[#allocation2 + $0x204] ss:$16 sps:$4 sm:$0xff]  }
 0x192   :  { %v837_v50 = vpack.c.bf16 %v725_v49, %v722_v45  ;;  %v4963_v45 = vld [vmem:[#allocation2 + $0x224] ss:$16 sps:$4 sm:$0xff]  }
 0x193   :  { %1545 = vmatmul.mubr.bf16.gmra.mrb[72].mxu1 %v4920_v44  ;;  %v4962_v44 = vld [vmem:[#allocation2 + $0x200] ss:$16 sps:$4 sm:$0xff]   ;;  %v4966_v47 = vld [vmem:[#allocation2 + $0x244] ss:$16 sps:$4 sm:$0xff]  }
 0x194   :  { %1552 = vmatprep.mubr.bf16.mxu1 %v4921_v46  ;;  %1794 = vmatpush1.bf16.msra.mxu1 %v837_v50  ;;  %v4965_v46 = vld [vmem:[#allocation2 + $0x220] ss:$16 sps:$4 sm:$0xff]   ;;  %v4969_v49 = vld [vmem:[#allocation2 + $0x264] ss:$16 sps:$4 sm:$0xff]  }
 0x195   :  { %1795 = vmatprep.subr.bf16.mxu1 %v5622_v32  ;;  %v4971_v50 = vld [vmem:[#allocation2 + $0x260] ss:$16 sps:$4 sm:$0xff]  }
 0x196   :  { %v4378_v53 = vpop.f32.mrb[44].mxu1 }
 0x197   :  { %v738_v54 = vpop.f32.mrb[45].mxu1 }
 0x198   :  { %1796 = vmatpush1.bf16.msra.mxu1 %v838_v48  ;;  %v4379_v55 = vpop.f32.mrb[46].mxu1  ;;  %v4968_v48 = vld [vmem:[#allocation2 + $0x240] ss:$16 sps:$4 sm:$0xff]  }
 0x199   :  { %1797 = vmatprep.subr.bf16.mxu1 %v5622_v32  ;;  %v840_v56 = vpack.c.bf16 %v4379_v55, %v4378_v53  ;;  %v741_v57 = vpop.f32.mrb[47].mxu1  ;;  %v4975_v53 = vld [vmem:[#allocation2 + $0x2a4] ss:$16 sps:$4 sm:$0xff]  }
 0x19a   :  { %v839_v58 = vpack.c.bf16 %v741_v57, %v738_v54  ;;  %v4977_v54 = vld [vmem:[#allocation2 + $0x2a0] ss:$16 sps:$4 sm:$0xff]   ;;  %v4978_v55 = vld [vmem:[#allocation2 + $0x2c4] ss:$16 sps:$4 sm:$0xff]  }
 0x19b   :  { %1553 = vmatmul.mubr.bf16.gmra.mrb[76].mxu1 %v4923_v51  ;;  %v4972_v51 = vld [vmem:[#allocation2 + $0x284] ss:$16 sps:$4 sm:$0xff]  }
 0x19c   :  { %1560 = vmatprep.mubr.bf16.mxu1 %v4924_v52  ;;  %1798 = vmatpush1.bf16.msra.mxu1 %v839_v58  ;;  %v4974_v52 = vld [vmem:[#allocation2 + $0x280] ss:$16 sps:$4 sm:$0xff]   ;;  %v4981_v57 = vld [vmem:[#allocation2 + $0x2e4] ss:$16 sps:$4 sm:$0xff]  }
 0x19d   :  { %1799 = vmatprep.subr.bf16.mxu1 %v5622_v32  ;;  %v4983_v58 = vld [vmem:[#allocation2 + $0x2e0] ss:$16 sps:$4 sm:$0xff]  }
 0x19e   :  { %v4382_v0 = vpop.f32.mrb[48].mxu1 }
 0x19f   :  { %v754_v2 = vpop.f32.mrb[49].mxu1 }
 0x1a0   :  { %1800 = vmatpush1.bf16.msra.mxu1 %v840_v56  ;;  %v4383_v3 = vpop.f32.mrb[50].mxu1  ;;  %v4980_v56 = vld [vmem:[#allocation2 + $0x2c0] ss:$16 sps:$4 sm:$0xff]  }
 0x1a1   :  { %1801 = vmatprep.subr.bf16.mxu1 %v5622_v32  ;;  %v757_v4 = vpop.f32.mrb[51].mxu1  ;;  %v842_v5 = vpack.c.bf16 %v4383_v3, %v4382_v0  ;;  %v4992_v0 = vld [vmem:[#allocation2 + $0x340] ss:$16 sps:$4 sm:$0xff]   ;;  %v4996_v3 = vld [vmem:[#allocation2 + $0x384] ss:$16 sps:$4 sm:$0xff]  }
 0x1a2   :  { %v841_v6 = vpack.c.bf16 %v757_v4, %v754_v2  ;;  %v4995_v2 = vld [vmem:[#allocation2 + $0x360] ss:$16 sps:$4 sm:$0xff]  }
 0x1a3   :  { %1561 = vmatmul.mubr.bf16.gmra.mrb[80].mxu1 %v4926_v59  ;;  %v4984_v59 = vld [vmem:[#allocation2 + $0x304] ss:$16 sps:$4 sm:$0xff]   ;;  %v4998_v4 = vld [vmem:[#allocation2 + $0x380] ss:$16 sps:$4 sm:$0xff]  }
 0x1a4   :  { %1568 = vmatprep.mubr.bf16.mxu1 %v4927_v60  ;;  %1802 = vmatpush1.bf16.msra.mxu1 %v841_v6  ;;  %v4986_v60 = vld [vmem:[#allocation2 + $0x300] ss:$16 sps:$4 sm:$0xff]  }
 0x1a5   :  { %1803 = vmatprep.subr.bf16.mxu1 %v5622_v32  ;;  %v5001_v6 = vld [vmem:[#allocation2 + $0x3a0] ss:$16 sps:$4 sm:$0xff]  }
 0x1a6   :  { %v4386_v8 = vpop.f32.mrb[52].mxu1 }
 0x1a7   :  { %v770_v10 = vpop.f32.mrb[53].mxu1 }
 0x1a8   :  { %1804 = vmatpush1.bf16.msra.mxu1 %v842_v5  ;;  %v4387_v11 = vpop.f32.mrb[54].mxu1  ;;  %v4999_v5 = vld [vmem:[#allocation2 + $0x3a4] ss:$16 sps:$4 sm:$0xff]  }
 0x1a9   :  { %v773_v12 = vpop.f32.mrb[55].mxu1  ;;  %1805 = vmatprep.subr.bf16.mxu1 %v5622_v32  ;;  %v844_v15 = vpack.c.bf16 %v4387_v11, %v4386_v8  ;;  %v5004_v8 = vld [vmem:[#allocation2 + $0x3c0] ss:$16 sps:$4 sm:$0xff]   ;;  %v5010_v11 = vld [vmem:[#allocation2 + $0xc] ss:$16 sps:$4 sm:$0xff]  }
 0x1aa   :  { %v843_v13 = vpack.c.bf16 %v773_v12, %v770_v10  ;;  %v5007_v10 = vld [vmem:[#allocation2 + $0x3e0] ss:$16 sps:$4 sm:$0xff]   ;;  %v5008_v12 = vld [vmem:[#allocation2 + $0x8] ss:$16 sps:$4 sm:$0xff]  }
 0x1ab   :  { %1569 = vmatmul.mubr.bf16.gmra.mrb[84].mxu1 %v4929_v61  ;;  %v4987_v61 = vld [vmem:[#allocation2 + $0x324] ss:$16 sps:$4 sm:$0xff]  }
 0x1ac   :  { %1576 = vmatprep.mubr.bf16.mxu1 %v4930_v62  ;;  %1806 = vmatpush1.bf16.msra.mxu1 %v843_v13  ;;  %v4989_v62 = vld [vmem:[#allocation2 + $0x320] ss:$16 sps:$4 sm:$0xff]   ;;  %v5011_v13 = vld [vmem:[#allocation2 + $0x2c] ss:$16 sps:$4 sm:$0xff]  }
 0x1ad   :  { %1807 = vmatprep.subr.bf16.mxu1 %v5622_v32 }
 0x1ae   :  { %v4390_v16 = vpop.f32.mrb[56].mxu1 }
 0x1af   :  { %v786_v18 = vpop.f32.mrb[57].mxu1 }
 0x1b0   :  { %1808 = vmatpush1.bf16.msra.mxu1 %v844_v15  ;;  %v4391_v19 = vpop.f32.mrb[58].mxu1  ;;  %v5014_v15 = vld [vmem:[#allocation2 + $0x4c] ss:$16 sps:$4 sm:$0xff]  }
 0x1b1   :  { %v789_v20 = vpop.f32.mrb[59].mxu1  ;;  %1809 = vmatprep.subr.bf16.mxu1 %v5622_v32  ;;  %v846_v23 = vpack.c.bf16 %v4391_v19, %v4390_v16  ;;  %v5016_v16 = vld [vmem:[#allocation2 + $0x48] ss:$16 sps:$4 sm:$0xff]   ;;  %v5020_v19 = vld [vmem:[#allocation2 + $0x8c] ss:$16 sps:$4 sm:$0xff]  }
 0x1b2   :  { %v845_v21 = vpack.c.bf16 %v789_v20, %v786_v18  ;;  %v5019_v18 = vld [vmem:[#allocation2 + $0x68] ss:$16 sps:$4 sm:$0xff]  }
 0x1b3   :  { %1577 = vmatmul.mubr.bf16.gmra.mrb[88].mxu1 %v4932_v63  ;;  %v4990_v63 = vld [vmem:[#allocation2 + $0x344] ss:$16 sps:$4 sm:$0xff]   ;;  %v5022_v20 = vld [vmem:[#allocation2 + $0x88] ss:$16 sps:$4 sm:$0xff]  }
 0x1b4   :  { %1584 = vmatprep.mubr.bf16.mxu1 %v4933_v1  ;;  %1810 = vmatpush1.bf16.msra.mxu1 %v845_v21  ;;  %v4993_v1 = vld [vmem:[#allocation2 + $0x364] ss:$16 sps:$4 sm:$0xff]   ;;  %v5023_v21 = vld [vmem:[#allocation2 + $0xac] ss:$16 sps:$4 sm:$0xff]  }
 0x1b5   :  { %1811 = vmatprep.subr.bf16.mxu1 %v5622_v32 }
 0x1b6   :  { %v4394_v24 = vpop.f32.mrb[60].mxu1 }
 0x1b7   :  { %v802_v26 = vpop.f32.mrb[61].mxu1 }
 0x1b8   :  { %v4395_v27 = vpop.f32.mrb[62].mxu1  ;;  %1812 = vmatpush1.bf16.msra.mxu1 %v846_v23  ;;  %v5026_v23 = vld [vmem:[#allocation2 + $0xcc] ss:$16 sps:$4 sm:$0xff]  }
 0x1b9   :  { %v805_v28 = vpop.f32.mrb[63].mxu1  ;;  %1813 = vmatprep.subr.bf16.mxu1 %v5622_v32  ;;  %v848_v31 = vpack.c.bf16 %v4395_v27, %v4394_v24  ;;  %v5028_v24 = vld [vmem:[#allocation2 + $0xc8] ss:$16 sps:$4 sm:$0xff]   ;;  %v5032_v27 = vld [vmem:[#allocation2 + $0x10c] ss:$16 sps:$4 sm:$0xff]  }
 0x1ba   :  { %v847_v29 = vpack.c.bf16 %v805_v28, %v802_v26  ;;  %v5031_v26 = vld [vmem:[#allocation2 + $0xe8] ss:$16 sps:$4 sm:$0xff]  }
 0x1bb   :  { %1585 = vmatmul.mubr.bf16.gmra.mrb[92].mxu1 %v4935_v7  ;;  %v5002_v7 = vld [vmem:[#allocation2 + $0x3c4] ss:$16 sps:$4 sm:$0xff]   ;;  %v5034_v28 = vld [vmem:[#allocation2 + $0x108] ss:$16 sps:$4 sm:$0xff]  }
 0x1bc   :  { %1592 = vmatprep.mubr.bf16.mxu1 %v4936_v9  ;;  %1814 = vmatpush1.bf16.msra.mxu1 %v847_v29  ;;  %v5005_v9 = vld [vmem:[#allocation2 + $0x3e4] ss:$16 sps:$4 sm:$0xff]   ;;  %v5035_v29 = vld [vmem:[#allocation2 + $0x12c] ss:$16 sps:$4 sm:$0xff]  }
 0x1bd   :  { %1815 = vmatprep.subr.bf16.mxu1 %v5622_v32 }
 0x1c0   :  { %1816 = vmatpush1.bf16.msra.mxu1 %v848_v31  ;;  %v5037_v31 = vld [vmem:[#allocation2 + $0x128] ss:$16 sps:$4 sm:$0xff]  }
 0x1c3   :  { %1593 = vmatmul.mubr.bf16.gmra.mrb[96].mxu1 %v4938_v14  ;;  %v5013_v14 = vld [vmem:[#allocation2 + $0x28] ss:$16 sps:$4 sm:$0xff]  }
 0x1c4   :  { %1600 = vmatprep.mubr.bf16.mxu1 %v4939_v17  ;;  %v5017_v17 = vld [vmem:[#allocation2 + $0x6c] ss:$16 sps:$4 sm:$0xff]  }
 0x1cb   :  { %1601 = vmatmul.mubr.bf16.gmra.mrb[100].mxu1 %v4941_v22  ;;  %v5025_v22 = vld [vmem:[#allocation2 + $0xa8] ss:$16 sps:$4 sm:$0xff]  }
 0x1cc   :  { %1608 = vmatprep.mubr.bf16.mxu1 %v4942_v25  ;;  %v5029_v25 = vld [vmem:[#allocation2 + $0xec] ss:$16 sps:$4 sm:$0xff]  }
 0x1d3   :  { %1609 = vmatmul.mubr.bf16.gmra.mrb[104].mxu1 %v4944_v30  ;;  %v5083_v30 = vld [vmem:[#allocation8] sm:$0xff]  }
 0x1d4   :  { %1616 = vmatprep.mubr.bf16.mxu1 %v4945_v33  ;;  %4396 = vmatprep.subr.bf16.mxu0 %v5083_v30  ;;  %v5038_v33 = vld [vmem:[#allocation2 + $0x14c] ss:$16 sps:$4 sm:$0xff]  }
 0x1d5   :  { %4397 = vmatpush3.bf16.msra.mxu0 %v5083_v30 }
 0x1db   :  { %1617 = vmatmul.mubr.bf16.gmra.mrb[108].mxu1 %v4947_v34  ;;  %v5087_v34 = vld [vmem:[#allocation8 + $0x8] sm:$0xff]  }
 0x1dc   :  { %1624 = vmatprep.mubr.bf16.mxu1 %v4948_v35  ;;  %4398 = vmatprep.subr.bf16.mxu0 %v5087_v34  ;;  %v5088_v35 = vld [vmem:[#allocation8 + $0x10] sm:$0xff]  }
 0x1dd   :  { %4399 = vmatpush3.bf16.msra.mxu0 %v5087_v34 }
 0x1de   :  { %4400 = vmatprep.subr.bf16.mxu0 %v5088_v35 }
 0x1e1   :  { %4401 = vmatpush3.bf16.msra.mxu0 %v5088_v35 }
 0x1e3   :  { %1625 = vmatmul.mubr.bf16.gmra.mrb[112].mxu1 %v4950_v36  ;;  %v5040_v36 = vld [vmem:[#allocation2 + $0x148] ss:$16 sps:$4 sm:$0xff]  }
 0x1e4   :  { %1632 = vmatprep.mubr.bf16.mxu1 %v4951_v37  ;;  %v5041_v37 = vld [vmem:[#allocation2 + $0x16c] ss:$16 sps:$4 sm:$0xff]  }
 0x1eb   :  { %1633 = vmatmul.mubr.bf16.gmra.mrb[116].mxu1 %v4953_v38  ;;  %v5092_v38 = vld [vmem:[#allocation8 + $0x18] sm:$0xff]  }
 0x1ec   :  { %1640 = vmatprep.mubr.bf16.mxu1 %v4954_v39  ;;  %4402 = vmatprep.subr.bf16.mxu0 %v5092_v38  ;;  %v5093_v39 = vld [vmem:[#allocation8 + $0x20] sm:$0xff]  }
 0x1ed   :  { %4403 = vmatpush3.bf16.msra.mxu0 %v5092_v38  ;;  %v5105_v38 = vld [vmem:[#allocation2 + $0x3a8] ss:$16 sps:$4 sm:$0xff]  }
 0x1ee   :  { %4404 = vmatprep.subr.bf16.mxu0 %v5093_v39 }
 0x1f1   :  { %4405 = vmatpush3.bf16.msra.mxu0 %v5093_v39 }
 0x1f3   :  { %1641 = vmatmul.mubr.bf16.gmra.mrb[120].mxu1 %v4956_v40  ;;  %v5043_v40 = vld [vmem:[#allocation2 + $0x168] ss:$16 sps:$4 sm:$0xff]  }
 0x1f4   :  { %1648 = vmatprep.mubr.bf16.mxu1 %v4957_v41  ;;  %v5044_v41 = vld [vmem:[#allocation2 + $0x18c] ss:$16 sps:$4 sm:$0xff]  }
 0x1fb   :  { %1649 = vmatmul.mubr.bf16.gmra.mrb[124].mxu1 %v4959_v42  ;;  %v5097_v42 = vld [vmem:[#allocation8 + $0x28] sm:$0xff]  }
 0x1fc   :  { %1656 = vmatprep.mubr.bf16.mxu1 %v4960_v43  ;;  %4406 = vmatprep.subr.bf16.mxu0 %v5097_v42  ;;  %v5098_v43 = vld [vmem:[#allocation8 + $0x30] sm:$0xff]  }
 0x1fd   :  { %4407 = vmatpush3.bf16.msra.mxu0 %v5097_v42 }
 0x1fe   :  { %4408 = vmatprep.subr.bf16.mxu0 %v5098_v43 }
 0x201   :  { %4409 = vmatpush3.bf16.msra.mxu0 %v5098_v43 }
 0x203   :  { %1657 = vmatmul.mubr.bf16.gmra.mrb[128].mxu1 %v4962_v44  ;;  %v5046_v44 = vld [vmem:[#allocation2 + $0x188] ss:$16 sps:$4 sm:$0xff]  }
 0x204   :  { %1664 = vmatprep.mubr.bf16.mxu1 %v4963_v45  ;;  %v5047_v45 = vld [vmem:[#allocation2 + $0x1ac] ss:$16 sps:$4 sm:$0xff]  }
 0x20b   :  { %1665 = vmatmul.mubr.bf16.gmra.mrb[132].mxu1 %v4965_v46  ;;  %v5102_v46 = vld [vmem:[#allocation8 + $0x38] sm:$0xff]  }
 0x20c   :  { %1672 = vmatprep.mubr.bf16.mxu1 %v4966_v47  ;;  %4410 = vmatprep.subr.bf16.mxu0 %v5102_v46  ;;  %v5049_v47 = vld [vmem:[#allocation2 + $0x1a8] ss:$16 sps:$4 sm:$0xff]  }
 0x20d   :  { %4411 = vmatpush3.bf16.msra.mxu0 %v5102_v46 }
 0x20e   :  { %2562 = vmatprep.subr.bf16.mxu0 %v5622_v32 }
 0x213   :  { %1673 = vmatmul.mubr.bf16.gmra.mrb[136].mxu1 %v4968_v48  ;;  %v5050_v48 = vld [vmem:[#allocation2 + $0x1cc] ss:$16 sps:$4 sm:$0xff]  }
 0x214   :  { %1680 = vmatprep.mubr.bf16.mxu1 %v4969_v49  ;;  %v5052_v49 = vld [vmem:[#allocation2 + $0x1c8] ss:$16 sps:$4 sm:$0xff]  }
 0x21b   :  { %1681 = vmatmul.mubr.bf16.gmra.mrb[140].mxu1 %v4971_v50  ;;  %v5053_v50 = vld [vmem:[#allocation2 + $0x1ec] ss:$16 sps:$4 sm:$0xff]  }
 0x21c   :  { %1688 = vmatprep.mubr.bf16.mxu1 %v4972_v51  ;;  %v5055_v51 = vld [vmem:[#allocation2 + $0x1e8] ss:$16 sps:$4 sm:$0xff]  }
 0x223   :  { %1689 = vmatmul.mubr.bf16.gmra.mrb[144].mxu1 %v4974_v52  ;;  %v5056_v52 = vld [vmem:[#allocation2 + $0x20c] ss:$16 sps:$4 sm:$0xff]  }
 0x224   :  { %1696 = vmatprep.mubr.bf16.mxu1 %v4975_v53  ;;  %v5058_v53 = vld [vmem:[#allocation2 + $0x208] ss:$16 sps:$4 sm:$0xff]  }
 0x22b   :  { %1697 = vmatmul.mubr.bf16.gmra.mrb[148].mxu1 %v4977_v54  ;;  %v5059_v54 = vld [vmem:[#allocation2 + $0x22c] ss:$16 sps:$4 sm:$0xff]  }
 0x22c   :  { %1704 = vmatprep.mubr.bf16.mxu1 %v4978_v55  ;;  %v5061_v55 = vld [vmem:[#allocation2 + $0x228] ss:$16 sps:$4 sm:$0xff]  }
 0x233   :  { %1705 = vmatmul.mubr.bf16.gmra.mrb[152].mxu1 %v4980_v56  ;;  %v5062_v56 = vld [vmem:[#allocation2 + $0x24c] ss:$16 sps:$4 sm:$0xff]  }
 0x234   :  { %1712 = vmatprep.mubr.bf16.mxu1 %v4981_v57  ;;  %v5064_v57 = vld [vmem:[#allocation2 + $0x248] ss:$16 sps:$4 sm:$0xff]  }
 0x23b   :  { %1713 = vmatmul.mubr.bf16.gmra.mrb[156].mxu1 %v4983_v58  ;;  %v5065_v58 = vld [vmem:[#allocation2 + $0x26c] ss:$16 sps:$4 sm:$0xff]  }
 0x23c   :  { %1720 = vmatprep.mubr.bf16.mxu1 %v4984_v59  ;;  %v5067_v59 = vld [vmem:[#allocation2 + $0x268] ss:$16 sps:$4 sm:$0xff]  }
 0x243   :  { %1721 = vmatmul.mubr.bf16.gmra.mrb[160].mxu1 %v4986_v60  ;;  %v5068_v60 = vld [vmem:[#allocation2 + $0x28c] ss:$16 sps:$4 sm:$0xff]  }
 0x244   :  { %1728 = vmatprep.mubr.bf16.mxu1 %v4987_v61  ;;  %v5070_v61 = vld [vmem:[#allocation2 + $0x288] ss:$16 sps:$4 sm:$0xff]  }
 0x24b   :  { %1729 = vmatmul.mubr.bf16.gmra.mrb[164].mxu1 %v4989_v62  ;;  %v5071_v62 = vld [vmem:[#allocation2 + $0x2ac] ss:$16 sps:$4 sm:$0xff]  }
 0x24c   :  { %1736 = vmatprep.mubr.bf16.mxu1 %v4990_v63  ;;  %v5073_v63 = vld [vmem:[#allocation2 + $0x2a8] ss:$16 sps:$4 sm:$0xff]  }
 0x253   :  { %1737 = vmatmul.mubr.bf16.gmra.mrb[168].mxu1 %v4992_v0  ;;  %v5074_v0 = vld [vmem:[#allocation2 + $0x2cc] ss:$16 sps:$4 sm:$0xff]  }
 0x254   :  { %1744 = vmatprep.mubr.bf16.mxu1 %v4993_v1  ;;  %v5076_v1 = vld [vmem:[#allocation2 + $0x2c8] ss:$16 sps:$4 sm:$0xff]  }
 0x25b   :  { %1745 = vmatmul.mubr.bf16.gmra.mrb[172].mxu1 %v4995_v2  ;;  %v5077_v2 = vld [vmem:[#allocation2 + $0x2ec] ss:$16 sps:$4 sm:$0xff]  }
 0x25c   :  { %1752 = vmatprep.mubr.bf16.mxu1 %v4996_v3  ;;  %v5079_v3 = vld [vmem:[#allocation2 + $0x2e8] ss:$16 sps:$4 sm:$0xff]  }
 0x263   :  { %1753 = vmatmul.mubr.bf16.gmra.mrb[176].mxu1 %v4998_v4  ;;  %v5080_v4 = vld [vmem:[#allocation2 + $0x30c] ss:$16 sps:$4 sm:$0xff]  }
 0x264   :  { %1760 = vmatprep.mubr.bf16.mxu1 %v4999_v5  ;;  %v5082_v5 = vld [vmem:[#allocation2 + $0x308] ss:$16 sps:$4 sm:$0xff]  }
 0x26b   :  { %1761 = vmatmul.mubr.bf16.gmra.mrb[180].mxu1 %v5001_v6  ;;  %v5084_v6 = vld [vmem:[#allocation2 + $0x32c] ss:$16 sps:$4 sm:$0xff]  }
 0x26c   :  { %1768 = vmatprep.mubr.bf16.mxu1 %v5002_v7  ;;  %v5086_v7 = vld [vmem:[#allocation2 + $0x328] ss:$16 sps:$4 sm:$0xff]  }
 0x273   :  { %1769 = vmatmul.mubr.bf16.gmra.mrb[184].mxu1 %v5004_v8  ;;  %v5089_v8 = vld [vmem:[#allocation2 + $0x34c] ss:$16 sps:$4 sm:$0xff]  }
 0x274   :  { %1776 = vmatprep.mubr.bf16.mxu1 %v5005_v9  ;;  %v5091_v9 = vld [vmem:[#allocation2 + $0x348] ss:$16 sps:$4 sm:$0xff]  }
 0x27b   :  { %1777 = vmatmul.mubr.bf16.gmra.mrb[188].mxu1 %v5007_v10  ;;  %v5094_v10 = vld [vmem:[#allocation2 + $0x36c] ss:$16 sps:$4 sm:$0xff]  }
 0x27c   :  { %1817 = vmatprep.mubr.bf16.mxu1 %v5010_v11  ;;  %v5761_v11 = vld [vmem:[%s6841_s3] ss:$0 sm:$0xff] }
 0x283   :  { %1818 = vmatmul.mubr.bf16.vlgmr.msra.gmra.mrb[64].mxu1 %v5008_v12 }
 0x284   :  { %1825 = vmatprep.mubr.bf16.mxu1 %v5011_v13 }
 0x28b   :  { %1826 = vmatmul.mubr.bf16.gmra.mrb[68].mxu1 %v5013_v14 }
 0x28c   :  { %1833 = vmatprep.mubr.bf16.mxu1 %v5014_v15  ;;  %v5096_v15 = vld [vmem:[#allocation2 + $0x368] ss:$16 sps:$4 sm:$0xff]  }
 0x293   :  { %1834 = vmatmul.mubr.bf16.gmra.mrb[72].mxu1 %v5016_v16 }
 0x294   :  { %1841 = vmatprep.mubr.bf16.mxu1 %v5017_v17  ;;  %v5099_v17 = vld [vmem:[#allocation2 + $0x38c] ss:$16 sps:$4 sm:$0xff]  }
 0x29b   :  { %1842 = vmatmul.mubr.bf16.gmra.mrb[76].mxu1 %v5019_v18 }
 0x29c   :  { %1849 = vmatprep.mubr.bf16.mxu1 %v5020_v19 }
 0x2a3   :  { %1850 = vmatmul.mubr.bf16.gmra.mrb[80].mxu1 %v5022_v20 }
 0x2a4   :  { %1857 = vmatprep.mubr.bf16.mxu1 %v5023_v21 }
 0x2ab   :  { %1858 = vmatmul.mubr.bf16.gmra.mrb[84].mxu1 %v5025_v22 }
 0x2ac   :  { %1865 = vmatprep.mubr.bf16.mxu1 %v5026_v23 }
 0x2b3   :  { %1866 = vmatmul.mubr.bf16.gmra.mrb[88].mxu1 %v5028_v24 }
 0x2b4   :  { %1873 = vmatprep.mubr.bf16.mxu1 %v5029_v25 }
 0x2bb   :  { %1874 = vmatmul.mubr.bf16.gmra.mrb[92].mxu1 %v5031_v26  ;;  %v5101_v26 = vld [vmem:[#allocation2 + $0x388] ss:$16 sps:$4 sm:$0xff]  }
 0x2bc   :  { %1881 = vmatprep.mubr.bf16.mxu1 %v5032_v27 }
 0x2c3   :  { %1882 = vmatmul.mubr.bf16.gmra.mrb[96].mxu1 %v5034_v28  ;;  %v5103_v28 = vld [vmem:[#allocation2 + $0x3ac] ss:$16 sps:$4 sm:$0xff]  }
 0x2c4   :  { %1889 = vmatprep.mubr.bf16.mxu1 %v5035_v29 }
 0x2cb   :  { %1890 = vmatmul.mubr.bf16.gmra.mrb[100].mxu1 %v5037_v31 }
 0x2cc   :  { %1897 = vmatprep.mubr.bf16.mxu1 %v5038_v33 }
 0x2d3   :  { %1898 = vmatmul.mubr.bf16.gmra.mrb[104].mxu1 %v5040_v36 }
 0x2d4   :  { %1905 = vmatprep.mubr.bf16.mxu1 %v5041_v37 }
 0x2db   :  { %1906 = vmatmul.mubr.bf16.gmra.mrb[108].mxu1 %v5043_v40  ;;  %v5106_v40 = vld [vmem:[#allocation2 + $0x3cc] ss:$16 sps:$4 sm:$0xff]  }
 0x2dc   :  { %1913 = vmatprep.mubr.bf16.mxu1 %v5044_v41 }
 0x2e3   :  { %1914 = vmatmul.mubr.bf16.gmra.mrb[112].mxu1 %v5046_v44 }
 0x2e4   :  { %1921 = vmatprep.mubr.bf16.mxu1 %v5047_v45 }
 0x2eb   :  { %1922 = vmatmul.mubr.bf16.gmra.mrb[116].mxu1 %v5049_v47 }
 0x2ec   :  { %1929 = vmatprep.mubr.bf16.mxu1 %v5050_v48 }
 0x2f3   :  { %1930 = vmatmul.mubr.bf16.gmra.mrb[120].mxu1 %v5052_v49  ;;  %v5108_v49 = vld [vmem:[#allocation2 + $0x3c8] ss:$16 sps:$4 sm:$0xff]  }
 0x2f4   :  { %1937 = vmatprep.mubr.bf16.mxu1 %v5053_v50 }
 0x2fb   :  { %1938 = vmatmul.mubr.bf16.gmra.mrb[124].mxu1 %v5055_v51  ;;  %v5109_v51 = vld [vmem:[#allocation2 + $0x3ec] ss:$16 sps:$4 sm:$0xff]  }
 0x2fc   :  { %1945 = vmatprep.mubr.bf16.mxu1 %v5056_v52 }
 0x303   :  { %1946 = vmatmul.mubr.bf16.gmra.mrb[128].mxu1 %v5058_v53 }
 0x304   :  { %1953 = vmatprep.mubr.bf16.mxu1 %v5059_v54 }
 0x30b   :  { %1954 = vmatmul.mubr.bf16.gmra.mrb[132].mxu1 %v5061_v55 }
 0x30c   :  { %1961 = vmatprep.mubr.bf16.mxu1 %v5062_v56 }
 0x313   :  { %1962 = vmatmul.mubr.bf16.gmra.mrb[136].mxu1 %v5064_v57 }
 0x314   :  { %1969 = vmatprep.mubr.bf16.mxu1 %v5065_v58 }
 0x31b   :  { %1970 = vmatmul.mubr.bf16.gmra.mrb[140].mxu1 %v5067_v59 }
 0x31c   :  { %1977 = vmatprep.mubr.bf16.mxu1 %v5068_v60  ;;  %v5111_v60 = vld [vmem:[#allocation2 + $0x3e8] ss:$16 sps:$4 sm:$0xff]  }
 0x323   :  { %1978 = vmatmul.mubr.bf16.gmra.mrb[144].mxu1 %v5070_v61 }
 0x324   :  { %1985 = vmatprep.mubr.bf16.mxu1 %v5071_v62 }
 0x32b   :  { %1986 = vmatmul.mubr.bf16.gmra.mrb[148].mxu1 %v5073_v63 }
 0x32c   :  { %1993 = vmatprep.mubr.bf16.mxu1 %v5074_v0 }
 0x333   :  { %1994 = vmatmul.mubr.bf16.gmra.mrb[152].mxu1 %v5076_v1 }
 0x334   :  { %2001 = vmatprep.mubr.bf16.mxu1 %v5077_v2 }
 0x33b   :  { %2002 = vmatmul.mubr.bf16.gmra.mrb[156].mxu1 %v5079_v3 }
 0x33c   :  { %2009 = vmatprep.mubr.bf16.mxu1 %v5080_v4 }
 0x343   :  { %2010 = vmatmul.mubr.bf16.gmra.mrb[160].mxu1 %v5082_v5 }
 0x344   :  { %2017 = vmatprep.mubr.bf16.mxu1 %v5084_v6 }
 0x34b   :  { %2018 = vmatmul.mubr.bf16.gmra.mrb[164].mxu1 %v5086_v7 }
 0x34c   :  { %2025 = vmatprep.mubr.bf16.mxu1 %v5089_v8 }
 0x353   :  { %2026 = vmatmul.mubr.bf16.gmra.mrb[168].mxu1 %v5091_v9 }
 0x354   :  { %2033 = vmatprep.mubr.bf16.mxu1 %v5094_v10 }
 0x356   :  { %v1819_v12 = vpop.f32.mrb[64].mxu1 }
 0x357   :  { %v4476_v13 = vadd.f32 %v5761_v11, %v1819_v12  ;;  %v1821_v14 = vpop.f32.mrb[65].mxu1 }
 0x358   :  { %v1822_v16 = vpop.f32.mrb[66].mxu1 }
 0x359   :  { %v4477_v18 = vadd.f32 %v5761_v11, %v1822_v16  ;;  %v1824_v19 = vpop.f32.mrb[67].mxu1  ;;  %v2074_v20 = vmax.f32 %v4476_v13, 0.0 }
 0x35b   :  { %v2075_v21 = vmax.f32 %v4477_v18, 0.0  ;;  %2034 = vmatmul.mubr.bf16.gmra.mrb[172].mxu1 %v5096_v15 }
 0x35c   :  { %2041 = vmatprep.mubr.bf16.mxu1 %v5099_v17 }
 0x35d   :  { %v2138_v22 = vpack.c.bf16 %v2075_v21, %v2074_v20 }
 0x35e   :  { %v1827_v23 = vpop.f32.mrb[68].mxu1 }
 0x35f   :  { %v4478_v24 = vadd.f32 %v5761_v11, %v1827_v23  ;;  %v1829_v25 = vpop.f32.mrb[69].mxu1  ;;  %4412 = vmatprep.mubr.bf16.mxu0 %v2138_v22 }
 0x360   :  { %v1830_v27 = vpop.f32.mrb[70].mxu1 }
 0x361   :  { %v4479_v29 = vadd.f32 %v5761_v11, %v1830_v27  ;;  %v1832_v30 = vpop.f32.mrb[71].mxu1  ;;  %v2076_v31 = vmax.f32 %v4478_v24, 0.0 }
 0x363   :  { %v2077_v33 = vmax.f32 %v4479_v29, 0.0  ;;  %2042 = vmatmul.mubr.bf16.gmra.mrb[176].mxu1 %v5101_v26 }
 0x364   :  { %2049 = vmatprep.mubr.bf16.mxu1 %v5103_v28 }
 0x365   :  { %v2139_v34 = vpack.c.bf16 %v2077_v33, %v2076_v31 }
 0x366   :  { %v1835_v35 = vpop.f32.mrb[72].mxu1 }
 0x367   :  { %v4480_v36 = vadd.f32 %v5761_v11, %v1835_v35  ;;  %v1837_v37 = vpop.f32.mrb[73].mxu1  ;;  %4413 = vmatmul.mubr.bf16.vlgmr.msra.gmra.mrb[0].mxu0 %v2139_v34 }
 0x368   :  { %v1838_v39 = vpop.f32.mrb[74].mxu1 }
 0x369   :  { %v4481_v41 = vadd.f32 %v5761_v11, %v1838_v39  ;;  %v1840_v42 = vpop.f32.mrb[75].mxu1  ;;  %v2078_v43 = vmax.f32 %v4480_v36, 0.0 }
 0x36b   :  { %v2079_v44 = vmax.f32 %v4481_v41, 0.0  ;;  %2050 = vmatmul.mubr.bf16.gmra.mrb[180].mxu1 %v5105_v38 }
 0x36c   :  { %2057 = vmatprep.mubr.bf16.mxu1 %v5106_v40 }
 0x36d   :  { %v2140_v45 = vpack.c.bf16 %v2079_v44, %v2078_v43 }
 0x36e   :  { %v1843_v46 = vpop.f32.mrb[76].mxu1 }
 0x36f   :  { %v4482_v47 = vadd.f32 %v5761_v11, %v1843_v46  ;;  %v1845_v48 = vpop.f32.mrb[77].mxu1  ;;  %4416 = vmatprep.mubr.bf16.mxu0 %v2140_v45 }
 0x370   :  { %v1846_v50 = vpop.f32.mrb[78].mxu1 }
 0x371   :  { %v4483_v52 = vadd.f32 %v5761_v11, %v1846_v50  ;;  %v1848_v53 = vpop.f32.mrb[79].mxu1  ;;  %v2080_v54 = vmax.f32 %v4482_v47, 0.0 }
 0x373   :  { %v2081_v55 = vmax.f32 %v4483_v52, 0.0  ;;  %2058 = vmatmul.mubr.bf16.gmra.mrb[184].mxu1 %v5108_v49 }
 0x374   :  { %2065 = vmatprep.mubr.bf16.mxu1 %v5109_v51 }
 0x375   :  { %v2141_v56 = vpack.c.bf16 %v2081_v55, %v2080_v54 }
 0x376   :  { %v1851_v57 = vpop.f32.mrb[80].mxu1 }
 0x377   :  { %v4484_v58 = vadd.f32 %v5761_v11, %v1851_v57  ;;  %v1853_v59 = vpop.f32.mrb[81].mxu1  ;;  %4417 = vmatmul.mubr.bf16.gmra.mrb[4].mxu0 %v2141_v56 }
 0x378   :  { %v1854_v61 = vpop.f32.mrb[82].mxu1 }
 0x379   :  { %v4485_v62 = vadd.f32 %v5761_v11, %v1854_v61  ;;  %v1856_v63 = vpop.f32.mrb[83].mxu1  ;;  %v2082_v0 = vmax.f32 %v4484_v58, 0.0 }
 0x37b   :  { %v2083_v1 = vmax.f32 %v4485_v62, 0.0  ;;  %2066 = vmatmul.mubr.bf16.gmra.mrb[188].mxu1 %v5111_v60 }
 0x37d   :  { %v2142_v2 = vpack.c.bf16 %v2083_v1, %v2082_v0 }
 0x37e   :  { %v1859_v3 = vpop.f32.mrb[84].mxu1 }
 0x37f   :  { %v4486_v4 = vadd.f32 %v5761_v11, %v1859_v3  ;;  %v1861_v5 = vpop.f32.mrb[85].mxu1  ;;  %4420 = vmatprep.mubr.bf16.mxu0 %v2142_v2 }
 0x380   :  { %v1862_v6 = vpop.f32.mrb[86].mxu1 }
 0x381   :  { %v4487_v7 = vadd.f32 %v5761_v11, %v1862_v6  ;;  %v1864_v8 = vpop.f32.mrb[87].mxu1  ;;  %v2084_v9 = vmax.f32 %v4486_v4, 0.0 }
 0x383   :  { %v2085_v10 = vmax.f32 %v4487_v7, 0.0 }
 0x385   :  { %v2143_v12 = vpack.c.bf16 %v2085_v10, %v2084_v9 }
 0x386   :  { %v1867_v13 = vpop.f32.mrb[88].mxu1 }
 0x387   :  { %v4488_v14 = vadd.f32 %v5761_v11, %v1867_v13  ;;  %v1869_v15 = vpop.f32.mrb[89].mxu1  ;;  %4421 = vmatmul.mubr.bf16.gmra.mrb[8].mxu0 %v2143_v12 }
 0x388   :  { %v1870_v16 = vpop.f32.mrb[90].mxu1 }
 0x389   :  { %v4489_v17 = vadd.f32 %v5761_v11, %v1870_v16  ;;  %v1872_v18 = vpop.f32.mrb[91].mxu1  ;;  %v2086_v19 = vmax.f32 %v4488_v14, 0.0 }
 0x38b   :  { %v2087_v20 = vmax.f32 %v4489_v17, 0.0 }
 0x38d   :  { %v2144_v21 = vpack.c.bf16 %v2087_v20, %v2086_v19 }
 0x38e   :  { %v1875_v22 = vpop.f32.mrb[92].mxu1 }
 0x38f   :  { %v4490_v23 = vadd.f32 %v5761_v11, %v1875_v22  ;;  %v1877_v24 = vpop.f32.mrb[93].mxu1  ;;  %4424 = vmatprep.mubr.bf16.mxu0 %v2144_v21 }
 0x390   :  { %v1878_v25 = vpop.f32.mrb[94].mxu1 }
 0x391   :  { %v4491_v26 = vadd.f32 %v5761_v11, %v1878_v25  ;;  %v1880_v27 = vpop.f32.mrb[95].mxu1  ;;  %v2088_v28 = vmax.f32 %v4490_v23, 0.0 }
 0x393   :  { %v2089_v29 = vmax.f32 %v4491_v26, 0.0 }
 0x395   :  { %v2145_v30 = vpack.c.bf16 %v2089_v29, %v2088_v28 }
 0x396   :  { %v1883_v31 = vpop.f32.mrb[96].mxu1 }
 0x397   :  { %v4492_v33 = vadd.f32 %v5761_v11, %v1883_v31  ;;  %v1885_v34 = vpop.f32.mrb[97].mxu1  ;;  %4425 = vmatmul.mubr.bf16.gmra.mrb[12].mxu0 %v2145_v30 }
 0x398   :  { %v1886_v35 = vpop.f32.mrb[98].mxu1 }
 0x399   :  { %v4493_v36 = vadd.f32 %v5761_v11, %v1886_v35  ;;  %v1888_v37 = vpop.f32.mrb[99].mxu1  ;;  %v2090_v38 = vmax.f32 %v4492_v33, 0.0 }
 0x39b   :  { %v2091_v39 = vmax.f32 %v4493_v36, 0.0 }
 0x39d   :  { %v2146_v40 = vpack.c.bf16 %v2091_v39, %v2090_v38 }
 0x39e   :  { %v1891_v41 = vpop.f32.mrb[100].mxu1 }
 0x39f   :  { %v4494_v42 = vadd.f32 %v5761_v11, %v1891_v41  ;;  %v1893_v43 = vpop.f32.mrb[101].mxu1  ;;  %4428 = vmatprep.mubr.bf16.mxu0 %v2146_v40 }
 0x3a0   :  { %v1894_v44 = vpop.f32.mrb[102].mxu1 }
 0x3a1   :  { %v4495_v45 = vadd.f32 %v5761_v11, %v1894_v44  ;;  %v1896_v46 = vpop.f32.mrb[103].mxu1  ;;  %v2092_v47 = vmax.f32 %v4494_v42, 0.0 }
 0x3a3   :  { %v2093_v48 = vmax.f32 %v4495_v45, 0.0 }
 0x3a5   :  { %v2147_v49 = vpack.c.bf16 %v2093_v48, %v2092_v47 }
 0x3a6   :  { %v1899_v50 = vpop.f32.mrb[104].mxu1 }
 0x3a7   :  { %v4496_v51 = vadd.f32 %v5761_v11, %v1899_v50  ;;  %v1901_v52 = vpop.f32.mrb[105].mxu1  ;;  %4429 = vmatmul.mubr.bf16.gmra.mrb[16].mxu0 %v2147_v49 }
 0x3a8   :  { %v1902_v53 = vpop.f32.mrb[106].mxu1 }
 0x3a9   :  { %v4497_v54 = vadd.f32 %v5761_v11, %v1902_v53  ;;  %v1904_v55 = vpop.f32.mrb[107].mxu1  ;;  %v2094_v56 = vmax.f32 %v4496_v51, 0.0 }
 0x3ab   :  { %v2095_v57 = vmax.f32 %v4497_v54, 0.0 }
 0x3ad   :  { %v2148_v58 = vpack.c.bf16 %v2095_v57, %v2094_v56 }
 0x3ae   :  { %v1907_v59 = vpop.f32.mrb[108].mxu1 }
 0x3af   :  { %v4498_v60 = vadd.f32 %v5761_v11, %v1907_v59  ;;  %v1909_v61 = vpop.f32.mrb[109].mxu1  ;;  %4432 = vmatprep.mubr.bf16.mxu0 %v2148_v58 }
 0x3b0   :  { %v1910_v62 = vpop.f32.mrb[110].mxu1 }
 0x3b1   :  { %v4499_v63 = vadd.f32 %v5761_v11, %v1910_v62  ;;  %v1912_v0 = vpop.f32.mrb[111].mxu1  ;;  %v2096_v1 = vmax.f32 %v4498_v60, 0.0 }
 0x3b3   :  { %v2097_v2 = vmax.f32 %v4499_v63, 0.0 }
 0x3b5   :  { %v2149_v3 = vpack.c.bf16 %v2097_v2, %v2096_v1 }
 0x3b6   :  { %v1915_v4 = vpop.f32.mrb[112].mxu1 }
 0x3b7   :  { %v4500_v5 = vadd.f32 %v5761_v11, %v1915_v4  ;;  %v1917_v6 = vpop.f32.mrb[113].mxu1  ;;  %4433 = vmatmul.mubr.bf16.gmra.mrb[20].mxu0 %v2149_v3 }
 0x3b8   :  { %v1918_v7 = vpop.f32.mrb[114].mxu1 }
 0x3b9   :  { %v4501_v8 = vadd.f32 %v5761_v11, %v1918_v7  ;;  %v1920_v9 = vpop.f32.mrb[115].mxu1  ;;  %v2098_v10 = vmax.f32 %v4500_v5, 0.0 }
 0x3bb   :  { %v2099_v12 = vmax.f32 %v4501_v8, 0.0 }
 0x3bd   :  { %v2150_v13 = vpack.c.bf16 %v2099_v12, %v2098_v10 }
 0x3be   :  { %v1923_v14 = vpop.f32.mrb[116].mxu1 }
 0x3bf   :  { %v4502_v15 = vadd.f32 %v5761_v11, %v1923_v14  ;;  %v1925_v16 = vpop.f32.mrb[117].mxu1  ;;  %4436 = vmatprep.mubr.bf16.mxu0 %v2150_v13 }
 0x3c0   :  { %v1926_v17 = vpop.f32.mrb[118].mxu1 }
 0x3c1   :  { %v4503_v18 = vadd.f32 %v5761_v11, %v1926_v17  ;;  %v1928_v19 = vpop.f32.mrb[119].mxu1  ;;  %v2100_v20 = vmax.f32 %v4502_v15, 0.0 }
 0x3c3   :  { %v2101_v21 = vmax.f32 %v4503_v18, 0.0 }
 0x3c5   :  { %v2151_v22 = vpack.c.bf16 %v2101_v21, %v2100_v20 }
 0x3c6   :  { %v1931_v23 = vpop.f32.mrb[120].mxu1 }
 0x3c7   :  { %v4504_v24 = vadd.f32 %v5761_v11, %v1931_v23  ;;  %v1933_v25 = vpop.f32.mrb[121].mxu1  ;;  %4437 = vmatmul.mubr.bf16.gmra.mrb[24].mxu0 %v2151_v22 }
 0x3c8   :  { %v1934_v26 = vpop.f32.mrb[122].mxu1 }
 0x3c9   :  { %v4505_v27 = vadd.f32 %v5761_v11, %v1934_v26  ;;  %v1936_v28 = vpop.f32.mrb[123].mxu1  ;;  %v2102_v29 = vmax.f32 %v4504_v24, 0.0 }
 0x3cb   :  { %v2103_v30 = vmax.f32 %v4505_v27, 0.0 }
 0x3cd   :  { %v2152_v31 = vpack.c.bf16 %v2103_v30, %v2102_v29 }
 0x3ce   :  { %v1939_v33 = vpop.f32.mrb[124].mxu1 }
 0x3cf   :  { %v4506_v34 = vadd.f32 %v5761_v11, %v1939_v33  ;;  %v1941_v35 = vpop.f32.mrb[125].mxu1  ;;  %4440 = vmatprep.mubr.bf16.mxu0 %v2152_v31 }
 0x3d0   :  { %v1942_v36 = vpop.f32.mrb[126].mxu1 }
 0x3d1   :  { %v4507_v37 = vadd.f32 %v5761_v11, %v1942_v36  ;;  %v1944_v38 = vpop.f32.mrb[127].mxu1  ;;  %v2104_v39 = vmax.f32 %v4506_v34, 0.0 }
 0x3d3   :  { %v2105_v40 = vmax.f32 %v4507_v37, 0.0 }
 0x3d5   :  { %v2153_v41 = vpack.c.bf16 %v2105_v40, %v2104_v39 }
 0x3d6   :  { %v1947_v42 = vpop.f32.mrb[128].mxu1 }
 0x3d7   :  { %v4508_v43 = vadd.f32 %v5761_v11, %v1947_v42  ;;  %v1949_v44 = vpop.f32.mrb[129].mxu1  ;;  %4441 = vmatmul.mubr.bf16.gmra.mrb[28].mxu0 %v2153_v41 }
 0x3d8   :  { %v1950_v45 = vpop.f32.mrb[130].mxu1 }
 0x3d9   :  { %v4509_v46 = vadd.f32 %v5761_v11, %v1950_v45  ;;  %v1952_v47 = vpop.f32.mrb[131].mxu1  ;;  %v2106_v48 = vmax.f32 %v4508_v43, 0.0 }
 0x3db   :  { %v2107_v49 = vmax.f32 %v4509_v46, 0.0 }
 0x3dd   :  { %v2154_v50 = vpack.c.bf16 %v2107_v49, %v2106_v48 }
 0x3de   :  { %v1955_v51 = vpop.f32.mrb[132].mxu1 }
 0x3df   :  { %v4510_v52 = vadd.f32 %v5761_v11, %v1955_v51  ;;  %v1957_v53 = vpop.f32.mrb[133].mxu1  ;;  %4444 = vmatprep.mubr.bf16.mxu0 %v2154_v50 }
 0x3e0   :  { %v1958_v54 = vpop.f32.mrb[134].mxu1 }
 0x3e1   :  { %v4511_v55 = vadd.f32 %v5761_v11, %v1958_v54  ;;  %v1960_v56 = vpop.f32.mrb[135].mxu1  ;;  %v2108_v57 = vmax.f32 %v4510_v52, 0.0 }
 0x3e3   :  { %v2109_v58 = vmax.f32 %v4511_v55, 0.0 }
 0x3e5   :  { %v2155_v59 = vpack.c.bf16 %v2109_v58, %v2108_v57 }
 0x3e6   :  { %v1963_v60 = vpop.f32.mrb[136].mxu1 }
 0x3e7   :  { %v4512_v61 = vadd.f32 %v5761_v11, %v1963_v60  ;;  %v1965_v62 = vpop.f32.mrb[137].mxu1  ;;  %4445 = vmatmul.mubr.bf16.gmra.mrb[32].mxu0 %v2155_v59 }
 0x3e8   :  { %v1966_v63 = vpop.f32.mrb[138].mxu1 }
 0x3e9   :  { %v4513_v0 = vadd.f32 %v5761_v11, %v1966_v63  ;;  %v1968_v1 = vpop.f32.mrb[139].mxu1  ;;  %v2110_v2 = vmax.f32 %v4512_v61, 0.0 }
 0x3eb   :  { %v2111_v3 = vmax.f32 %v4513_v0, 0.0 }
 0x3ed   :  { %v2156_v4 = vpack.c.bf16 %v2111_v3, %v2110_v2 }
 0x3ee   :  { %v1971_v5 = vpop.f32.mrb[140].mxu1 }
 0x3ef   :  { %v4514_v6 = vadd.f32 %v5761_v11, %v1971_v5  ;;  %v1973_v7 = vpop.f32.mrb[141].mxu1  ;;  %4448 = vmatprep.mubr.bf16.mxu0 %v2156_v4 }
 0x3f0   :  { %v1974_v8 = vpop.f32.mrb[142].mxu1 }
 0x3f1   :  { %v4515_v9 = vadd.f32 %v5761_v11, %v1974_v8  ;;  %v1976_v10 = vpop.f32.mrb[143].mxu1  ;;  %v2112_v12 = vmax.f32 %v4514_v6, 0.0 }
 0x3f3   :  { %v2113_v13 = vmax.f32 %v4515_v9, 0.0 }
 0x3f5   :  { %v2157_v14 = vpack.c.bf16 %v2113_v13, %v2112_v12 }
 0x3f6   :  { %v1979_v15 = vpop.f32.mrb[144].mxu1 }
 0x3f7   :  { %v4516_v16 = vadd.f32 %v5761_v11, %v1979_v15  ;;  %v1981_v17 = vpop.f32.mrb[145].mxu1  ;;  %4449 = vmatmul.mubr.bf16.gmra.mrb[36].mxu0 %v2157_v14 }
 0x3f8   :  { %v1982_v18 = vpop.f32.mrb[146].mxu1 }
 0x3f9   :  { %v4517_v19 = vadd.f32 %v5761_v11, %v1982_v18  ;;  %v1984_v20 = vpop.f32.mrb[147].mxu1  ;;  %v2114_v21 = vmax.f32 %v4516_v16, 0.0 }
 0x3fb   :  { %v2115_v22 = vmax.f32 %v4517_v19, 0.0 }
 0x3fd   :  { %v2158_v23 = vpack.c.bf16 %v2115_v22, %v2114_v21 }
 0x3fe   :  { %v1987_v24 = vpop.f32.mrb[148].mxu1 }
 0x3ff   :  { %v4518_v25 = vadd.f32 %v5761_v11, %v1987_v24  ;;  %v1989_v26 = vpop.f32.mrb[149].mxu1  ;;  %4452 = vmatprep.mubr.bf16.mxu0 %v2158_v23 }
 0x400   :  { %v1990_v27 = vpop.f32.mrb[150].mxu1 }
 0x401   :  { %v4519_v28 = vadd.f32 %v5761_v11, %v1990_v27  ;;  %v1992_v29 = vpop.f32.mrb[151].mxu1  ;;  %v2116_v30 = vmax.f32 %v4518_v25, 0.0 }
 0x403   :  { %v2117_v31 = vmax.f32 %v4519_v28, 0.0 }
 0x405   :  { %v2159_v33 = vpack.c.bf16 %v2117_v31, %v2116_v30 }
 0x406   :  { %v1995_v34 = vpop.f32.mrb[152].mxu1 }
 0x407   :  { %v4520_v35 = vadd.f32 %v5761_v11, %v1995_v34  ;;  %v1997_v36 = vpop.f32.mrb[153].mxu1  ;;  %4453 = vmatmul.mubr.bf16.gmra.mrb[40].mxu0 %v2159_v33 }
 0x408   :  { %v1998_v37 = vpop.f32.mrb[154].mxu1 }
 0x409   :  { %v4521_v38 = vadd.f32 %v5761_v11, %v1998_v37  ;;  %v2000_v39 = vpop.f32.mrb[155].mxu1  ;;  %v2118_v40 = vmax.f32 %v4520_v35, 0.0 }
 0x40b   :  { %v2119_v41 = vmax.f32 %v4521_v38, 0.0 }
 0x40d   :  { %v2160_v42 = vpack.c.bf16 %v2119_v41, %v2118_v40 }
 0x40e   :  { %v2003_v43 = vpop.f32.mrb[156].mxu1 }
 0x40f   :  { %v4522_v44 = vadd.f32 %v5761_v11, %v2003_v43  ;;  %v2005_v45 = vpop.f32.mrb[157].mxu1  ;;  %4456 = vmatprep.mubr.bf16.mxu0 %v2160_v42 }
 0x410   :  { %v2006_v46 = vpop.f32.mrb[158].mxu1 }
 0x411   :  { %v4523_v47 = vadd.f32 %v5761_v11, %v2006_v46  ;;  %v2008_v48 = vpop.f32.mrb[159].mxu1  ;;  %v2120_v49 = vmax.f32 %v4522_v44, 0.0 }
 0x413   :  { %v2121_v50 = vmax.f32 %v4523_v47, 0.0 }
 0x415   :  { %v2161_v51 = vpack.c.bf16 %v2121_v50, %v2120_v49 }
 0x416   :  { %v2011_v52 = vpop.f32.mrb[160].mxu1 }
 0x417   :  { %v4524_v53 = vadd.f32 %v5761_v11, %v2011_v52  ;;  %v2013_v54 = vpop.f32.mrb[161].mxu1  ;;  %4457 = vmatmul.mubr.bf16.gmra.mrb[44].mxu0 %v2161_v51 }
 0x418   :  { %v2014_v55 = vpop.f32.mrb[162].mxu1 }
 0x419   :  { %v4525_v56 = vadd.f32 %v5761_v11, %v2014_v55  ;;  %v2016_v57 = vpop.f32.mrb[163].mxu1  ;;  %v2122_v58 = vmax.f32 %v4524_v53, 0.0 }
 0x41b   :  { %v2123_v59 = vmax.f32 %v4525_v56, 0.0 }
 0x41d   :  { %v2162_v60 = vpack.c.bf16 %v2123_v59, %v2122_v58 }
 0x41e   :  { %v2019_v61 = vpop.f32.mrb[164].mxu1 }
 0x41f   :  { %v4526_v62 = vadd.f32 %v5761_v11, %v2019_v61  ;;  %v2021_v63 = vpop.f32.mrb[165].mxu1  ;;  %4460 = vmatprep.mubr.bf16.mxu0 %v2162_v60 }
 0x420   :  { %v2022_v0 = vpop.f32.mrb[166].mxu1 }
 0x421   :  { %v4527_v1 = vadd.f32 %v5761_v11, %v2022_v0  ;;  %v2024_v2 = vpop.f32.mrb[167].mxu1  ;;  %v2124_v3 = vmax.f32 %v4526_v62, 0.0 }
 0x423   :  { %v2125_v4 = vmax.f32 %v4527_v1, 0.0 }
 0x425   :  { %v2163_v5 = vpack.c.bf16 %v2125_v4, %v2124_v3 }
 0x426   :  { %v2027_v6 = vpop.f32.mrb[168].mxu1 }
 0x427   :  { %v4528_v7 = vadd.f32 %v5761_v11, %v2027_v6  ;;  %v2029_v8 = vpop.f32.mrb[169].mxu1  ;;  %4461 = vmatmul.mubr.bf16.gmra.mrb[48].mxu0 %v2163_v5 }
 0x428   :  { %v2030_v9 = vpop.f32.mrb[170].mxu1 }
 0x429   :  { %v4529_v10 = vadd.f32 %v5761_v11, %v2030_v9  ;;  %v2032_v12 = vpop.f32.mrb[171].mxu1  ;;  %v2126_v13 = vmax.f32 %v4528_v7, 0.0 }
 0x42b   :  { %v2127_v14 = vmax.f32 %v4529_v10, 0.0  ;;  %v5368_v10 = vld [vmem:[#allocation2 + $0x4] ss:$16 sps:$4 sm:$0xff]  }
 0x42d   :  { %v2164_v15 = vpack.c.bf16 %v2127_v14, %v2126_v13 }
 0x42e   :  { %v2035_v16 = vpop.f32.mrb[172].mxu1 }
 0x42f   :  { %v4530_v17 = vadd.f32 %v5761_v11, %v2035_v16  ;;  %v2037_v18 = vpop.f32.mrb[173].mxu1  ;;  %4464 = vmatprep.mubr.bf16.mxu0 %v2164_v15 }
 0x430   :  { %v2038_v19 = vpop.f32.mrb[174].mxu1 }
 0x431   :  { %v4531_v20 = vadd.f32 %v5761_v11, %v2038_v19  ;;  %v2040_v21 = vpop.f32.mrb[175].mxu1  ;;  %v2128_v22 = vmax.f32 %v4530_v17, 0.0 }
 0x433   :  { %v2129_v23 = vmax.f32 %v4531_v20, 0.0 }
 0x435   :  { %v2165_v24 = vpack.c.bf16 %v2129_v23, %v2128_v22 }
 0x436   :  { %v2043_v25 = vpop.f32.mrb[176].mxu1 }
 0x437   :  { %v4532_v26 = vadd.f32 %v5761_v11, %v2043_v25  ;;  %v2045_v27 = vpop.f32.mrb[177].mxu1  ;;  %4465 = vmatmul.mubr.bf16.gmra.mrb[52].mxu0 %v2165_v24 }
 0x438   :  { %v2046_v28 = vpop.f32.mrb[178].mxu1 }
 0x439   :  { %v4533_v29 = vadd.f32 %v5761_v11, %v2046_v28  ;;  %v2048_v30 = vpop.f32.mrb[179].mxu1  ;;  %v2130_v33 = vmax.f32 %v4532_v26, 0.0 }
 0x43a   :  { %v4414_v31 = vpop.f32.mrb[0].mxu0 }
 0x43b   :  { %v2131_v34 = vmax.f32 %v4533_v29, 0.0  ;;  %v2268_v35 = vpop.f32.mrb[1].mxu0 }
 0x43c   :  { %v4415_v36 = vpop.f32.mrb[2].mxu0 }
 0x43d   :  { %v2166_v37 = vpack.c.bf16 %v2131_v34, %v2130_v33  ;;  %v2524_v38 = vpack.c.bf16 %v4415_v36, %v4414_v31  ;;  %v2271_v39 = vpop.f32.mrb[3].mxu0 }
 0x43e   :  { %v2523_v40 = vpack.c.bf16 %v2271_v39, %v2268_v35  ;;  %v2051_v41 = vpop.f32.mrb[180].mxu1 }
 0x43f   :  { %v4534_v42 = vadd.f32 %v5761_v11, %v2051_v41  ;;  %v2053_v43 = vpop.f32.mrb[181].mxu1  ;;  %4468 = vmatprep.mubr.bf16.mxu0 %v2166_v37 }
 0x440   :  { %v2054_v44 = vpop.f32.mrb[182].mxu1  ;;  %2563 = vmatpush1.bf16.msra.mxu0 %v2523_v40 }
 0x441   :  { %v4535_v45 = vadd.f32 %v5761_v11, %v2054_v44  ;;  %v2056_v46 = vpop.f32.mrb[183].mxu1  ;;  %2564 = vmatprep.subr.bf16.mxu0 %v5622_v32  ;;  %v2132_v47 = vmax.f32 %v4534_v42, 0.0 }
 0x443   :  { %v2133_v48 = vmax.f32 %v4535_v45, 0.0 }
 0x444   :  { %2565 = vmatpush1.bf16.msra.mxu0 %v2524_v38 }
 0x445   :  { %v2167_v49 = vpack.c.bf16 %v2133_v48, %v2132_v47  ;;  %2566 = vmatprep.subr.bf16.mxu0 %v5622_v32  ;;  %v5369_v48 = vld [vmem:[#allocation2] ss:$16 sps:$4 sm:$0xff]  }
 0x446   :  { %v2059_v50 = vpop.f32.mrb[184].mxu1 }
 0x447   :  { %v4536_v51 = vadd.f32 %v5761_v11, %v2059_v50  ;;  %v2061_v52 = vpop.f32.mrb[185].mxu1  ;;  %4469 = vmatmul.mubr.bf16.gmra.mrb[56].mxu0 %v2167_v49  ;;  %v5370_v49 = vld [vmem:[#allocation2 + $0x24] ss:$16 sps:$4 sm:$0xff]  }
 0x448   :  { %v2062_v53 = vpop.f32.mrb[186].mxu1 }
 0x449   :  { %v4537_v54 = vadd.f32 %v5761_v11, %v2062_v53  ;;  %v2064_v55 = vpop.f32.mrb[187].mxu1  ;;  %v2134_v57 = vmax.f32 %v4536_v51, 0.0 }
 0x44a   :  { %v4418_v56 = vpop.f32.mrb[4].mxu0 }
 0x44b   :  { %v2135_v58 = vmax.f32 %v4537_v54, 0.0  ;;  %v2284_v59 = vpop.f32.mrb[5].mxu0 }
 0x44c   :  { %v4419_v60 = vpop.f32.mrb[6].mxu0 }
 0x44d   :  { %v2168_v61 = vpack.c.bf16 %v2135_v58, %v2134_v57  ;;  %v2526_v62 = vpack.c.bf16 %v4419_v60, %v4418_v56  ;;  %v2287_v63 = vpop.f32.mrb[7].mxu0  ;;  %v5371_v56 = vld [vmem:[#allocation2 + $0x20] ss:$16 sps:$4 sm:$0xff]   ;;  %v5372_v57 = vld [vmem:[#allocation2 + $0x44] ss:$16 sps:$4 sm:$0xff]  }
 0x44e   :  { %v2525_v0 = vpack.c.bf16 %v2287_v63, %v2284_v59  ;;  %v2067_v1 = vpop.f32.mrb[188].mxu1  ;;  %v5373_v58 = vld [vmem:[#allocation2 + $0x40] ss:$16 sps:$4 sm:$0xff]   ;;  %v5374_v59 = vld [vmem:[#allocation2 + $0x64] ss:$16 sps:$4 sm:$0xff]  }
 0x44f   :  { %v4538_v2 = vadd.f32 %v5761_v11, %v2067_v1  ;;  %v2069_v3 = vpop.f32.mrb[189].mxu1  ;;  %4472 = vmatprep.mubr.bf16.mxu0 %v2168_v61 }
 0x450   :  { %v2070_v4 = vpop.f32.mrb[190].mxu1  ;;  %2567 = vmatpush1.bf16.msra.mxu0 %v2525_v0  ;;  %v5376_v3 = vld [vmem:[#allocation2 + $0x84] ss:$16 sps:$4 sm:$0xff]  }
 0x451   :  { %v4539_v5 = vadd.f32 %v5761_v11, %v2070_v4  ;;  %v2072_v6 = vpop.f32.mrb[191].mxu1  ;;  %2568 = vmatprep.subr.bf16.mxu0 %v5622_v32  ;;  %v2136_v7 = vmax.f32 %v4538_v2, 0.0  ;;  %v5375_v2 = vld [vmem:[#allocation2 + $0x60] ss:$16 sps:$4 sm:$0xff]  }
 0x452   :  { %v5377_v4 = vld [vmem:[#allocation2 + $0x80] ss:$16 sps:$4 sm:$0xff]  }
 0x453   :  { %v2137_v8 = vmax.f32 %v4539_v5, 0.0  ;;  %v5378_v5 = vld [vmem:[#allocation2 + $0xa4] ss:$16 sps:$4 sm:$0xff]  }
 0x454   :  { %2569 = vmatpush1.bf16.msra.mxu0 %v2526_v62 }
 0x455   :  { %v2169_v9 = vpack.c.bf16 %v2137_v8, %v2136_v7  ;;  %2570 = vmatprep.subr.bf16.mxu0 %v5622_v32 }
 0x457   :  { %4473 = vmatmul.mubr.bf16.gmra.mrb[60].mxu0 %v2169_v9 }
 0x458   :  { %2594 = vmatprep.mubr.bf16.mxu0 %v5368_v10 }
 0x45a   :  { %v4422_v12 = vpop.f32.mrb[8].mxu0 }
 0x45b   :  { %v2300_v13 = vpop.f32.mrb[9].mxu0 }
 0x45c   :  { %v4423_v14 = vpop.f32.mrb[10].mxu0 }
 0x45d   :  { %v2528_v15 = vpack.c.bf16 %v4423_v14, %v4422_v12  ;;  %v2303_v16 = vpop.f32.mrb[11].mxu0  ;;  %v5380_v14 = vld [vmem:[#allocation2 + $0xc4] ss:$16 sps:$4 sm:$0xff]  }
 0x45e   :  { %v2527_v17 = vpack.c.bf16 %v2303_v16, %v2300_v13  ;;  %v5379_v13 = vld [vmem:[#allocation2 + $0xa0] ss:$16 sps:$4 sm:$0xff]   ;;  %v5382_v16 = vld [vmem:[#allocation2 + $0xe4] ss:$16 sps:$4 sm:$0xff]  }
 0x460   :  { %2571 = vmatpush1.bf16.msra.mxu0 %v2527_v17 }
 0x461   :  { %2572 = vmatprep.subr.bf16.mxu0 %v5622_v32 }
 0x464   :  { %2573 = vmatpush1.bf16.msra.mxu0 %v2528_v15  ;;  %v5381_v15 = vld [vmem:[#allocation2 + $0xc0] ss:$16 sps:$4 sm:$0xff]  }
 0x465   :  { %2574 = vmatprep.subr.bf16.mxu0 %v5622_v32 }
 0x46a   :  { %v4426_v11 = vpop.f32.mrb[12].mxu0 }
 0x46b   :  { %v2316_v18 = vpop.f32.mrb[13].mxu0 }
 0x46c   :  { %v4427_v19 = vpop.f32.mrb[14].mxu0 }
 0x46d   :  { %v2530_v20 = vpack.c.bf16 %v4427_v19, %v4426_v11  ;;  %v2319_v21 = vpop.f32.mrb[15].mxu0 }
 0x46e   :  { %v2529_v22 = vpack.c.bf16 %v2319_v21, %v2316_v18 }
 0x470   :  { %2575 = vmatpush1.bf16.msra.mxu0 %v2529_v22  ;;  %v5383_v22 = vld [vmem:[#allocation2 + $0xe0] ss:$16 sps:$4 sm:$0xff]  }
 0x471   :  { %2576 = vmatprep.subr.bf16.mxu0 %v5622_v32 }
 0x474   :  { %2577 = vmatpush1.bf16.msra.mxu0 %v2530_v20 }
 0x475   :  { %2578 = vmatprep.subr.bf16.mxu0 %v5622_v32 }
 0x47a   :  { %v4430_v23 = vpop.f32.mrb[16].mxu0 }
 0x47b   :  { %v2332_v24 = vpop.f32.mrb[17].mxu0 }
 0x47c   :  { %v4431_v25 = vpop.f32.mrb[18].mxu0 }
 0x47d   :  { %v2532_v26 = vpack.c.bf16 %v4431_v25, %v4430_v23  ;;  %v2335_v27 = vpop.f32.mrb[19].mxu0  ;;  %v5384_v23 = vld [vmem:[#allocation2 + $0x104] ss:$16 sps:$4 sm:$0xff]  }
 0x47e   :  { %v2531_v28 = vpack.c.bf16 %v2335_v27, %v2332_v24  ;;  %v5385_v24 = vld [vmem:[#allocation2 + $0x100] ss:$16 sps:$4 sm:$0xff]   ;;  %v5386_v25 = vld [vmem:[#allocation2 + $0x124] ss:$16 sps:$4 sm:$0xff]  }
 0x480   :  { %2579 = vmatpush1.bf16.msra.mxu0 %v2531_v28 }
 0x481   :  { %2580 = vmatprep.subr.bf16.mxu0 %v5622_v32 }
 0x484   :  { %2581 = vmatpush1.bf16.msra.mxu0 %v2532_v26 }
 0x485   :  { %2582 = vmatprep.subr.bf16.mxu0 %v5622_v32 }
 0x48a   :  { %v4434_v29 = vpop.f32.mrb[20].mxu0 }
 0x48b   :  { %v2348_v30 = vpop.f32.mrb[21].mxu0 }
 0x48c   :  { %v4435_v31 = vpop.f32.mrb[22].mxu0 }
 0x48d   :  { %v2534_v33 = vpack.c.bf16 %v4435_v31, %v4434_v29  ;;  %v2351_v34 = vpop.f32.mrb[23].mxu0 }
 0x48e   :  { %v2533_v35 = vpack.c.bf16 %v2351_v34, %v2348_v30  ;;  %v5388_v34 = vld [vmem:[#allocation2 + $0x144] ss:$16 sps:$4 sm:$0xff]  }
 0x490   :  { %2583 = vmatpush1.bf16.msra.mxu0 %v2533_v35  ;;  %v5389_v35 = vld [vmem:[#allocation2 + $0x140] ss:$16 sps:$4 sm:$0xff]  }
 0x491   :  { %2584 = vmatprep.subr.bf16.mxu0 %v5622_v32 }
 0x494   :  { %2585 = vmatpush1.bf16.msra.mxu0 %v2534_v33  ;;  %v5387_v33 = vld [vmem:[#allocation2 + $0x120] ss:$16 sps:$4 sm:$0xff]  }
 0x495   :  { %2586 = vmatprep.subr.bf16.mxu0 %v5622_v32 }
 0x49a   :  { %v4438_v36 = vpop.f32.mrb[24].mxu0 }
 0x49b   :  { %v2364_v37 = vpop.f32.mrb[25].mxu0 }
 0x49c   :  { %v4439_v38 = vpop.f32.mrb[26].mxu0 }
 0x49d   :  { %v2536_v39 = vpack.c.bf16 %v4439_v38, %v4438_v36  ;;  %v2367_v40 = vpop.f32.mrb[27].mxu0  ;;  %v5390_v36 = vld [vmem:[#allocation2 + $0x164] ss:$16 sps:$4 sm:$0xff]  }
 0x49e   :  { %v2535_v41 = vpack.c.bf16 %v2367_v40, %v2364_v37 }
 0x4a0   :  { %2587 = vmatpush1.bf16.msra.mxu0 %v2535_v41 }
 0x4a1   :  { %2588 = vmatprep.subr.bf16.mxu0 %v5622_v32 }
 0x4a4   :  { %2589 = vmatpush1.bf16.msra.mxu0 %v2536_v39 }
 0x4a5   :  { %2590 = vmatprep.subr.bf16.mxu0 %v5622_v32 }
 0x4aa   :  { %v4442_v42 = vpop.f32.mrb[28].mxu0 }
 0x4ab   :  { %v2380_v43 = vpop.f32.mrb[29].mxu0 }
 0x4ac   :  { %v4443_v44 = vpop.f32.mrb[30].mxu0 }
 0x4ad   :  { %v2538_v45 = vpack.c.bf16 %v4443_v44, %v4442_v42  ;;  %v2383_v46 = vpop.f32.mrb[31].mxu0  ;;  %v5392_v44 = vld [vmem:[#allocation2 + $0x184] ss:$16 sps:$4 sm:$0xff]  }
 0x4ae   :  { %v2537_v47 = vpack.c.bf16 %v2383_v46, %v2380_v43  ;;  %v5391_v43 = vld [vmem:[#allocation2 + $0x160] ss:$16 sps:$4 sm:$0xff]   ;;  %v5394_v46 = vld [vmem:[#allocation2 + $0x1a4] ss:$16 sps:$4 sm:$0xff]  }
 0x4b0   :  { %2591 = vmatpush1.bf16.msra.mxu0 %v2537_v47 }
 0x4b1   :  { %2592 = vmatprep.subr.bf16.mxu0 %v5622_v32 }
 0x4b4   :  { %2593 = vmatpush1.bf16.msra.mxu0 %v2538_v45  ;;  %v5393_v45 = vld [vmem:[#allocation2 + $0x180] ss:$16 sps:$4 sm:$0xff]  }
 0x4b5   :  { %2851 = vmatprep.subr.bf16.mxu0 %v5622_v32 }
 0x4b7   :  { %2595 = vmatmul.mubr.bf16.vlgmr.msra.gmra.mrb[64].mxu0 %v5369_v48 }
 0x4b8   :  { %2602 = vmatprep.mubr.bf16.mxu0 %v5370_v49 }
 0x4ba   :  { %v4446_v50 = vpop.f32.mrb[32].mxu0 }
 0x4bb   :  { %v2396_v51 = vpop.f32.mrb[33].mxu0 }
 0x4bc   :  { %v4447_v52 = vpop.f32.mrb[34].mxu0 }
 0x4bd   :  { %v2540_v53 = vpack.c.bf16 %v4447_v52, %v4446_v50  ;;  %v2399_v54 = vpop.f32.mrb[35].mxu0 }
 0x4be   :  { %v2539_v55 = vpack.c.bf16 %v2399_v54, %v2396_v51  ;;  %v5396_v54 = vld [vmem:[#allocation2 + $0x1c4] ss:$16 sps:$4 sm:$0xff]  }
 0x4bf   :  { %2603 = vmatmul.mubr.bf16.gmra.mrb[68].mxu0 %v5371_v56  ;;  %v5398_v56 = vld [vmem:[#allocation2 + $0x1e4] ss:$16 sps:$4 sm:$0xff]  }
 0x4c0   :  { %2852 = vmatpush1.bf16.msra.mxu0 %v2539_v55  ;;  %2610 = vmatprep.mubr.bf16.mxu0 %v5372_v57  ;;  %v5397_v55 = vld [vmem:[#allocation2 + $0x1c0] ss:$16 sps:$4 sm:$0xff]  }
 0x4c1   :  { %2853 = vmatprep.subr.bf16.mxu0 %v5622_v32 }
 0x4c4   :  { %2854 = vmatpush1.bf16.msra.mxu0 %v2540_v53  ;;  %v5395_v53 = vld [vmem:[#allocation2 + $0x1a0] ss:$16 sps:$4 sm:$0xff]  }
 0x4c5   :  { %2855 = vmatprep.subr.bf16.mxu0 %v5622_v32 }
 0x4c7   :  { %2611 = vmatmul.mubr.bf16.gmra.mrb[72].mxu0 %v5373_v58 }
 0x4c8   :  { %2618 = vmatprep.mubr.bf16.mxu0 %v5374_v59 }
 0x4ca   :  { %v4450_v60 = vpop.f32.mrb[36].mxu0 }
 0x4cb   :  { %v2412_v61 = vpop.f32.mrb[37].mxu0 }
 0x4cc   :  { %v4451_v62 = vpop.f32.mrb[38].mxu0 }
 0x4cd   :  { %v2542_v63 = vpack.c.bf16 %v4451_v62, %v4450_v60  ;;  %v2415_v0 = vpop.f32.mrb[39].mxu0 }
 0x4ce   :  { %v2541_v1 = vpack.c.bf16 %v2415_v0, %v2412_v61  ;;  %v5400_v0 = vld [vmem:[#allocation2 + $0x204] ss:$16 sps:$4 sm:$0xff]  }
 0x4cf   :  { %2619 = vmatmul.mubr.bf16.gmra.mrb[76].mxu0 %v5375_v2  ;;  %v5402_v2 = vld [vmem:[#allocation2 + $0x224] ss:$16 sps:$4 sm:$0xff]  }
 0x4d0   :  { %2856 = vmatpush1.bf16.msra.mxu0 %v2541_v1  ;;  %2626 = vmatprep.mubr.bf16.mxu0 %v5376_v3  ;;  %v5401_v1 = vld [vmem:[#allocation2 + $0x200] ss:$16 sps:$4 sm:$0xff]  }
 0x4d1   :  { %2857 = vmatprep.subr.bf16.mxu0 %v5622_v32  ;;  %v5403_v3 = vld [vmem:[#allocation2 + $0x220] ss:$16 sps:$4 sm:$0xff]  }
 0x4d4   :  { %2858 = vmatpush1.bf16.msra.mxu0 %v2542_v63  ;;  %v5399_v63 = vld [vmem:[#allocation2 + $0x1e0] ss:$16 sps:$4 sm:$0xff]  }
 0x4d5   :  { %2859 = vmatprep.subr.bf16.mxu0 %v5622_v32 }
 0x4d7   :  { %2627 = vmatmul.mubr.bf16.gmra.mrb[80].mxu0 %v5377_v4  ;;  %v5404_v4 = vld [vmem:[#allocation2 + $0x244] ss:$16 sps:$4 sm:$0xff]  }
 0x4d8   :  { %2634 = vmatprep.mubr.bf16.mxu0 %v5378_v5  ;;  %v5405_v5 = vld [vmem:[#allocation2 + $0x240] ss:$16 sps:$4 sm:$0xff]  }
 0x4da   :  { %v4454_v6 = vpop.f32.mrb[40].mxu0 }
 0x4db   :  { %v2428_v7 = vpop.f32.mrb[41].mxu0 }
 0x4dc   :  { %v4455_v8 = vpop.f32.mrb[42].mxu0 }
 0x4dd   :  { %v2544_v9 = vpack.c.bf16 %v4455_v8, %v4454_v6  ;;  %v2431_v10 = vpop.f32.mrb[43].mxu0  ;;  %v5406_v6 = vld [vmem:[#allocation2 + $0x264] ss:$16 sps:$4 sm:$0xff]  }
 0x4de   :  { %v2543_v12 = vpack.c.bf16 %v2431_v10, %v2428_v7  ;;  %v5407_v7 = vld [vmem:[#allocation2 + $0x260] ss:$16 sps:$4 sm:$0xff]   ;;  %v5408_v8 = vld [vmem:[#allocation2 + $0x284] ss:$16 sps:$4 sm:$0xff]  }
 0x4df   :  { %2635 = vmatmul.mubr.bf16.gmra.mrb[84].mxu0 %v5379_v13  ;;  %v5411_v10 = vld [vmem:[#allocation2 + $0x2a0] ss:$16 sps:$4 sm:$0xff]  }
 0x4e0   :  { %2860 = vmatpush1.bf16.msra.mxu0 %v2543_v12  ;;  %2642 = vmatprep.mubr.bf16.mxu0 %v5380_v14  ;;  %v5412_v12 = vld [vmem:[#allocation2 + $0x2c4] ss:$16 sps:$4 sm:$0xff]   ;;  %v5413_v13 = vld [vmem:[#allocation2 + $0x2c0] ss:$16 sps:$4 sm:$0xff]  }
 0x4e1   :  { %2861 = vmatprep.subr.bf16.mxu0 %v5622_v32  ;;  %v5414_v14 = vld [vmem:[#allocation2 + $0x2e4] ss:$16 sps:$4 sm:$0xff]  }
 0x4e4   :  { %2862 = vmatpush1.bf16.msra.mxu0 %v2544_v9  ;;  %v5409_v9 = vld [vmem:[#allocation2 + $0x280] ss:$16 sps:$4 sm:$0xff]  }
 0x4e5   :  { %2863 = vmatprep.subr.bf16.mxu0 %v5622_v32 }
 0x4e7   :  { %2643 = vmatmul.mubr.bf16.gmra.mrb[88].mxu0 %v5381_v15  ;;  %v5415_v15 = vld [vmem:[#allocation2 + $0x2e0] ss:$16 sps:$4 sm:$0xff]  }
 0x4e8   :  { %2650 = vmatprep.mubr.bf16.mxu0 %v5382_v16  ;;  %v5416_v16 = vld [vmem:[#allocation2 + $0x304] ss:$16 sps:$4 sm:$0xff]  }
 0x4ea   :  { %v4458_v17 = vpop.f32.mrb[44].mxu0 }
 0x4eb   :  { %v2444_v11 = vpop.f32.mrb[45].mxu0 }
 0x4ec   :  { %v4459_v18 = vpop.f32.mrb[46].mxu0 }
 0x4ed   :  { %v2546_v19 = vpack.c.bf16 %v4459_v18, %v4458_v17  ;;  %v2447_v20 = vpop.f32.mrb[47].mxu0  ;;  %v5417_v17 = vld [vmem:[#allocation2 + $0x300] ss:$16 sps:$4 sm:$0xff]  }
 0x4ee   :  { %v2545_v21 = vpack.c.bf16 %v2447_v20, %v2444_v11  ;;  %v5418_v11 = vld [vmem:[#allocation2 + $0x324] ss:$16 sps:$4 sm:$0xff]   ;;  %v5419_v18 = vld [vmem:[#allocation2 + $0x320] ss:$16 sps:$4 sm:$0xff]  }
 0x4ef   :  { %2651 = vmatmul.mubr.bf16.gmra.mrb[92].mxu0 %v5383_v22  ;;  %v5421_v20 = vld [vmem:[#allocation2 + $0x340] ss:$16 sps:$4 sm:$0xff]  }
 0x4f0   :  { %2864 = vmatpush1.bf16.msra.mxu0 %v2545_v21  ;;  %2658 = vmatprep.mubr.bf16.mxu0 %v5384_v23  ;;  %v5422_v21 = vld [vmem:[#allocation2 + $0x364] ss:$16 sps:$4 sm:$0xff]   ;;  %v5423_v22 = vld [vmem:[#allocation2 + $0x360] ss:$16 sps:$4 sm:$0xff]  }
 0x4f1   :  { %2865 = vmatprep.subr.bf16.mxu0 %v5622_v32  ;;  %v5424_v23 = vld [vmem:[#allocation2 + $0x384] ss:$16 sps:$4 sm:$0xff]  }
 0x4f4   :  { %2866 = vmatpush1.bf16.msra.mxu0 %v2546_v19  ;;  %v5420_v19 = vld [vmem:[#allocation2 + $0x344] ss:$16 sps:$4 sm:$0xff]  }
 0x4f5   :  { %2867 = vmatprep.subr.bf16.mxu0 %v5622_v32 }
 0x4f7   :  { %2659 = vmatmul.mubr.bf16.gmra.mrb[96].mxu0 %v5385_v24  ;;  %v5425_v24 = vld [vmem:[#allocation2 + $0x380] ss:$16 sps:$4 sm:$0xff]  }
 0x4f8   :  { %2666 = vmatprep.mubr.bf16.mxu0 %v5386_v25  ;;  %v5426_v25 = vld [vmem:[#allocation2 + $0x3a4] ss:$16 sps:$4 sm:$0xff]  }
 0x4fa   :  { %v4462_v26 = vpop.f32.mrb[48].mxu0 }
 0x4fb   :  { %v2460_v27 = vpop.f32.mrb[49].mxu0 }
 0x4fc   :  { %v4463_v28 = vpop.f32.mrb[50].mxu0 }
 0x4fd   :  { %v2548_v29 = vpack.c.bf16 %v4463_v28, %v4462_v26  ;;  %v2463_v30 = vpop.f32.mrb[51].mxu0  ;;  %v5427_v26 = vld [vmem:[#allocation2 + $0x3a0] ss:$16 sps:$4 sm:$0xff]  }
 0x4fe   :  { %v2547_v31 = vpack.c.bf16 %v2463_v30, %v2460_v27  ;;  %v5428_v27 = vld [vmem:[#allocation2 + $0x3c4] ss:$16 sps:$4 sm:$0xff]   ;;  %v5429_v28 = vld [vmem:[#allocation2 + $0x3c0] ss:$16 sps:$4 sm:$0xff]  }
 0x4ff   :  { %2667 = vmatmul.mubr.bf16.gmra.mrb[100].mxu0 %v5387_v33  ;;  %v5431_v30 = vld [vmem:[#allocation2 + $0x3e0] ss:$16 sps:$4 sm:$0xff]   ;;  %v5433_v33 = vld [vmem:[#allocation2 + $0x8] ss:$16 sps:$4 sm:$0xff]  }
 0x500   :  { %2868 = vmatpush1.bf16.msra.mxu0 %v2547_v31  ;;  %2674 = vmatprep.mubr.bf16.mxu0 %v5388_v34  ;;  %v5432_v31 = vld [vmem:[#allocation2 + $0xc] ss:$16 sps:$4 sm:$0xff]  }
 0x501   :  { %2869 = vmatprep.subr.bf16.mxu0 %v5622_v32  ;;  %v5434_v34 = vld [vmem:[#allocation2 + $0x2c] ss:$16 sps:$4 sm:$0xff]  }
 0x504   :  { %2870 = vmatpush1.bf16.msra.mxu0 %v2548_v29  ;;  %v5430_v29 = vld [vmem:[#allocation2 + $0x3e4] ss:$16 sps:$4 sm:$0xff]  }
 0x505   :  { %2871 = vmatprep.subr.bf16.mxu0 %v5622_v32 }
 0x507   :  { %2675 = vmatmul.mubr.bf16.gmra.mrb[104].mxu0 %v5389_v35  ;;  %v5435_v35 = vld [vmem:[#allocation2 + $0x28] ss:$16 sps:$4 sm:$0xff]  }
 0x508   :  { %2682 = vmatprep.mubr.bf16.mxu0 %v5390_v36  ;;  %v5436_v36 = vld [vmem:[#allocation2 + $0x4c] ss:$16 sps:$4 sm:$0xff]  }
 0x50a   :  { %v4466_v37 = vpop.f32.mrb[52].mxu0 }
 0x50b   :  { %v2476_v38 = vpop.f32.mrb[53].mxu0 }
 0x50c   :  { %v4467_v39 = vpop.f32.mrb[54].mxu0 }
 0x50d   :  { %v2550_v40 = vpack.c.bf16 %v4467_v39, %v4466_v37  ;;  %v2479_v41 = vpop.f32.mrb[55].mxu0  ;;  %v5437_v37 = vld [vmem:[#allocation2 + $0x48] ss:$16 sps:$4 sm:$0xff]  }
 0x50e   :  { %v2549_v42 = vpack.c.bf16 %v2479_v41, %v2476_v38  ;;  %v5438_v38 = vld [vmem:[#allocation2 + $0x6c] ss:$16 sps:$4 sm:$0xff]   ;;  %v5439_v39 = vld [vmem:[#allocation2 + $0x68] ss:$16 sps:$4 sm:$0xff]  }
 0x50f   :  { %2683 = vmatmul.mubr.bf16.gmra.mrb[108].mxu0 %v5391_v43  ;;  %v5441_v41 = vld [vmem:[#allocation2 + $0x88] ss:$16 sps:$4 sm:$0xff]  }
 0x510   :  { %2872 = vmatpush1.bf16.msra.mxu0 %v2549_v42  ;;  %2690 = vmatprep.mubr.bf16.mxu0 %v5392_v44  ;;  %v5442_v42 = vld [vmem:[#allocation2 + $0xac] ss:$16 sps:$4 sm:$0xff]   ;;  %v5443_v43 = vld [vmem:[#allocation2 + $0xa8] ss:$16 sps:$4 sm:$0xff]  }
 0x511   :  { %2873 = vmatprep.subr.bf16.mxu0 %v5622_v32  ;;  %v5444_v44 = vld [vmem:[#allocation2 + $0xcc] ss:$16 sps:$4 sm:$0xff]  }
 0x514   :  { %2874 = vmatpush1.bf16.msra.mxu0 %v2550_v40  ;;  %v5440_v40 = vld [vmem:[#allocation2 + $0x8c] ss:$16 sps:$4 sm:$0xff]  }
 0x515   :  { %2875 = vmatprep.subr.bf16.mxu0 %v5622_v32 }
 0x517   :  { %2691 = vmatmul.mubr.bf16.gmra.mrb[112].mxu0 %v5393_v45  ;;  %v5445_v45 = vld [vmem:[#allocation2 + $0xc8] ss:$16 sps:$4 sm:$0xff]  }
 0x518   :  { %2698 = vmatprep.mubr.bf16.mxu0 %v5394_v46  ;;  %v5446_v46 = vld [vmem:[#allocation2 + $0xec] ss:$16 sps:$4 sm:$0xff]  }
 0x51a   :  { %v4470_v47 = vpop.f32.mrb[56].mxu0 }
 0x51b   :  { %v2492_v48 = vpop.f32.mrb[57].mxu0 }
 0x51c   :  { %v4471_v49 = vpop.f32.mrb[58].mxu0 }
 0x51d   :  { %v2552_v50 = vpack.c.bf16 %v4471_v49, %v4470_v47  ;;  %v2495_v51 = vpop.f32.mrb[59].mxu0  ;;  %v5447_v47 = vld [vmem:[#allocation2 + $0xe8] ss:$16 sps:$4 sm:$0xff]  }
 0x51e   :  { %v2551_v52 = vpack.c.bf16 %v2495_v51, %v2492_v48  ;;  %v5448_v48 = vld [vmem:[#allocation2 + $0x10c] ss:$16 sps:$4 sm:$0xff]   ;;  %v5449_v49 = vld [vmem:[#allocation2 + $0x108] ss:$16 sps:$4 sm:$0xff]  }
 0x51f   :  { %2699 = vmatmul.mubr.bf16.gmra.mrb[116].mxu0 %v5395_v53  ;;  %v5451_v51 = vld [vmem:[#allocation2 + $0x128] ss:$16 sps:$4 sm:$0xff]  }
 0x520   :  { %2876 = vmatpush1.bf16.msra.mxu0 %v2551_v52  ;;  %2706 = vmatprep.mubr.bf16.mxu0 %v5396_v54  ;;  %v5452_v52 = vld [vmem:[#allocation2 + $0x14c] ss:$16 sps:$4 sm:$0xff]   ;;  %v5453_v53 = vld [vmem:[#allocation2 + $0x148] ss:$16 sps:$4 sm:$0xff]  }
 0x521   :  { %2877 = vmatprep.subr.bf16.mxu0 %v5622_v32  ;;  %v5454_v54 = vld [vmem:[#allocation2 + $0x16c] ss:$16 sps:$4 sm:$0xff]  }
 0x524   :  { %2878 = vmatpush1.bf16.msra.mxu0 %v2552_v50  ;;  %v5450_v50 = vld [vmem:[#allocation2 + $0x12c] ss:$16 sps:$4 sm:$0xff]  }
 0x525   :  { %2879 = vmatprep.subr.bf16.mxu0 %v5622_v32 }
 0x527   :  { %2707 = vmatmul.mubr.bf16.gmra.mrb[120].mxu0 %v5397_v55  ;;  %v5455_v55 = vld [vmem:[#allocation2 + $0x168] ss:$16 sps:$4 sm:$0xff]  }
 0x528   :  { %2714 = vmatprep.mubr.bf16.mxu0 %v5398_v56  ;;  %v5456_v56 = vld [vmem:[#allocation2 + $0x18c] ss:$16 sps:$4 sm:$0xff]  }
 0x52a   :  { %v4474_v57 = vpop.f32.mrb[60].mxu0 }
 0x52b   :  { %v2508_v58 = vpop.f32.mrb[61].mxu0 }
 0x52c   :  { %v4475_v59 = vpop.f32.mrb[62].mxu0 }
 0x52d   :  { %v2554_v60 = vpack.c.bf16 %v4475_v59, %v4474_v57  ;;  %v2511_v61 = vpop.f32.mrb[63].mxu0  ;;  %v5457_v57 = vld [vmem:[#allocation2 + $0x188] ss:$16 sps:$4 sm:$0xff]  }
 0x52e   :  { %v2553_v62 = vpack.c.bf16 %v2511_v61, %v2508_v58  ;;  %v5458_v58 = vld [vmem:[#allocation2 + $0x1ac] ss:$16 sps:$4 sm:$0xff]   ;;  %v5459_v59 = vld [vmem:[#allocation2 + $0x1a8] ss:$16 sps:$4 sm:$0xff]  }
 0x52f   :  { %2715 = vmatmul.mubr.bf16.gmra.mrb[124].mxu0 %v5399_v63  ;;  %v5461_v61 = vld [vmem:[#allocation2 + $0x1c8] ss:$16 sps:$4 sm:$0xff]  }
 0x530   :  { %2880 = vmatpush1.bf16.msra.mxu0 %v2553_v62  ;;  %2722 = vmatprep.mubr.bf16.mxu0 %v5400_v0  ;;  %v5462_v62 = vld [vmem:[#allocation2 + $0x1ec] ss:$16 sps:$4 sm:$0xff]   ;;  %v5463_v63 = vld [vmem:[#allocation2 + $0x1e8] ss:$16 sps:$4 sm:$0xff]  }
 0x531   :  { %2881 = vmatprep.subr.bf16.mxu0 %v5622_v32  ;;  %v5410_v32 = vld [vmem:[#allocation2 + $0x2a4] ss:$16 sps:$4 sm:$0xff]   ;;  %v5464_v0 = vld [vmem:[#allocation2 + $0x20c] ss:$16 sps:$4 sm:$0xff]  }
 0x534   :  { %2882 = vmatpush1.bf16.msra.mxu0 %v2554_v60  ;;  %v5460_v60 = vld [vmem:[#allocation2 + $0x1cc] ss:$16 sps:$4 sm:$0xff]  }
 0x537   :  { %2723 = vmatmul.mubr.bf16.gmra.mrb[128].mxu0 %v5401_v1  ;;  %v5465_v1 = vld [vmem:[#allocation2 + $0x208] ss:$16 sps:$4 sm:$0xff]  }
 0x538   :  { %2730 = vmatprep.mubr.bf16.mxu0 %v5402_v2  ;;  %v5466_v2 = vld [vmem:[#allocation2 + $0x22c] ss:$16 sps:$4 sm:$0xff]  }
 0x53f   :  { %2731 = vmatmul.mubr.bf16.gmra.mrb[132].mxu0 %v5403_v3  ;;  %v5467_v3 = vld [vmem:[#allocation2 + $0x228] ss:$16 sps:$4 sm:$0xff]  }
 0x540   :  { %2738 = vmatprep.mubr.bf16.mxu0 %v5404_v4  ;;  %v5468_v4 = vld [vmem:[#allocation2 + $0x24c] ss:$16 sps:$4 sm:$0xff]  }
 0x547   :  { %2739 = vmatmul.mubr.bf16.gmra.mrb[136].mxu0 %v5405_v5  ;;  %v5469_v5 = vld [vmem:[#allocation2 + $0x248] ss:$16 sps:$4 sm:$0xff]  }
 0x548   :  { %2746 = vmatprep.mubr.bf16.mxu0 %v5406_v6  ;;  %v5470_v6 = vld [vmem:[#allocation2 + $0x26c] ss:$16 sps:$4 sm:$0xff]  }
 0x54f   :  { %2747 = vmatmul.mubr.bf16.gmra.mrb[140].mxu0 %v5407_v7  ;;  %v5471_v7 = vld [vmem:[#allocation2 + $0x268] ss:$16 sps:$4 sm:$0xff]  }
 0x550   :  { %2754 = vmatprep.mubr.bf16.mxu0 %v5408_v8  ;;  %v5472_v8 = vld [vmem:[#allocation2 + $0x28c] ss:$16 sps:$4 sm:$0xff]  }
 0x557   :  { %2755 = vmatmul.mubr.bf16.gmra.mrb[144].mxu0 %v5409_v9  ;;  %v5473_v9 = vld [vmem:[#allocation2 + $0x288] ss:$16 sps:$4 sm:$0xff]  }
 0x558   :  { %2762 = vmatprep.mubr.bf16.mxu0 %v5410_v32  ;;  %v5474_v32 = vld [vmem:[#allocation2 + $0x2ac] ss:$16 sps:$4 sm:$0xff]  }
 0x55f   :  { %2763 = vmatmul.mubr.bf16.gmra.mrb[148].mxu0 %v5411_v10  ;;  %v5475_v10 = vld [vmem:[#allocation2 + $0x2a8] ss:$16 sps:$4 sm:$0xff]  }
 0x560   :  { %2770 = vmatprep.mubr.bf16.mxu0 %v5412_v12  ;;  %v5476_v12 = vld [vmem:[#allocation2 + $0x2cc] ss:$16 sps:$4 sm:$0xff]  }
 0x567   :  { %2771 = vmatmul.mubr.bf16.gmra.mrb[152].mxu0 %v5413_v13  ;;  %v5477_v13 = vld [vmem:[#allocation2 + $0x2c8] ss:$16 sps:$4 sm:$0xff]  }
 0x568   :  { %2778 = vmatprep.mubr.bf16.mxu0 %v5414_v14  ;;  %v5478_v14 = vld [vmem:[#allocation2 + $0x2ec] ss:$16 sps:$4 sm:$0xff]  }
 0x56f   :  { %2779 = vmatmul.mubr.bf16.gmra.mrb[156].mxu0 %v5415_v15  ;;  %v5479_v15 = vld [vmem:[#allocation2 + $0x2e8] ss:$16 sps:$4 sm:$0xff]  }
 0x570   :  { %2786 = vmatprep.mubr.bf16.mxu0 %v5416_v16  ;;  %v5480_v16 = vld [vmem:[#allocation2 + $0x30c] ss:$16 sps:$4 sm:$0xff]  }
 0x577   :  { %2787 = vmatmul.mubr.bf16.gmra.mrb[160].mxu0 %v5417_v17  ;;  %v5481_v17 = vld [vmem:[#allocation2 + $0x308] ss:$16 sps:$4 sm:$0xff]  }
 0x578   :  { %2794 = vmatprep.mubr.bf16.mxu0 %v5418_v11  ;;  %v5482_v11 = vld [vmem:[#allocation2 + $0x32c] ss:$16 sps:$4 sm:$0xff]  }
 0x57f   :  { %2795 = vmatmul.mubr.bf16.gmra.mrb[164].mxu0 %v5419_v18  ;;  %v5483_v18 = vld [vmem:[#allocation2 + $0x328] ss:$16 sps:$4 sm:$0xff]  }
 0x580   :  { %2802 = vmatprep.mubr.bf16.mxu0 %v5420_v19  ;;  %v5484_v19 = vld [vmem:[#allocation2 + $0x34c] ss:$16 sps:$4 sm:$0xff]  }
 0x587   :  { %2803 = vmatmul.mubr.bf16.gmra.mrb[168].mxu0 %v5421_v20  ;;  %v3140_v20 = vlaneseq }
 0x588   :  { %2810 = vmatprep.mubr.bf16.mxu0 %v5422_v21 }
 0x589   :  { %v5858_v21 = vand.u32 127, %v3140_v20 }
 0x58b   :  { %vm3142_vm0 = vcmp.lt.s32.totalorder %v5858_v21, 2 }
 0x58f   :  { %2811 = vmatmul.mubr.bf16.gmra.mrb[172].mxu0 %v5423_v22  ;;  %v5485_v22 = vld [vmem:[#allocation2 + $0x348] ss:$16 sps:$4 sm:$0xff]  }
 0x590   :  { %2818 = vmatprep.mubr.bf16.mxu0 %v5424_v23  ;;  %v5863_v23 = vld [vmem:[%s6843_s5] ss:$0 sm:$0xff]  ;;  %s5623_s5 = smov [#allocation10]  }
 0x591   :  { %s4044_s23 = sshll.u32 %s5623_s5, 4  ;;  %s4045_s23 = int_to_ptr.vmem [resolvable:$true] %s4044_s23 }
 0x592   :  { %s5584_s24 = scalar_lea.vmem %s4045_s23, 8192  ;;  %p5589_p5 = scmp.lt.s32.totalorder %s4045_s23, %s4045_s23 }
 0x593   :  { %p5585_p4 = scmp.ne.s32.totalorder %s4045_s23, %s5584_s24  ;;  %p5590_p6 = scmp.lt.s32.totalorder %s5584_s24, %s5584_s24 }
 0x595   :  { %p5591_p7 = por %p5590_p6, %p5589_p5 }
 0x597   :  { %2819 = vmatmul.mubr.bf16.gmra.mrb[176].mxu0 %v5425_v24  ;;  %v5486_v24 = vld [vmem:[#allocation2 + $0x36c] ss:$16 sps:$4 sm:$0xff]   ;;  %p5592_p8 = pnand %p5591_p7, %p5585_p4 }
 0x598   :  { %2826 = vmatprep.mubr.bf16.mxu0 %v5426_v25 }
 0x59f   :  { %2827 = vmatmul.mubr.bf16.gmra.mrb[180].mxu0 %v5427_v26 }
 0x5a0   :  { %2834 = vmatprep.mubr.bf16.mxu0 %v5428_v27 }
 0x5a7   :  { %2835 = vmatmul.mubr.bf16.gmra.mrb[184].mxu0 %v5429_v28 }
 0x5a8   :  { %2842 = vmatprep.mubr.bf16.mxu0 %v5430_v29 }
 0x5af   :  { %2843 = vmatmul.mubr.bf16.gmra.mrb[188].mxu0 %v5431_v30 }
 0x5b0   :  { %2883 = vmatprep.mubr.bf16.mxu0 %v5432_v31 }
 0x5b7   :  { %2884 = vmatmul.mubr.bf16.vlgmr.msra.gmra.mrb[64].mxu0 %v5433_v33  ;;  %v5487_v33 = vld [vmem:[#allocation2 + $0x368] ss:$16 sps:$4 sm:$0xff]  }
 0x5b8   :  { %2891 = vmatprep.mubr.bf16.mxu0 %v5434_v34  ;;  %v5488_v34 = vld [vmem:[#allocation2 + $0x38c] ss:$16 sps:$4 sm:$0xff]  }
 0x5bf   :  { %2892 = vmatmul.mubr.bf16.gmra.mrb[68].mxu0 %v5435_v35 }
 0x5c0   :  { %2899 = vmatprep.mubr.bf16.mxu0 %v5436_v36 }
 0x5c7   :  { %2900 = vmatmul.mubr.bf16.gmra.mrb[72].mxu0 %v5437_v37 }
 0x5c8   :  { %2907 = vmatprep.mubr.bf16.mxu0 %v5438_v38 }
 0x5cf   :  { %2908 = vmatmul.mubr.bf16.gmra.mrb[76].mxu0 %v5439_v39 }
 0x5d0   :  { %2915 = vmatprep.mubr.bf16.mxu0 %v5440_v40 }
 0x5d7   :  { %2916 = vmatmul.mubr.bf16.gmra.mrb[80].mxu0 %v5441_v41 }
 0x5d8   :  { %2923 = vmatprep.mubr.bf16.mxu0 %v5442_v42 }
 0x5df   :  { %2924 = vmatmul.mubr.bf16.gmra.mrb[84].mxu0 %v5443_v43  ;;  %v5489_v43 = vld [vmem:[#allocation2 + $0x388] ss:$16 sps:$4 sm:$0xff]  }
 0x5e0   :  { %2931 = vmatprep.mubr.bf16.mxu0 %v5444_v44  ;;  %v5490_v44 = vld [vmem:[#allocation2 + $0x3ac] ss:$16 sps:$4 sm:$0xff]  }
 0x5e7   :  { %2932 = vmatmul.mubr.bf16.gmra.mrb[88].mxu0 %v5445_v45 }
 0x5e8   :  { %2939 = vmatprep.mubr.bf16.mxu0 %v5446_v46 }
 0x5ef   :  { %2940 = vmatmul.mubr.bf16.gmra.mrb[92].mxu0 %v5447_v47 }
 0x5f0   :  { %2947 = vmatprep.mubr.bf16.mxu0 %v5448_v48 }
 0x5f7   :  { %2948 = vmatmul.mubr.bf16.gmra.mrb[96].mxu0 %v5449_v49 }
 0x5f8   :  { %2955 = vmatprep.mubr.bf16.mxu0 %v5450_v50 }
 0x5ff   :  { %2956 = vmatmul.mubr.bf16.gmra.mrb[100].mxu0 %v5451_v51 }
 0x600   :  { %2963 = vmatprep.mubr.bf16.mxu0 %v5452_v52 }
 0x607   :  { %2964 = vmatmul.mubr.bf16.gmra.mrb[104].mxu0 %v5453_v53  ;;  %v5491_v53 = vld [vmem:[#allocation2 + $0x3a8] ss:$16 sps:$4 sm:$0xff]  }
 0x608   :  { %2971 = vmatprep.mubr.bf16.mxu0 %v5454_v54 }
 0x60f   :  { %2972 = vmatmul.mubr.bf16.gmra.mrb[108].mxu0 %v5455_v55  ;;  %v5492_v55 = vld [vmem:[#allocation2 + $0x3cc] ss:$16 sps:$4 sm:$0xff]  }
 0x610   :  { %2979 = vmatprep.mubr.bf16.mxu0 %v5456_v56 }
 0x617   :  { %2980 = vmatmul.mubr.bf16.gmra.mrb[112].mxu0 %v5457_v57 }
 0x618   :  { %2987 = vmatprep.mubr.bf16.mxu0 %v5458_v58 }
 0x61f   :  { %2988 = vmatmul.mubr.bf16.gmra.mrb[116].mxu0 %v5459_v59 }
 0x620   :  { %2995 = vmatprep.mubr.bf16.mxu0 %v5460_v60 }
 0x627   :  { %2996 = vmatmul.mubr.bf16.gmra.mrb[120].mxu0 %v5461_v61 }
 0x628   :  { %3003 = vmatprep.mubr.bf16.mxu0 %v5462_v62 }
 0x62f   :  { %3004 = vmatmul.mubr.bf16.gmra.mrb[124].mxu0 %v5463_v63  ;;  %v5493_v63 = vld [vmem:[#allocation2 + $0x3c8] ss:$16 sps:$4 sm:$0xff]  }
 0x630   :  { %3011 = vmatprep.mubr.bf16.mxu0 %v5464_v0 }
 0x637   :  { %3012 = vmatmul.mubr.bf16.gmra.mrb[128].mxu0 %v5465_v1  ;;  %v5494_v1 = vld [vmem:[#allocation2 + $0x3ec] ss:$16 sps:$4 sm:$0xff]  }
 0x638   :  { %3019 = vmatprep.mubr.bf16.mxu0 %v5466_v2 }
 0x63f   :  { %3020 = vmatmul.mubr.bf16.gmra.mrb[132].mxu0 %v5467_v3 }
 0x640   :  { %3027 = vmatprep.mubr.bf16.mxu0 %v5468_v4 }
 0x647   :  { %3028 = vmatmul.mubr.bf16.gmra.mrb[136].mxu0 %v5469_v5 }
 0x648   :  { %3035 = vmatprep.mubr.bf16.mxu0 %v5470_v6 }
 0x64f   :  { %3036 = vmatmul.mubr.bf16.gmra.mrb[140].mxu0 %v5471_v7 }
 0x650   :  { %3043 = vmatprep.mubr.bf16.mxu0 %v5472_v8 }
 0x657   :  { %3044 = vmatmul.mubr.bf16.gmra.mrb[144].mxu0 %v5473_v9  ;;  %v5495_v9 = vld [vmem:[#allocation2 + $0x3e8] ss:$16 sps:$4 sm:$0xff]  }
 0x658   :  { %3051 = vmatprep.mubr.bf16.mxu0 %v5474_v32 }
 0x65f   :  { %3052 = vmatmul.mubr.bf16.gmra.mrb[148].mxu0 %v5475_v10 }
 0x660   :  { %3059 = vmatprep.mubr.bf16.mxu0 %v5476_v12 }
 0x667   :  { %3060 = vmatmul.mubr.bf16.gmra.mrb[152].mxu0 %v5477_v13 }
 0x668   :  { %3067 = vmatprep.mubr.bf16.mxu0 %v5478_v14 }
 0x66f   :  { %3068 = vmatmul.mubr.bf16.gmra.mrb[156].mxu0 %v5479_v15 }
 0x670   :  { %3075 = vmatprep.mubr.bf16.mxu0 %v5480_v16 }
 0x677   :  { %3076 = vmatmul.mubr.bf16.gmra.mrb[160].mxu0 %v5481_v17 }
 0x678   :  { %3083 = vmatprep.mubr.bf16.mxu0 %v5482_v11 }
 0x67f   :  { %3084 = vmatmul.mubr.bf16.gmra.mrb[164].mxu0 %v5483_v18 }
 0x680   :  { %3091 = vmatprep.mubr.bf16.mxu0 %v5484_v19 }
 0x687   :  { %3092 = vmatmul.mubr.bf16.gmra.mrb[168].mxu0 %v5485_v22 }
 0x688   :  { %3099 = vmatprep.mubr.bf16.mxu0 %v5486_v24 }
 0x68a   :  { %v2885_v25 = vpop.f32.mrb[64].mxu0 }
 0x68b   :  { %v5867_v26 = vadd.f32 %v5863_v23, %v2885_v25  ;;  %v2887_v27 = vpop.f32.mrb[65].mxu0 }
 0x68c   :  { %v2888_v28 = vpop.f32.mrb[66].mxu0 }
 0x68d   :  { %v5870_v29 = vadd.f32 %v5863_v23, %v2888_v28  ;;  %v2890_v30 = vpop.f32.mrb[67].mxu0  ;;  %v3143_v31 = vsel %vm3142_vm0, %v5867_v26, -1e+30 }
 0x68e   :  { %3207 = vmax.xlane.f32.xlu0 %v3143_v31 }
 0x68f   :  { %3100 = vmatmul.mubr.bf16.gmra.mrb[172].mxu0 %v5487_v33  ;;  %v3144_v35 = vsel %vm3142_vm0, %v5870_v29, -1e+30 }
 0x690   :  { %3107 = vmatprep.mubr.bf16.mxu0 %v5488_v34 }
 0x692   :  { %v2893_v36 = vpop.f32.mrb[68].mxu0  ;;  %3209 = vmax.xlane.f32.xlu0 %v3144_v35 }
 0x693   :  { %v5879_v37 = vadd.f32 %v5863_v23, %v2893_v36  ;;  %v2895_v38 = vpop.f32.mrb[69].mxu0 }
 0x694   :  { %v2896_v39 = vpop.f32.mrb[70].mxu0 }
 0x695   :  { %v5882_v40 = vadd.f32 %v5863_v23, %v2896_v39  ;;  %v2898_v41 = vpop.f32.mrb[71].mxu0  ;;  %v3145_v42 = vsel %vm3142_vm0, %v5879_v37, -1e+30 }
 0x696   :  { %3211 = vmax.xlane.f32.xlu1 %v3145_v42 }
 0x697   :  { %3108 = vmatmul.mubr.bf16.gmra.mrb[176].mxu0 %v5489_v43  ;;  %v3146_v45 = vsel %vm3142_vm0, %v5882_v40, -1e+30 }
 0x698   :  { %3115 = vmatprep.mubr.bf16.mxu0 %v5490_v44 }
 0x69a   :  { %v2901_v46 = vpop.f32.mrb[72].mxu0  ;;  %3213 = vmax.xlane.f32.xlu1 %v3146_v45 }
 0x69b   :  { %v5891_v47 = vadd.f32 %v5863_v23, %v2901_v46  ;;  %v2903_v48 = vpop.f32.mrb[73].mxu0 }
 0x69c   :  { %v2904_v49 = vpop.f32.mrb[74].mxu0 }
 0x69d   :  { %v5894_v50 = vadd.f32 %v5863_v23, %v2904_v49  ;;  %v2906_v51 = vpop.f32.mrb[75].mxu0  ;;  %v3147_v52 = vsel %vm3142_vm0, %v5891_v47, -1e+30 }
 0x69e   :  { %3215 = vmax.xlane.f32.xlu0 %v3147_v52 }
 0x69f   :  { %3116 = vmatmul.mubr.bf16.gmra.mrb[180].mxu0 %v5491_v53  ;;  %v3148_v54 = vsel %vm3142_vm0, %v5894_v50, -1e+30 }
 0x6a0   :  { %3217 = vmax.xlane.f32.xlu1 %v3148_v54  ;;  %3123 = vmatprep.mubr.bf16.mxu0 %v5492_v55 }
 0x6a2   :  { %v2909_v56 = vpop.f32.mrb[76].mxu0 }
 0x6a3   :  { %v5903_v57 = vadd.f32 %v5863_v23, %v2909_v56  ;;  %v2911_v58 = vpop.f32.mrb[77].mxu0 }
 0x6a4   :  { %v2912_v59 = vpop.f32.mrb[78].mxu0 }
 0x6a5   :  { %v5906_v60 = vadd.f32 %v5863_v23, %v2912_v59  ;;  %v2914_v61 = vpop.f32.mrb[79].mxu0  ;;  %v3149_v62 = vsel %vm3142_vm0, %v5903_v57, -1e+30 }
 0x6a6   :  { %3219 = vmax.xlane.f32.xlu0 %v3149_v62 }
 0x6a7   :  { %3124 = vmatmul.mubr.bf16.gmra.mrb[184].mxu0 %v5493_v63  ;;  %v3150_v0 = vsel %vm3142_vm0, %v5906_v60, -1e+30 }
 0x6a8   :  { %3221 = vmax.xlane.f32.xlu1 %v3150_v0  ;;  %3131 = vmatprep.mubr.bf16.mxu0 %v5494_v1 }
 0x6aa   :  { %v2917_v2 = vpop.f32.mrb[80].mxu0 }
 0x6ab   :  { %v5915_v3 = vadd.f32 %v5863_v23, %v2917_v2  ;;  %v2919_v4 = vpop.f32.mrb[81].mxu0 }
 0x6ac   :  { %v2920_v5 = vpop.f32.mrb[82].mxu0 }
 0x6ad   :  { %v5918_v6 = vadd.f32 %v5863_v23, %v2920_v5  ;;  %v2922_v7 = vpop.f32.mrb[83].mxu0  ;;  %v3151_v8 = vsel %vm3142_vm0, %v5915_v3, -1e+30 }
 0x6ae   :  { %3223 = vmax.xlane.f32.xlu0 %v3151_v8 }
 0x6af   :  { %3132 = vmatmul.mubr.bf16.gmra.mrb[188].mxu0 %v5495_v9  ;;  %v3152_v32 = vsel %vm3142_vm0, %v5918_v6, -1e+30 }
 0x6b0   :  { %3225 = vmax.xlane.f32.xlu1 %v3152_v32 }
 0x6b2   :  { %v2925_v10 = vpop.f32.mrb[84].mxu0 }
 0x6b3   :  { %v5927_v12 = vadd.f32 %v5863_v23, %v2925_v10  ;;  %v2927_v13 = vpop.f32.mrb[85].mxu0 }
 0x6b4   :  { %v2928_v14 = vpop.f32.mrb[86].mxu0 }
 0x6b5   :  { %v5930_v15 = vadd.f32 %v5863_v23, %v2928_v14  ;;  %v2930_v16 = vpop.f32.mrb[87].mxu0  ;;  %v3153_v17 = vsel %vm3142_vm0, %v5927_v12, -1e+30 }
 0x6b6   :  { %3227 = vmax.xlane.f32.xlu0 %v3153_v17 }
 0x6b7   :  { %v3154_v11 = vsel %vm3142_vm0, %v5930_v15, -1e+30 }
 0x6b8   :  { %3229 = vmax.xlane.f32.xlu1 %v3154_v11 }
 0x6ba   :  { %v2933_v18 = vpop.f32.mrb[88].mxu0 }
 0x6bb   :  { %v5939_v19 = vadd.f32 %v5863_v23, %v2933_v18  ;;  %v2935_v20 = vpop.f32.mrb[89].mxu0 }
 0x6bc   :  { %v2936_v22 = vpop.f32.mrb[90].mxu0 }
 0x6bd   :  { %v5942_v24 = vadd.f32 %v5863_v23, %v2936_v22  ;;  %v2938_v25 = vpop.f32.mrb[91].mxu0  ;;  %v3155_v27 = vsel %vm3142_vm0, %v5939_v19, -1e+30 }
 0x6be   :  { %3231 = vmax.xlane.f32.xlu0 %v3155_v27 }
 0x6bf   :  { %v3156_v28 = vsel %vm3142_vm0, %v5942_v24, -1e+30 }
 0x6c0   :  { %3233 = vmax.xlane.f32.xlu1 %v3156_v28 }
 0x6c2   :  { %v2941_v30 = vpop.f32.mrb[92].mxu0 }
 0x6c3   :  { %v5951_v31 = vadd.f32 %v5863_v23, %v2941_v30  ;;  %v2943_v33 = vpop.f32.mrb[93].mxu0 }
 0x6c4   :  { %v2944_v34 = vpop.f32.mrb[94].mxu0 }
 0x6c5   :  { %v5954_v35 = vadd.f32 %v5863_v23, %v2944_v34  ;;  %v2946_v36 = vpop.f32.mrb[95].mxu0  ;;  %v3157_v38 = vsel %vm3142_vm0, %v5951_v31, -1e+30 }
 0x6c6   :  { %3235 = vmax.xlane.f32.xlu0 %v3157_v38 }
 0x6c7   :  { %v3158_v39 = vsel %vm3142_vm0, %v5954_v35, -1e+30 }
 0x6c8   :  { %3237 = vmax.xlane.f32.xlu1 %v3158_v39 }
 0x6ca   :  { %v2949_v41 = vpop.f32.mrb[96].mxu0 }
 0x6cb   :  { %v5963_v42 = vadd.f32 %v5863_v23, %v2949_v41  ;;  %v2951_v43 = vpop.f32.mrb[97].mxu0 }
 0x6cc   :  { %v2952_v44 = vpop.f32.mrb[98].mxu0 }
 0x6cd   :  { %v5966_v45 = vadd.f32 %v5863_v23, %v2952_v44  ;;  %v2954_v46 = vpop.f32.mrb[99].mxu0  ;;  %v3159_v48 = vsel %vm3142_vm0, %v5963_v42, -1e+30 }
 0x6ce   :  { %3239 = vmax.xlane.f32.xlu0 %v3159_v48 }
 0x6cf   :  { %v3160_v49 = vsel %vm3142_vm0, %v5966_v45, -1e+30 }
 0x6d0   :  { %3241 = vmax.xlane.f32.xlu1 %v3160_v49 }
 0x6d2   :  { %v2957_v51 = vpop.f32.mrb[100].mxu0 }
 0x6d3   :  { %v5975_v52 = vadd.f32 %v5863_v23, %v2957_v51  ;;  %v2959_v53 = vpop.f32.mrb[101].mxu0 }
 0x6d4   :  { %v2960_v54 = vpop.f32.mrb[102].mxu0 }
 0x6d5   :  { %v5978_v55 = vadd.f32 %v5863_v23, %v2960_v54  ;;  %v2962_v56 = vpop.f32.mrb[103].mxu0  ;;  %v3161_v58 = vsel %vm3142_vm0, %v5975_v52, -1e+30 }
 0x6d6   :  { %3243 = vmax.xlane.f32.xlu0 %v3161_v58 }
 0x6d7   :  { %v3162_v59 = vsel %vm3142_vm0, %v5978_v55, -1e+30 }
 0x6d8   :  { %3245 = vmax.xlane.f32.xlu1 %v3162_v59 }
 0x6da   :  { %v2965_v61 = vpop.f32.mrb[104].mxu0 }
 0x6db   :  { %v5987_v62 = vadd.f32 %v5863_v23, %v2965_v61  ;;  %v2967_v63 = vpop.f32.mrb[105].mxu0 }
 0x6dc   :  { %v2968_v0 = vpop.f32.mrb[106].mxu0 }
 0x6dd   :  { %v5990_v1 = vadd.f32 %v5863_v23, %v2968_v0  ;;  %v2970_v2 = vpop.f32.mrb[107].mxu0  ;;  %v3163_v4 = vsel %vm3142_vm0, %v5987_v62, -1e+30 }
 0x6de   :  { %3247 = vmax.xlane.f32.xlu0 %v3163_v4 }
 0x6df   :  { %v3164_v5 = vsel %vm3142_vm0, %v5990_v1, -1e+30 }
 0x6e0   :  { %3249 = vmax.xlane.f32.xlu1 %v3164_v5 }
 0x6e2   :  { %v2973_v7 = vpop.f32.mrb[108].mxu0 }
 0x6e3   :  { %v5999_v8 = vadd.f32 %v5863_v23, %v2973_v7  ;;  %v2975_v9 = vpop.f32.mrb[109].mxu0 }
 0x6e4   :  { %v2976_v32 = vpop.f32.mrb[110].mxu0 }
 0x6e5   :  { %v6002_v10 = vadd.f32 %v5863_v23, %v2976_v32  ;;  %v2978_v13 = vpop.f32.mrb[111].mxu0  ;;  %v3165_v14 = vsel %vm3142_vm0, %v5999_v8, -1e+30 }
 0x6e6   :  { %3251 = vmax.xlane.f32.xlu0 %v3165_v14 }
 0x6e7   :  { %v3166_v16 = vsel %vm3142_vm0, %v6002_v10, -1e+30 }
 0x6e8   :  { %3253 = vmax.xlane.f32.xlu1 %v3166_v16 }
 0x6ea   :  { %v2981_v17 = vpop.f32.mrb[112].mxu0 }
 0x6eb   :  { %v6011_v11 = vadd.f32 %v5863_v23, %v2981_v17  ;;  %v2983_v18 = vpop.f32.mrb[113].mxu0 }
 0x6ec   :  { %v2984_v20 = vpop.f32.mrb[114].mxu0 }
 0x6ed   :  { %v6014_v22 = vadd.f32 %v5863_v23, %v2984_v20  ;;  %v2986_v25 = vpop.f32.mrb[115].mxu0  ;;  %v3167_v27 = vsel %vm3142_vm0, %v6011_v11, -1e+30 }
 0x6ee   :  { %3255 = vmax.xlane.f32.xlu0 %v3167_v27 }
 0x6ef   :  { %v3168_v28 = vsel %vm3142_vm0, %v6014_v22, -1e+30 }
 0x6f0   :  { %3257 = vmax.xlane.f32.xlu1 %v3168_v28 }
 0x6f2   :  { %v2989_v30 = vpop.f32.mrb[116].mxu0 }
 0x6f3   :  { %v6023_v33 = vadd.f32 %v5863_v23, %v2989_v30  ;;  %v2991_v34 = vpop.f32.mrb[117].mxu0 }
 0x6f4   :  { %v2992_v36 = vpop.f32.mrb[118].mxu0 }
 0x6f5   :  { %v6026_v38 = vadd.f32 %v5863_v23, %v2992_v36  ;;  %v2994_v39 = vpop.f32.mrb[119].mxu0  ;;  %v3169_v41 = vsel %vm3142_vm0, %v6023_v33, -1e+30 }
 0x6f6   :  { %3259 = vmax.xlane.f32.xlu0 %v3169_v41 }
 0x6f7   :  { %v3170_v43 = vsel %vm3142_vm0, %v6026_v38, -1e+30 }
 0x6f8   :  { %3261 = vmax.xlane.f32.xlu1 %v3170_v43 }
 0x6fa   :  { %v2997_v44 = vpop.f32.mrb[120].mxu0 }
 0x6fb   :  { %v6035_v46 = vadd.f32 %v5863_v23, %v2997_v44  ;;  %v2999_v48 = vpop.f32.mrb[121].mxu0 }
 0x6fc   :  { %v3000_v49 = vpop.f32.mrb[122].mxu0 }
 0x6fd   :  { %v6038_v51 = vadd.f32 %v5863_v23, %v3000_v49  ;;  %v3002_v53 = vpop.f32.mrb[123].mxu0  ;;  %v3171_v54 = vsel %vm3142_vm0, %v6035_v46, -1e+30 }
 0x6fe   :  { %3263 = vmax.xlane.f32.xlu0 %v3171_v54 }
 0x6ff   :  { %v3172_v56 = vsel %vm3142_vm0, %v6038_v51, -1e+30 }
 0x700   :  { %3265 = vmax.xlane.f32.xlu1 %v3172_v56 }
 0x702   :  { %v3005_v58 = vpop.f32.mrb[124].mxu0 }
 0x703   :  { %v6047_v59 = vadd.f32 %v5863_v23, %v3005_v58  ;;  %v3007_v61 = vpop.f32.mrb[125].mxu0 }
 0x704   :  { %v3008_v63 = vpop.f32.mrb[126].mxu0 }
 0x705   :  { %v6050_v0 = vadd.f32 %v5863_v23, %v3008_v63  ;;  %v3010_v2 = vpop.f32.mrb[127].mxu0  ;;  %v3173_v4 = vsel %vm3142_vm0, %v6047_v59, -1e+30 }
 0x706   :  { %3267 = vmax.xlane.f32.xlu0 %v3173_v4 }
 0x707   :  { %v3174_v5 = vsel %vm3142_vm0, %v6050_v0, -1e+30 }
 0x708   :  { %3269 = vmax.xlane.f32.xlu1 %v3174_v5 }
 0x70a   :  { %v3013_v7 = vpop.f32.mrb[128].mxu0 }
 0x70b   :  { %v6059_v9 = vadd.f32 %v5863_v23, %v3013_v7  ;;  %v3015_v32 = vpop.f32.mrb[129].mxu0 }
 0x70c   :  { %v3016_v13 = vpop.f32.mrb[130].mxu0 }
 0x70d   :  { %v6062_v14 = vadd.f32 %v5863_v23, %v3016_v13  ;;  %v3018_v16 = vpop.f32.mrb[131].mxu0  ;;  %v3175_v17 = vsel %vm3142_vm0, %v6059_v9, -1e+30 }
 0x70e   :  { %3271 = vmax.xlane.f32.xlu0 %v3175_v17 }
 0x70f   :  { %v3176_v18 = vsel %vm3142_vm0, %v6062_v14, -1e+30 }
 0x710   :  { %3273 = vmax.xlane.f32.xlu1 %v3176_v18 }
 0x712   :  { %v3021_v20 = vpop.f32.mrb[132].mxu0 }
 0x713   :  { %v6071_v25 = vadd.f32 %v5863_v23, %v3021_v20  ;;  %v3023_v27 = vpop.f32.mrb[133].mxu0 }
 0x714   :  { %v3024_v28 = vpop.f32.mrb[134].mxu0 }
 0x715   :  { %v6074_v30 = vadd.f32 %v5863_v23, %v3024_v28  ;;  %v3026_v34 = vpop.f32.mrb[135].mxu0  ;;  %v3177_v36 = vsel %vm3142_vm0, %v6071_v25, -1e+30 }
 0x716   :  { %3275 = vmax.xlane.f32.xlu0 %v3177_v36 }
 0x717   :  { %v3178_v39 = vsel %vm3142_vm0, %v6074_v30, -1e+30 }
 0x718   :  { %3277 = vmax.xlane.f32.xlu1 %v3178_v39 }
 0x71a   :  { %v3029_v41 = vpop.f32.mrb[136].mxu0 }
 0x71b   :  { %v6083_v43 = vadd.f32 %v5863_v23, %v3029_v41  ;;  %v3031_v44 = vpop.f32.mrb[137].mxu0  ;;  %v3208_v48 = vpop.xlane.xlu0 %3207 }
 0x71c   :  { %v6086_v49 = vsub.f32 %v5867_v26, %v3208_v48  ;;  %v3032_v53 = vpop.f32.mrb[138].mxu0 }
 0x71d   :  { %v6089_v54 = vadd.f32 %v5863_v23, %v3032_v53  ;;  %v3034_v56 = vpop.f32.mrb[139].mxu0  ;;  %v3179_v58 = vsel %vm3142_vm0, %v6083_v43, -1e+30 }
 0x71e   :  { %v3399_v61 = vmul.f32 1.442695, %v6086_v49  ;;  %3279 = vmax.xlane.f32.xlu0 %v3179_v58 }
 0x71f   :  { %v3210_v63 = vpop.xlane.xlu0 %3209  ;;  %v3180_v2 = vsel %vm3142_vm0, %v6089_v54, -1e+30 }
 0x720   :  { %5112 = vpow2.f32 %v3399_v61  ;;  %v6099_v26 = vsub.f32 %v5870_v29, %v3210_v63  ;;  %3281 = vmax.xlane.f32.xlu1 %v3180_v2 }
 0x722   :  { %v3401_v4 = vmul.f32 1.442695, %v6099_v26  ;;  %v3037_v5 = vpop.f32.mrb[140].mxu0 }
 0x723   :  { %v6103_v7 = vadd.f32 %v5863_v23, %v3037_v5  ;;  %v3039_v32 = vpop.f32.mrb[141].mxu0  ;;  %v3212_v13 = vpop.xlane.xlu1 %3211 }
 0x724   :  { %5114 = vpow2.f32 %v3401_v4  ;;  %v6106_v16 = vsub.f32 %v5879_v37, %v3212_v13  ;;  %v3040_v17 = vpop.f32.mrb[142].mxu0 }
 0x725   :  { %v6109_v18 = vadd.f32 %v5863_v23, %v3040_v17  ;;  %v3042_v20 = vpop.f32.mrb[143].mxu0  ;;  %v3181_v29 = vsel %vm3142_vm0, %v6103_v7, -1e+30 }
 0x726   :  { %v3403_v27 = vmul.f32 1.442695, %v6106_v16  ;;  %3283 = vmax.xlane.f32.xlu0 %v3181_v29 }
 0x727   :  { %v3214_v28 = vpop.xlane.xlu1 %3213  ;;  %v3182_v34 = vsel %vm3142_vm0, %v6109_v18, -1e+30 }
 0x728   :  { %5116 = vpow2.f32 %v3403_v27  ;;  %v6119_v37 = vsub.f32 %v5882_v40, %v3214_v28  ;;  %3285 = vmax.xlane.f32.xlu1 %v3182_v34 }
 0x72a   :  { %v5113_v36 = vpop.eup %5112  ;;  %v3405_v39 = vmul.f32 1.442695, %v6119_v37  ;;  %v3045_v41 = vpop.f32.mrb[144].mxu0 }
 0x72b   :  { %v6123_v44 = vadd.f32 %v5863_v23, %v3045_v41  ;;  %v3047_v48 = vpop.f32.mrb[145].mxu0  ;;  %v3216_v53 = vpop.xlane.xlu0 %3215  ;;  %v3527_v56 = vsel %vm3142_vm0, %v5113_v36, 0.0 }
 0x72c   :  { %5118 = vpow2.f32 %v3405_v39  ;;  %v6128_v58 = vsub.f32 %v5891_v47, %v3216_v53  ;;  %v3048_v61 = vpop.f32.mrb[146].mxu0  ;;  %3591 = vadd.xlane.f32.xlu0 %v3527_v56 }
 0x72d   :  { %v3050_v40 = vpop.f32.mrb[147].mxu0  ;;  %v3218_v63 = vpop.xlane.xlu1 %3217  ;;  %v6135_v32 = vadd.f32 %v5863_v23, %v3048_v61  ;;  %v3183_v13 = vsel %vm3142_vm0, %v6123_v44, -1e+30 }
 0x72e   :  { %v5115_v2 = vpop.eup %5114  ;;  %v3407_v4 = vmul.f32 1.442695, %v6128_v58  ;;  %v6132_v5 = vsub.f32 %v5894_v50, %v3218_v63 }
 0x72f   :  { %v3528_v47 = vsel %vm3142_vm0, %v5115_v2, 0.0  ;;  %v3184_v36 = vsel %vm3142_vm0, %v6135_v32, -1e+30 }
 0x730   :  { %5120 = vpow2.f32 %v3407_v4  ;;  %v3409_v17 = vmul.f32 1.442695, %v6132_v5  ;;  %3287 = vmax.xlane.f32.xlu0 %v3183_v13  ;;  %3593 = vadd.xlane.f32.xlu1 %v3528_v47 }
 0x732   :  { %v5117_v20 = vpop.eup %5116  ;;  %5122 = vpow2.f32 %v3409_v17  ;;  %v3053_v29 = vpop.f32.mrb[148].mxu0 }
 0x733   :  { %v6144_v50 = vadd.f32 %v5863_v23, %v3053_v29  ;;  %v3055_v27 = vpop.f32.mrb[149].mxu0  ;;  %v3220_v28 = vpop.xlane.xlu0 %3219  ;;  %v3529_v34 = vsel %vm3142_vm0, %v5117_v20, 0.0 }
 0x734   :  { %v6152_v39 = vsub.f32 %v5903_v57, %v3220_v28  ;;  %v3056_v41 = vpop.f32.mrb[150].mxu0  ;;  %3595 = vadd.xlane.f32.xlu0 %v3529_v34  ;;  %3289 = vmax.xlane.f32.xlu1 %v3184_v36 }
 0x735   :  { %v3058_v48 = vpop.f32.mrb[151].mxu0  ;;  %v3222_v53 = vpop.xlane.xlu1 %3221  ;;  %v6159_v63 = vadd.f32 %v5863_v23, %v3056_v41  ;;  %v3185_v2 = vsel %vm3142_vm0, %v6144_v50, -1e+30 }
 0x736   :  { %v5119_v56 = vpop.eup %5118  ;;  %v3411_v61 = vmul.f32 1.442695, %v6152_v39  ;;  %v6156_v40 = vsub.f32 %v5906_v60, %v3222_v53 }
 0x737   :  { %v3530_v57 = vsel %vm3142_vm0, %v5119_v56, 0.0  ;;  %v3186_v29 = vsel %vm3142_vm0, %v6159_v63, -1e+30 }
 0x738   :  { %5124 = vpow2.f32 %v3411_v61  ;;  %v3413_v4 = vmul.f32 1.442695, %v6156_v40  ;;  %3291 = vmax.xlane.f32.xlu0 %v3185_v2  ;;  %3597 = vadd.xlane.f32.xlu1 %v3530_v57 }
 0x73a   :  { %v5121_v13 = vpop.eup %5120  ;;  %5126 = vpow2.f32 %v3413_v4  ;;  %v3061_v47 = vpop.f32.mrb[152].mxu0 }
 0x73b   :  { %v6168_v60 = vadd.f32 %v5863_v23, %v3061_v47  ;;  %v3063_v17 = vpop.f32.mrb[153].mxu0  ;;  %v3224_v20 = vpop.xlane.xlu0 %3223  ;;  %v3531_v27 = vsel %vm3142_vm0, %v5121_v13, 0.0 }
 0x73c   :  { %v5123_v28 = vpop.eup %5122  ;;  %v6176_v34 = vsub.f32 %v5915_v3, %v3224_v20  ;;  %v3064_v36 = vpop.f32.mrb[154].mxu0  ;;  %3293 = vmax.xlane.f32.xlu1 %v3186_v29  ;;  %3599 = vadd.xlane.f32.xlu0 %v3531_v27 }
 0x73d   :  { %v3066_v41 = vpop.f32.mrb[155].mxu0  ;;  %v3226_v48 = vpop.xlane.xlu1 %3225  ;;  %v6183_v61 = vadd.f32 %v5863_v23, %v3064_v36  ;;  %v3532_v2 = vsel %vm3142_vm0, %v5123_v28, 0.0  ;;  %v3187_v3 = vsel %vm3142_vm0, %v6168_v60, -1e+30 }
 0x73e   :  { %v3415_v53 = vmul.f32 1.442695, %v6176_v34  ;;  %v6180_v56 = vsub.f32 %v5918_v6, %v3226_v48 }
 0x73f   :  { %v3188_v20 = vsel %vm3142_vm0, %v6183_v61, -1e+30 }
 0x740   :  { %5128 = vpow2.f32 %v3415_v53  ;;  %v3417_v57 = vmul.f32 1.442695, %v6180_v56  ;;  %3601 = vadd.xlane.f32.xlu1 %v3532_v2  ;;  %3295 = vmax.xlane.f32.xlu0 %v3187_v3 }
 0x742   :  { %v5125_v4 = vpop.eup %5124  ;;  %5130 = vpow2.f32 %v3417_v57  ;;  %v3069_v13 = vpop.f32.mrb[156].mxu0 }
 0x743   :  { %v6192_v6 = vadd.f32 %v5863_v23, %v3069_v13  ;;  %v3071_v47 = vpop.f32.mrb[157].mxu0  ;;  %v3228_v17 = vpop.xlane.xlu0 %3227  ;;  %v3533_v29 = vsel %vm3142_vm0, %v5125_v4, 0.0 }
 0x744   :  { %v5127_v27 = vpop.eup %5126  ;;  %v6200_v28 = vsub.f32 %v5927_v12, %v3228_v17  ;;  %v3072_v36 = vpop.f32.mrb[158].mxu0  ;;  %3297 = vmax.xlane.f32.xlu1 %v3188_v20  ;;  %3603 = vadd.xlane.f32.xlu0 %v3533_v29 }
 0x745   :  { %v3074_v41 = vpop.f32.mrb[159].mxu0  ;;  %v3230_v48 = vpop.xlane.xlu1 %3229  ;;  %v6207_v3 = vadd.f32 %v5863_v23, %v3072_v36  ;;  %v3534_v57 = vsel %vm3142_vm0, %v5127_v27, 0.0  ;;  %v3189_v12 = vsel %vm3142_vm0, %v6192_v6, -1e+30 }
 0x746   :  { %v3419_v53 = vmul.f32 1.442695, %v6200_v28  ;;  %v6204_v2 = vsub.f32 %v5930_v15, %v3230_v48 }
 0x747   :  { %v3190_v29 = vsel %vm3142_vm0, %v6207_v3, -1e+30 }
 0x748   :  { %5132 = vpow2.f32 %v3419_v53  ;;  %v3421_v4 = vmul.f32 1.442695, %v6204_v2  ;;  %3605 = vadd.xlane.f32.xlu1 %v3534_v57  ;;  %3299 = vmax.xlane.f32.xlu0 %v3189_v12 }
 0x74a   :  { %v5129_v13 = vpop.eup %5128  ;;  %5134 = vpow2.f32 %v3421_v4  ;;  %v3077_v47 = vpop.f32.mrb[160].mxu0 }
 0x74b   :  { %v6216_v15 = vadd.f32 %v5863_v23, %v3077_v47  ;;  %v3079_v17 = vpop.f32.mrb[161].mxu0  ;;  %v3232_v20 = vpop.xlane.xlu0 %3231  ;;  %v3535_v27 = vsel %vm3142_vm0, %v5129_v13, 0.0 }
 0x74c   :  { %v5131_v36 = vpop.eup %5130  ;;  %v6224_v41 = vsub.f32 %v5939_v19, %v3232_v20  ;;  %v3080_v48 = vpop.f32.mrb[162].mxu0  ;;  %3301 = vmax.xlane.f32.xlu1 %v3190_v29  ;;  %3607 = vadd.xlane.f32.xlu0 %v3535_v27 }
 0x74d   :  { %v3082_v53 = vpop.f32.mrb[163].mxu0  ;;  %v3234_v57 = vpop.xlane.xlu1 %3233  ;;  %v6231_v47 = vadd.f32 %v5863_v23, %v3080_v48  ;;  %v3536_v13 = vsel %vm3142_vm0, %v5131_v36, 0.0  ;;  %v3191_v19 = vsel %vm3142_vm0, %v6216_v15, -1e+30 }
 0x74e   :  { %6861 = vst [vmem:[#allocation15_spill] sm:$0xff] %v6224_v41  ;;  %v3423_v12 = vmul.f32 1.442695, %v6224_v41  ;;  %v6228_v4 = vsub.f32 %v5942_v24, %v3234_v57 }
 0x74f   :  { %v3192_v36 = vsel %vm3142_vm0, %v6231_v47, -1e+30 }
 0x750   :  { %6862 = vst [vmem:[#allocation16_spill] sm:$0xff] %v6228_v4  ;;  %5136 = vpow2.f32 %v3423_v12  ;;  %v3425_v17 = vmul.f32 1.442695, %v6228_v4  ;;  %3609 = vadd.xlane.f32.xlu1 %v3536_v13  ;;  %3303 = vmax.xlane.f32.xlu0 %v3191_v19 }
 0x752   :  { %v5133_v20 = vpop.eup %5132  ;;  %5138 = vpow2.f32 %v3425_v17  ;;  %v3085_v29 = vpop.f32.mrb[164].mxu0 }
 0x753   :  { %v6240_v24 = vadd.f32 %v5863_v23, %v3085_v29  ;;  %v3087_v27 = vpop.f32.mrb[165].mxu0  ;;  %v3236_v48 = vpop.xlane.xlu0 %3235  ;;  %v3537_v53 = vsel %vm3142_vm0, %v5133_v20, 0.0 }
 0x754   :  { %v5135_v57 = vpop.eup %5134  ;;  %v6248_v12 = vsub.f32 %v5951_v31, %v3236_v48  ;;  %v3088_v13 = vpop.f32.mrb[166].mxu0  ;;  %3305 = vmax.xlane.f32.xlu1 %v3192_v36  ;;  %3611 = vadd.xlane.f32.xlu0 %v3537_v53 }
 0x755   :  { %v3090_v19 = vpop.f32.mrb[167].mxu0  ;;  %v3238_v17 = vpop.xlane.xlu1 %3237  ;;  %v6255_v4 = vadd.f32 %v5863_v23, %v3088_v13  ;;  %v3538_v20 = vsel %vm3142_vm0, %v5135_v57, 0.0  ;;  %v3193_v31 = vsel %vm3142_vm0, %v6240_v24, -1e+30 }
 0x756   :  { %6863 = vst [vmem:[#allocation17_spill] sm:$0xff] %v6248_v12  ;;  %v3427_v29 = vmul.f32 1.442695, %v6248_v12  ;;  %v6252_v27 = vsub.f32 %v5954_v35, %v3238_v17 }
 0x757   :  { %v3194_v57 = vsel %vm3142_vm0, %v6255_v4, -1e+30 }
 0x758   :  { %6864 = vst [vmem:[#allocation18_spill] sm:$0xff] %v6252_v27  ;;  %5140 = vpow2.f32 %v3427_v29  ;;  %v3429_v48 = vmul.f32 1.442695, %v6252_v27  ;;  %3613 = vadd.xlane.f32.xlu1 %v3538_v20  ;;  %3307 = vmax.xlane.f32.xlu0 %v3193_v31 }
 0x75a   :  { %v5137_v36 = vpop.eup %5136  ;;  %5142 = vpow2.f32 %v3429_v48  ;;  %v3093_v53 = vpop.f32.mrb[168].mxu0 }
 0x75b   :  { %v6264_v35 = vadd.f32 %v5863_v23, %v3093_v53  ;;  %v3095_v13 = vpop.f32.mrb[169].mxu0  ;;  %v3240_v19 = vpop.xlane.xlu0 %3239  ;;  %v3539_v17 = vsel %vm3142_vm0, %v5137_v36, 0.0 }
 0x75c   :  { %v5139_v29 = vpop.eup %5138  ;;  %v6272_v27 = vsub.f32 %v5963_v42, %v3240_v19  ;;  %v3096_v20 = vpop.f32.mrb[170].mxu0  ;;  %3309 = vmax.xlane.f32.xlu1 %v3194_v57  ;;  %3615 = vadd.xlane.f32.xlu0 %v3539_v17 }
 0x75d   :  { %v3098_v31 = vpop.f32.mrb[171].mxu0  ;;  %v3242_v48 = vpop.xlane.xlu1 %3241  ;;  %v6279_v12 = vadd.f32 %v5863_v23, %v3096_v20  ;;  %v3540_v36 = vsel %vm3142_vm0, %v5139_v29, 0.0  ;;  %v3195_v42 = vsel %vm3142_vm0, %v6264_v35, -1e+30 }
 0x75e   :  { %6865 = vst [vmem:[#allocation19_spill] sm:$0xff] %v6272_v27  ;;  %v3431_v53 = vmul.f32 1.442695, %v6272_v27  ;;  %v6276_v13 = vsub.f32 %v5966_v45, %v3242_v48 }
 0x75f   :  { %v3196_v29 = vsel %vm3142_vm0, %v6279_v12, -1e+30 }
 0x760   :  { %6866 = vst [vmem:[#allocation20_spill] sm:$0xff] %v6276_v13  ;;  %5144 = vpow2.f32 %v3431_v53  ;;  %v3433_v19 = vmul.f32 1.442695, %v6276_v13  ;;  %3617 = vadd.xlane.f32.xlu1 %v3540_v36  ;;  %3311 = vmax.xlane.f32.xlu0 %v3195_v42 }
 0x762   :  { %v5141_v57 = vpop.eup %5140  ;;  %5146 = vpow2.f32 %v3433_v19  ;;  %v3101_v17 = vpop.f32.mrb[172].mxu0 }
 0x763   :  { %v6288_v45 = vadd.f32 %v5863_v23, %v3101_v17  ;;  %v3103_v20 = vpop.f32.mrb[173].mxu0  ;;  %v3244_v31 = vpop.xlane.xlu0 %3243  ;;  %v3541_v48 = vsel %vm3142_vm0, %v5141_v57, 0.0 }
 0x764   :  { %v5143_v53 = vpop.eup %5142  ;;  %v6296_v13 = vsub.f32 %v5975_v52, %v3244_v31  ;;  %v3104_v36 = vpop.f32.mrb[174].mxu0  ;;  %3313 = vmax.xlane.f32.xlu1 %v3196_v29  ;;  %3619 = vadd.xlane.f32.xlu0 %v3541_v48 }
 0x765   :  { %v3106_v42 = vpop.f32.mrb[175].mxu0  ;;  %v3246_v19 = vpop.xlane.xlu1 %3245  ;;  %v6303_v27 = vadd.f32 %v5863_v23, %v3104_v36  ;;  %v3542_v57 = vsel %vm3142_vm0, %v5143_v53, 0.0  ;;  %v3197_v52 = vsel %vm3142_vm0, %v6288_v45, -1e+30 }
 0x766   :  { %6867 = vst [vmem:[#allocation21_spill] sm:$0xff] %v6296_v13  ;;  %v3435_v17 = vmul.f32 1.442695, %v6296_v13  ;;  %v6300_v20 = vsub.f32 %v5978_v55, %v3246_v19 }
 0x767   :  { %6869 = vst [vmem:[#allocation23_spill] sm:$0xff] %v6303_v27  ;;  %v3198_v53 = vsel %vm3142_vm0, %v6303_v27, -1e+30 }
 0x768   :  { %6868 = vst [vmem:[#allocation22_spill] sm:$0xff] %v6300_v20  ;;  %5148 = vpow2.f32 %v3435_v17  ;;  %v3437_v31 = vmul.f32 1.442695, %v6300_v20  ;;  %3621 = vadd.xlane.f32.xlu1 %v3542_v57  ;;  %3315 = vmax.xlane.f32.xlu0 %v3197_v52 }
 0x76a   :  { %v5145_v29 = vpop.eup %5144  ;;  %5150 = vpow2.f32 %v3437_v31  ;;  %v3109_v48 = vpop.f32.mrb[176].mxu0 }
 0x76b   :  { %v6312_v55 = vadd.f32 %v5863_v23, %v3109_v48  ;;  %v3111_v36 = vpop.f32.mrb[177].mxu0  ;;  %v3543_v42 = vsel %vm3142_vm0, %v5145_v29, 0.0 }
 0x76c   :  { %v5147_v19 = vpop.eup %5146  ;;  %v3112_v17 = vpop.f32.mrb[178].mxu0  ;;  %3317 = vmax.xlane.f32.xlu1 %v3198_v53  ;;  %3623 = vadd.xlane.f32.xlu0 %v3543_v42 }
 0x76d   :  { %6870 = vst [vmem:[#allocation24_spill] sm:$0xff] %v6312_v55  ;;  %v3114_v57 = vpop.f32.mrb[179].mxu0  ;;  %v6320_v52 = vadd.f32 %v5863_v23, %v3112_v17  ;;  %v3544_v31 = vsel %vm3142_vm0, %v5147_v19, 0.0  ;;  %v3199_v48 = vsel %vm3142_vm0, %v6312_v55, -1e+30  ;;  %v3248_v36 = vpop.xlane.xlu0 %3247 }
 0x76e   :  { %v3250_v13 = vpop.xlane.xlu1 %3249  ;;  %v6336_v55 = vsub.f32 %v5987_v62, %v3248_v36 }
 0x76f   :  { %6871 = vst [vmem:[#allocation25_spill] sm:$0xff] %v6320_v52  ;;  %v3200_v17 = vsel %vm3142_vm0, %v6320_v52, -1e+30 }
 0x770   :  { %3625 = vadd.xlane.f32.xlu1 %v3544_v31  ;;  %3319 = vmax.xlane.f32.xlu0 %v3199_v48 }
 0x772   :  { %v5149_v20 = vpop.eup %5148  ;;  %v3117_v29 = vpop.f32.mrb[180].mxu0 }
 0x773   :  { %v6328_v53 = vadd.f32 %v5863_v23, %v3117_v29  ;;  %v3119_v42 = vpop.f32.mrb[181].mxu0  ;;  %v3545_v19 = vsel %vm3142_vm0, %v5149_v20, 0.0  ;;  %v3252_v48 = vpop.xlane.xlu0 %3251  ;;  %v6339_v29 = vsub.f32 %v5990_v1, %v3250_v13  ;;  %v3439_v20 = vmul.f32 1.442695, %v6336_v55 }
 0x774   :  { %v5151_v57 = vpop.eup %5150  ;;  %v3120_v31 = vpop.f32.mrb[182].mxu0  ;;  %3321 = vmax.xlane.f32.xlu1 %v3200_v17  ;;  %3627 = vadd.xlane.f32.xlu0 %v3545_v19  ;;  %v6351_v36 = vsub.f32 %v5999_v8, %v3252_v48 }
 0x775   :  { %v3122_v27 = vpop.f32.mrb[183].mxu0  ;;  %v6342_v42 = vadd.f32 %v5863_v23, %v3120_v31  ;;  %v3254_v41 = vpop.xlane.xlu1 %3253  ;;  %v3546_v52 = vsel %vm3142_vm0, %v5151_v57, 0.0  ;;  %v3201_v62 = vsel %vm3142_vm0, %v6328_v53, -1e+30  ;;  %v3441_v1 = vmul.f32 1.442695, %v6339_v29 }
 0x776   :  { %v6355_v27 = vsub.f32 %v6002_v10, %v3254_v41  ;;  %5152 = vpow2.f32 %v3439_v20  ;;  %v3443_v8 = vmul.f32 1.442695, %v6351_v36 }
 0x777   :  { %v3202_v31 = vsel %vm3142_vm0, %v6342_v42, -1e+30  ;;  %5154 = vpow2.f32 %v3441_v1 }
 0x778   :  { %3629 = vadd.xlane.f32.xlu1 %v3546_v52  ;;  %3323 = vmax.xlane.f32.xlu0 %v3201_v62  ;;  %6872 = vst [vmem:[#allocation26_spill] sm:$0xff] %v6355_v27  ;;  %5156 = vpow2.f32 %v3443_v8 }
 0x77a   :  { %v3125_v13 = vpop.f32.mrb[184].mxu0 }
 0x77b   :  { %v6358_v17 = vadd.f32 %v5863_v23, %v3125_v13  ;;  %v3127_v19 = vpop.f32.mrb[185].mxu0  ;;  %v3256_v57 = vpop.xlane.xlu0 %3255 }
 0x77c   :  { %v6365_v52 = vsub.f32 %v6011_v11, %v3256_v57  ;;  %v3128_v48 = vpop.f32.mrb[186].mxu0  ;;  %3325 = vmax.xlane.f32.xlu1 %v3202_v31  ;;  %v3445_v19 = vmul.f32 1.442695, %v6355_v27 }
 0x77d   :  { %v6368_v10 = vadd.f32 %v5863_v23, %v3128_v48  ;;  %v3130_v41 = vpop.f32.mrb[187].mxu0  ;;  %v3258_v62 = vpop.xlane.xlu1 %3257  ;;  %v3203_v13 = vsel %vm3142_vm0, %v6358_v17, -1e+30 }
 0x77e   :  { %6873 = vst [vmem:[#allocation27_spill] sm:$0xff] %v6365_v52  ;;  %v6375_v20 = vsub.f32 %v6014_v22, %v3258_v62  ;;  %3327 = vmax.xlane.f32.xlu0 %v3203_v13  ;;  %v3447_v57 = vmul.f32 1.442695, %v6365_v52  ;;  %5158 = vpow2.f32 %v3445_v19 }
 0x77f   :  { %v3204_v11 = vsel %vm3142_vm0, %v6368_v10, -1e+30 }
 0x780   :  { %3329 = vmax.xlane.f32.xlu1 %v3204_v11  ;;  %v3449_v31 = vmul.f32 1.442695, %v6375_v20  ;;  %5160 = vpow2.f32 %v3447_v57  ;;  %v5153_v11 = vpop.eup %5152 }
 0x781   :  { %v3547_v57 = vsel %vm3142_vm0, %v5153_v11, 0.0 }
 0x782   :  { %v3133_v48 = vpop.f32.mrb[188].mxu0  ;;  %5162 = vpow2.f32 %v3449_v31 }
 0x783   :  { %v6383_v1 = vadd.f32 %v5863_v23, %v3133_v48  ;;  %v3135_v41 = vpop.f32.mrb[189].mxu0  ;;  %v3260_v27 = vpop.xlane.xlu0 %3259 }
 0x784   :  { %v6386_v22 = vsub.f32 %v6023_v33, %v3260_v27  ;;  %v3136_v62 = vpop.f32.mrb[190].mxu0 }
 0x785   :  { %v6389_v13 = vadd.f32 %v5863_v23, %v3136_v62  ;;  %v3138_v8 = vpop.f32.mrb[191].mxu0  ;;  %v3262_v52 = vpop.xlane.xlu1 %3261  ;;  %v3205_v19 = vsel %vm3142_vm0, %v6383_v1, -1e+30 }
 0x786   :  { %v3451_v48 = vmul.f32 1.442695, %v6386_v22  ;;  %v6396_v41 = vsub.f32 %v6026_v38, %v3262_v52  ;;  %3331 = vmax.xlane.f32.xlu0 %v3205_v19  ;;  %v5155_v23 = vpop.eup %5154 }
 0x787   :  { %v3206_v33 = vsel %vm3142_vm0, %v6389_v13, -1e+30  ;;  %v5157_v62 = vpop.eup %5156  ;;  %v3548_v38 = vsel %vm3142_vm0, %v5155_v23, 0.0 }
 0x788   :  { %6874 = vst [vmem:[#allocation28_spill] sm:$0xff] %v6396_v41  ;;  %5164 = vpow2.f32 %v3451_v48  ;;  %v3453_v27 = vmul.f32 1.442695, %v6396_v41  ;;  %3333 = vmax.xlane.f32.xlu1 %v3206_v33  ;;  %v5159_v52 = vpop.eup %5158  ;;  %v3549_v48 = vsel %vm3142_vm0, %v5157_v62, 0.0 }
 0x78a   :  { %5166 = vpow2.f32 %v3453_v27  ;;  %3631 = vadd.xlane.f32.xlu0 %v3547_v57  ;;  %v5161_v33 = vpop.eup %5160  ;;  %v3550_v27 = vsel %vm3142_vm0, %v5159_v52, 0.0 }
 0x78b   :  { %v3264_v31 = vpop.xlane.xlu0 %3263  ;;  %v3551_v57 = vsel %vm3142_vm0, %v5161_v33, 0.0 }
 0x78c   :  { %v6407_v8 = vsub.f32 %v6035_v46, %v3264_v31  ;;  %3633 = vadd.xlane.f32.xlu1 %v3548_v38  ;;  %v5163_v23 = vpop.eup %5162 }
 0x78d   :  { %v3266_v19 = vpop.xlane.xlu1 %3265 }
 0x78e   :  { %v3455_v41 = vmul.f32 1.442695, %v6407_v8  ;;  %v6413_v11 = vsub.f32 %v6038_v51, %v3266_v19  ;;  %3635 = vadd.xlane.f32.xlu0 %v3549_v48  ;;  %v3552_v51 = vsel %vm3142_vm0, %v5163_v23, 0.0 }
 0x790   :  { %5168 = vpow2.f32 %v3455_v41  ;;  %v3457_v46 = vmul.f32 1.442695, %v6413_v11  ;;  %3637 = vadd.xlane.f32.xlu1 %v3550_v27 }
 0x792   :  { %v5165_v31 = vpop.eup %5164  ;;  %5170 = vpow2.f32 %v3457_v46  ;;  %3639 = vadd.xlane.f32.xlu0 %v3551_v57 }
 0x793   :  { %v3268_v62 = vpop.xlane.xlu0 %3267  ;;  %v3553_v41 = vsel %vm3142_vm0, %v5165_v31, 0.0 }
 0x794   :  { %v5167_v38 = vpop.eup %5166  ;;  %v6423_v19 = vsub.f32 %v6047_v59, %v3268_v62  ;;  %3641 = vadd.xlane.f32.xlu1 %v3552_v51 }
 0x795   :  { %v3270_v52 = vpop.xlane.xlu1 %3269  ;;  %v3554_v27 = vsel %vm3142_vm0, %v5167_v38, 0.0 }
 0x796   :  { %v3459_v48 = vmul.f32 1.442695, %v6423_v19  ;;  %v6429_v33 = vsub.f32 %v6050_v0, %v3270_v52  ;;  %3643 = vadd.xlane.f32.xlu0 %v3553_v41 }
 0x798   :  { %5172 = vpow2.f32 %v3459_v48  ;;  %v3461_v23 = vmul.f32 1.442695, %v6429_v33  ;;  %3645 = vadd.xlane.f32.xlu1 %v3554_v27 }
 0x79a   :  { %v5169_v59 = vpop.eup %5168  ;;  %5174 = vpow2.f32 %v3461_v23 }
 0x79b   :  { %v3272_v46 = vpop.xlane.xlu0 %3271  ;;  %v3555_v57 = vsel %vm3142_vm0, %v5169_v59, 0.0 }
 0x79c   :  { %v5171_v31 = vpop.eup %5170  ;;  %v6437_v62 = vsub.f32 %v6059_v9, %v3272_v46  ;;  %3647 = vadd.xlane.f32.xlu0 %v3555_v57 }
 0x79d   :  { %v3274_v0 = vpop.xlane.xlu1 %3273  ;;  %v3556_v51 = vsel %vm3142_vm0, %v5171_v31, 0.0 }
 0x79e   :  { %v3463_v38 = vmul.f32 1.442695, %v6437_v62  ;;  %v6443_v52 = vsub.f32 %v6062_v14, %v3274_v0  ;;  %3649 = vadd.xlane.f32.xlu1 %v3556_v51 }
 0x7a0   :  { %5176 = vpow2.f32 %v3463_v38  ;;  %v3465_v41 = vmul.f32 1.442695, %v6443_v52 }
 0x7a2   :  { %v5173_v48 = vpop.eup %5172  ;;  %5178 = vpow2.f32 %v3465_v41 }
 0x7a3   :  { %v3276_v27 = vpop.xlane.xlu0 %3275  ;;  %v3557_v9 = vsel %vm3142_vm0, %v5173_v48, 0.0 }
 0x7a4   :  { %v5175_v23 = vpop.eup %5174  ;;  %v6449_v59 = vsub.f32 %v6071_v25, %v3276_v27  ;;  %3651 = vadd.xlane.f32.xlu0 %v3557_v9 }
 0x7a5   :  { %v3278_v46 = vpop.xlane.xlu1 %3277  ;;  %v3558_v14 = vsel %vm3142_vm0, %v5175_v23, 0.0 }
 0x7a6   :  { %v3467_v57 = vmul.f32 1.442695, %v6449_v59  ;;  %v6455_v31 = vsub.f32 %v6074_v30, %v3278_v46  ;;  %3653 = vadd.xlane.f32.xlu1 %v3558_v14 }
 0x7a8   :  { %5180 = vpow2.f32 %v3467_v57  ;;  %v3469_v0 = vmul.f32 1.442695, %v6455_v31 }
 0x7aa   :  { %v5177_v51 = vpop.eup %5176  ;;  %5182 = vpow2.f32 %v3469_v0 }
 0x7ab   :  { %v3280_v38 = vpop.xlane.xlu0 %3279  ;;  %v3559_v25 = vsel %vm3142_vm0, %v5177_v51, 0.0 }
 0x7ac   :  { %v5179_v41 = vpop.eup %5178  ;;  %v6461_v48 = vsub.f32 %v6083_v43, %v3280_v38  ;;  %3655 = vadd.xlane.f32.xlu0 %v3559_v25 }
 0x7ad   :  { %v3282_v27 = vpop.xlane.xlu1 %3281  ;;  %v3560_v30 = vsel %vm3142_vm0, %v5179_v41, 0.0 }
 0x7ae   :  { %v3471_v9 = vmul.f32 1.442695, %v6461_v48  ;;  %v6467_v23 = vsub.f32 %v6089_v54, %v3282_v27  ;;  %3657 = vadd.xlane.f32.xlu1 %v3560_v30 }
 0x7b0   :  { %5184 = vpow2.f32 %v3471_v9  ;;  %v3473_v46 = vmul.f32 1.442695, %v6467_v23 }
 0x7b2   :  { %v5181_v14 = vpop.eup %5180  ;;  %5186 = vpow2.f32 %v3473_v46 }
 0x7b3   :  { %v3284_v57 = vpop.xlane.xlu0 %3283  ;;  %v3561_v43 = vsel %vm3142_vm0, %v5181_v14, 0.0 }
 0x7b4   :  { %v5183_v0 = vpop.eup %5182  ;;  %v6473_v51 = vsub.f32 %v6103_v7, %v3284_v57  ;;  %3659 = vadd.xlane.f32.xlu0 %v3561_v43 }
 0x7b5   :  { %v3286_v38 = vpop.xlane.xlu1 %3285  ;;  %v3562_v54 = vsel %vm3142_vm0, %v5183_v0, 0.0 }
 0x7b6   :  { %v3475_v25 = vmul.f32 1.442695, %v6473_v51  ;;  %v6479_v41 = vsub.f32 %v6109_v18, %v3286_v38  ;;  %3661 = vadd.xlane.f32.xlu1 %v3562_v54 }
 0x7b8   :  { %5188 = vpow2.f32 %v3475_v25  ;;  %v3477_v27 = vmul.f32 1.442695, %v6479_v41 }
 0x7b9   :  { %v3592_v30 = vpop.xlane.xlu0 %3591 }
 0x7ba   :  { %v5185_v9 = vpop.eup %5184  ;;  %5190 = vpow2.f32 %v3477_v27 }
 0x7bb   :  { %5192 = vlog2.f32 %v3592_v30  ;;  %v3563_v7 = vsel %vm3142_vm0, %v5185_v9, 0.0 }
 0x7bc   :  { %v5187_v46 = vpop.eup %5186  ;;  %3663 = vadd.xlane.f32.xlu0 %v3563_v7 }
 0x7bd   :  { %v3594_v14 = vpop.xlane.xlu1 %3593  ;;  %v3288_v57 = vpop.xlane.xlu0 %3287  ;;  %v3564_v43 = vsel %vm3142_vm0, %v5187_v46, 0.0 }
 0x7be   :  { %5194 = vlog2.f32 %v3594_v14  ;;  %v6487_v18 = vsub.f32 %v6123_v44, %v3288_v57  ;;  %3665 = vadd.xlane.f32.xlu1 %v3564_v43 }
 0x7c0   :  { %6875 = vst [vmem:[#allocation29_spill] sm:$0xff] %v6487_v18  ;;  %v3479_v0 = vmul.f32 1.442695, %v6487_v18 }
 0x7c1   :  { %v3290_v38 = vpop.xlane.xlu1 %3289  ;;  %v3596_v54 = vpop.xlane.xlu0 %3595 }
 0x7c2   :  { %v5189_v25 = vpop.eup %5188  ;;  %5196 = vpow2.f32 %v3479_v0  ;;  %v6491_v27 = vsub.f32 %v6135_v32, %v3290_v38 }
 0x7c3   :  { %5198 = vlog2.f32 %v3596_v54  ;;  %v3565_v30 = vsel %vm3142_vm0, %v5189_v25, 0.0 }
 0x7c4   :  { %6876 = vst [vmem:[#allocation30_spill] sm:$0xff] %v6491_v27  ;;  %v5191_v9 = vpop.eup %5190  ;;  %v3481_v7 = vmul.f32 1.442695, %v6491_v27  ;;  %3667 = vadd.xlane.f32.xlu0 %v3565_v30 }
 0x7c5   :  { %v5193_v44 = vpop.eup %5192  ;;  %v3598_v46 = vpop.xlane.xlu1 %3597  ;;  %v3566_v57 = vsel %vm3142_vm0, %v5191_v9, 0.0 }
 0x7c6   :  { %v3292_v14 = vpop.xlane.xlu0 %3291  ;;  %v3720_v43 = vmul.f32 0.6931472, %v5193_v44  ;;  %5200 = vpow2.f32 %v3481_v7  ;;  %3669 = vadd.xlane.f32.xlu1 %v3566_v57 }
 0x7c7   :  { %v6499_v0 = vsub.f32 %v6144_v50, %v3292_v14  ;;  %5202 = vlog2.f32 %v3598_v46 }
 0x7c8   :  { %v5195_v32 = vpop.eup %5194  ;;  %v3847_v38 = vsub.f32 %v6086_v49, %v3720_v43 }
 0x7c9   :  { %v3483_v54 = vmul.f32 1.442695, %v6499_v0  ;;  %v3722_v25 = vmul.f32 0.6931472, %v5195_v32  ;;  %v3294_v30 = vpop.xlane.xlu1 %3293 }
 0x7ca   :  { %v3600_v27 = vpop.xlane.xlu0 %3599  ;;  %v3911_v18 = vsel %vm3142_vm0, %v3847_v38, 0.0  ;;  %v6506_v9 = vsub.f32 %v6159_v63, %v3294_v30 }
 0x7cb   :  { %5204 = vpow2.f32 %v3483_v54  ;;  %3975 = vst [vmem:[#allocation10] sm:$0xff] %v3911_v18  ;;  %v3848_v50 = vsub.f32 %v6099_v26, %v3722_v25 }
 0x7cc   :  { %5206 = vlog2.f32 %v3600_v27  ;;  %v5197_v7 = vpop.eup %5196  ;;  %v3485_v44 = vmul.f32 1.442695, %v6506_v9 }
 0x7cd   :  { %v5199_v49 = vpop.eup %5198  ;;  %v3912_v46 = vsel %vm3142_vm0, %v3848_v50, 0.0  ;;  %v3602_v14 = vpop.xlane.xlu1 %3601  ;;  %v3567_v43 = vsel %vm3142_vm0, %v5197_v7, 0.0 }
 0x7ce   :  { %v3296_v57 = vpop.xlane.xlu0 %3295  ;;  %3976 = vst [vmem:[#allocation10 + $0x8] sm:$0xff] %v3912_v46  ;;  %v3724_v32 = vmul.f32 0.6931472, %v5199_v49  ;;  %5208 = vpow2.f32 %v3485_v44  ;;  %3671 = vadd.xlane.f32.xlu0 %v3567_v43 }
 0x7cf   :  { %v6515_v63 = vsub.f32 %v6168_v60, %v3296_v57  ;;  %5210 = vlog2.f32 %v3602_v14 }
 0x7d0   :  { %v5201_v26 = vpop.eup %5200  ;;  %v3849_v18 = vsub.f32 %v6106_v16, %v3724_v32 }
 0x7d1   :  { %v3487_v27 = vmul.f32 1.442695, %v6515_v63  ;;  %v5203_v38 = vpop.eup %5202  ;;  %v3298_v54 = vpop.xlane.xlu1 %3297  ;;  %v3568_v30 = vsel %vm3142_vm0, %v5201_v26, 0.0 }
 0x7d2   :  { %v3604_v25 = vpop.xlane.xlu0 %3603  ;;  %v3913_v50 = vsel %vm3142_vm0, %v3849_v18, 0.0  ;;  %v3726_v7 = vmul.f32 0.6931472, %v5203_v38  ;;  %v6524_v60 = vsub.f32 %v6183_v61, %v3298_v54  ;;  %3673 = vadd.xlane.f32.xlu1 %v3568_v30 }
 0x7d3   :  { %5212 = vpow2.f32 %v3487_v27  ;;  %3977 = vst [vmem:[#allocation10 + $0x10] sm:$0xff] %v3913_v50 }
 0x7d4   :  { %5214 = vlog2.f32 %v3604_v25  ;;  %v3850_v44 = vsub.f32 %v6119_v37, %v3726_v7  ;;  %v3489_v49 = vmul.f32 1.442695, %v6524_v60 }
 0x7d5   :  { %v5205_v16 = vpop.eup %5204  ;;  %v3606_v14 = vpop.xlane.xlu1 %3605 }
 0x7d6   :  { %v5207_v46 = vpop.eup %5206  ;;  %v3300_v57 = vpop.xlane.xlu0 %3299  ;;  %v3569_v43 = vsel %vm3142_vm0, %v5205_v16, 0.0  ;;  %v3914_v32 = vsel %vm3142_vm0, %v3850_v44, 0.0  ;;  %5216 = vpow2.f32 %v3489_v49 }
 0x7d7   :  { %v3728_v26 = vmul.f32 0.6931472, %v5207_v46  ;;  %v6533_v61 = vsub.f32 %v6192_v6, %v3300_v57  ;;  %3675 = vadd.xlane.f32.xlu0 %v3569_v43  ;;  %3978 = vst [vmem:[#allocation10 + $0x18] sm:$0xff] %v3914_v32  ;;  %5218 = vlog2.f32 %v3606_v14 }
 0x7d8   :  { %v5209_v37 = vpop.eup %5208 }
 0x7d9   :  { %v3851_v18 = vsub.f32 %v6128_v58, %v3728_v26  ;;  %v3491_v27 = vmul.f32 1.442695, %v6533_v61  ;;  %v5211_v38 = vpop.eup %5210  ;;  %v3302_v54 = vpop.xlane.xlu1 %3301  ;;  %v3570_v30 = vsel %vm3142_vm0, %v5209_v37, 0.0 }
 0x7da   :  { %v3608_v25 = vpop.xlane.xlu0 %3607  ;;  %v3730_v7 = vmul.f32 0.6931472, %v5211_v38  ;;  %v6542_v6 = vsub.f32 %v6207_v3, %v3302_v54  ;;  %3677 = vadd.xlane.f32.xlu1 %v3570_v30 }
 0x7db   :  { %v3915_v50 = vsel %vm3142_vm0, %v3851_v18, 0.0  ;;  %5220 = vpow2.f32 %v3491_v27 }
 0x7dc   :  { %3979 = vst [vmem:[#allocation10 + $0x20] sm:$0xff] %v3915_v50  ;;  %5222 = vlog2.f32 %v3608_v25  ;;  %v3852_v16 = vsub.f32 %v6132_v5, %v3730_v7  ;;  %v3493_v44 = vmul.f32 1.442695, %v6542_v6 }
 0x7dd   :  { %v5213_v58 = vpop.eup %5212  ;;  %v3610_v46 = vpop.xlane.xlu1 %3609 }
 0x7de   :  { %v5215_v49 = vpop.eup %5214  ;;  %v3304_v14 = vpop.xlane.xlu0 %3303  ;;  %v3571_v57 = vsel %vm3142_vm0, %v5213_v58, 0.0  ;;  %v3916_v43 = vsel %vm3142_vm0, %v3852_v16, 0.0  ;;  %5224 = vpow2.f32 %v3493_v44 }
 0x7df   :  { %v3732_v32 = vmul.f32 0.6931472, %v5215_v49  ;;  %v6551_v3 = vsub.f32 %v6216_v15, %v3304_v14  ;;  %3679 = vadd.xlane.f32.xlu0 %v3571_v57  ;;  %3980 = vst [vmem:[#allocation10 + $0x28] sm:$0xff] %v3916_v43  ;;  %5226 = vlog2.f32 %v3610_v46 }
 0x7e0   :  { %v5217_v5 = vpop.eup %5216 }
 0x7e1   :  { %v3853_v26 = vsub.f32 %v6152_v39, %v3732_v32  ;;  %v3495_v37 = vmul.f32 1.442695, %v6551_v3  ;;  %v5219_v18 = vpop.eup %5218  ;;  %v3306_v27 = vpop.xlane.xlu1 %3305  ;;  %v3572_v54 = vsel %vm3142_vm0, %v5217_v5, 0.0 }
 0x7e2   :  { %v3612_v38 = vpop.xlane.xlu0 %3611  ;;  %v3734_v30 = vmul.f32 0.6931472, %v5219_v18  ;;  %v6560_v15 = vsub.f32 %v6231_v47, %v3306_v27  ;;  %3681 = vadd.xlane.f32.xlu1 %v3572_v54 }
 0x7e3   :  { %v3917_v25 = vsel %vm3142_vm0, %v3853_v26, 0.0  ;;  %5228 = vpow2.f32 %v3495_v37 }
 0x7e4   :  { %3981 = vst [vmem:[#allocation10 + $0x30] sm:$0xff] %v3917_v25  ;;  %5230 = vlog2.f32 %v3612_v38  ;;  %v3854_v50 = vsub.f32 %v6156_v40, %v3734_v30  ;;  %v3497_v7 = vmul.f32 1.442695, %v6560_v15 }
 0x7e5   :  { %v5221_v39 = vpop.eup %5220  ;;  %v3614_v16 = vpop.xlane.xlu1 %3613 }
 0x7e6   :  { %v5223_v58 = vpop.eup %5222  ;;  %v3308_v44 = vpop.xlane.xlu0 %3307  ;;  %v3573_v49 = vsel %vm3142_vm0, %v5221_v39, 0.0  ;;  %v3918_v46 = vsel %vm3142_vm0, %v3854_v50, 0.0  ;;  %5232 = vpow2.f32 %v3497_v7 }
 0x7e7   :  { %v3736_v14 = vmul.f32 0.6931472, %v5223_v58  ;;  %v6569_v47 = vsub.f32 %v6240_v24, %v3308_v44  ;;  %3683 = vadd.xlane.f32.xlu0 %v3573_v49  ;;  %3982 = vst [vmem:[#allocation10 + $0x38] sm:$0xff] %v3918_v46  ;;  %5234 = vlog2.f32 %v3614_v16 }
 0x7e8   :  { %v5225_v40 = vpop.eup %5224 }
 0x7e9   :  { %v3855_v57 = vsub.f32 %v6176_v34, %v3736_v14  ;;  %v3499_v43 = vmul.f32 1.442695, %v6569_v47  ;;  %v5227_v32 = vpop.eup %5226  ;;  %v3310_v5 = vpop.xlane.xlu1 %3309  ;;  %v3574_v37 = vsel %vm3142_vm0, %v5225_v40, 0.0 }
 0x7ea   :  { %v3616_v26 = vpop.xlane.xlu0 %3615  ;;  %v3738_v27 = vmul.f32 0.6931472, %v5227_v32  ;;  %v6578_v24 = vsub.f32 %v6255_v4, %v3310_v5  ;;  %3685 = vadd.xlane.f32.xlu1 %v3574_v37 }
 0x7eb   :  { %v3919_v18 = vsel %vm3142_vm0, %v3855_v57, 0.0  ;;  %5236 = vpow2.f32 %v3499_v43 }
 0x7ec   :  { %3983 = vst [vmem:[#allocation10 + $0x40] sm:$0xff] %v3919_v18  ;;  %5238 = vlog2.f32 %v3616_v26  ;;  %v3856_v38 = vsub.f32 %v6180_v56, %v3738_v27  ;;  %v3501_v54 = vmul.f32 1.442695, %v6578_v24 }
 0x7ed   :  { %v5229_v34 = vpop.eup %5228  ;;  %v3618_v30 = vpop.xlane.xlu1 %3617 }
 0x7ee   :  { %v5231_v25 = vpop.eup %5230  ;;  %v3312_v39 = vpop.xlane.xlu0 %3311  ;;  %v3575_v50 = vsel %vm3142_vm0, %v5229_v34, 0.0  ;;  %v3920_v7 = vsel %vm3142_vm0, %v3856_v38, 0.0  ;;  %5240 = vpow2.f32 %v3501_v54  ;;  %v6877_v54 = vld [vmem:[#allocation15_spill] sm:$0xff] }
 0x7ef   :  { %v3740_v58 = vmul.f32 0.6931472, %v5231_v25  ;;  %v6587_v4 = vsub.f32 %v6264_v35, %v3312_v39  ;;  %3687 = vadd.xlane.f32.xlu0 %v3575_v50  ;;  %3984 = vst [vmem:[#allocation10 + $0x48] sm:$0xff] %v3920_v7  ;;  %5242 = vlog2.f32 %v3618_v30 }
 0x7f0   :  { %v5233_v56 = vpop.eup %5232 }
 0x7f1   :  { %v3857_v16 = vsub.f32 %v6200_v28, %v3740_v58  ;;  %v3503_v44 = vmul.f32 1.442695, %v6587_v4  ;;  %v5235_v49 = vpop.eup %5234  ;;  %v3314_v46 = vpop.xlane.xlu1 %3313  ;;  %v3576_v40 = vsel %vm3142_vm0, %v5233_v56, 0.0 }
 0x7f2   :  { %v3620_v14 = vpop.xlane.xlu0 %3619  ;;  %v3742_v43 = vmul.f32 0.6931472, %v5235_v49  ;;  %v6596_v35 = vsub.f32 %v6279_v12, %v3314_v46  ;;  %3689 = vadd.xlane.f32.xlu1 %v3576_v40  ;;  %v6879_v46 = vld [vmem:[#allocation16_spill] sm:$0xff] }
 0x7f3   :  { %v3921_v57 = vsel %vm3142_vm0, %v3857_v16, 0.0  ;;  %5244 = vpow2.f32 %v3503_v44 }
 0x7f4   :  { %3985 = vst [vmem:[#allocation10 + $0x50] sm:$0xff] %v3921_v57  ;;  %5246 = vlog2.f32 %v3620_v14  ;;  %v3858_v32 = vsub.f32 %v6204_v2, %v3742_v43  ;;  %v3505_v5 = vmul.f32 1.442695, %v6596_v35 }
 0x7f5   :  { %v5237_v28 = vpop.eup %5236  ;;  %v3622_v37 = vpop.xlane.xlu1 %3621 }
 0x7f6   :  { %v5239_v26 = vpop.eup %5238  ;;  %v3316_v18 = vpop.xlane.xlu0 %3315  ;;  %v3577_v27 = vsel %vm3142_vm0, %v5237_v28, 0.0  ;;  %v3922_v34 = vsel %vm3142_vm0, %v3858_v32, 0.0  ;;  %5248 = vpow2.f32 %v3505_v5 }
 0x7f7   :  { %v3744_v38 = vmul.f32 0.6931472, %v5239_v26  ;;  %v6605_v12 = vsub.f32 %v6288_v45, %v3316_v18  ;;  %3691 = vadd.xlane.f32.xlu0 %v3577_v27  ;;  %3986 = vst [vmem:[#allocation10 + $0x58] sm:$0xff] %v3922_v34  ;;  %5250 = vlog2.f32 %v3622_v37  ;;  %v6878_v45 = vld [vmem:[#allocation23_spill] sm:$0xff]  ;;  %v6880_v37 = vld [vmem:[#allocation24_spill] sm:$0xff]  ;;  %v6881_v34 = vld [vmem:[#allocation17_spill] sm:$0xff] }
 0x7f8   :  { %v5241_v2 = vpop.eup %5240 }
 0x7f9   :  { %v3859_v25 = vsub.f32 %v6877_v54, %v3744_v38  ;;  %v3507_v30 = vmul.f32 1.442695, %v6605_v12  ;;  %v5243_v39 = vpop.eup %5242  ;;  %v3318_v50 = vpop.xlane.xlu1 %3317  ;;  %v3578_v58 = vsel %vm3142_vm0, %v5241_v2, 0.0 }
 0x7fa   :  { %v3624_v7 = vpop.xlane.xlu0 %3623  ;;  %v3746_v16 = vmul.f32 0.6931472, %v5243_v39  ;;  %v6614_v44 = vsub.f32 %v6878_v45, %v3318_v50  ;;  %3693 = vadd.xlane.f32.xlu1 %v3578_v58  ;;  %v6882_v58 = vld [vmem:[#allocation25_spill] sm:$0xff]  ;;  %v6883_v45 = vld [vmem:[#allocation18_spill] sm:$0xff] }
 0x7fb   :  { %v3923_v56 = vsel %vm3142_vm0, %v3859_v25, 0.0  ;;  %5252 = vpow2.f32 %v3507_v30 }
 0x7fc   :  { %3987 = vst [vmem:[#allocation10 + $0x60] sm:$0xff] %v3923_v56  ;;  %5254 = vlog2.f32 %v3624_v7  ;;  %v3860_v14 = vsub.f32 %v6879_v46, %v3746_v16  ;;  %v3509_v40 = vmul.f32 1.442695, %v6614_v44 }
 0x7fd   :  { %v5245_v49 = vpop.eup %5244  ;;  %v3626_v43 = vpop.xlane.xlu1 %3625 }
 0x7fe   :  { %v5247_v57 = vpop.eup %5246  ;;  %v3320_v28 = vpop.xlane.xlu0 %3319  ;;  %v3579_v32 = vsel %vm3142_vm0, %v5245_v49, 0.0  ;;  %v3924_v5 = vsel %vm3142_vm0, %v3860_v14, 0.0  ;;  %5256 = vpow2.f32 %v3509_v40 }
 0x7ff   :  { %v3748_v26 = vmul.f32 0.6931472, %v5247_v57  ;;  %v6623_v18 = vsub.f32 %v6880_v37, %v3320_v28  ;;  %3695 = vadd.xlane.f32.xlu0 %v3579_v32  ;;  %3988 = vst [vmem:[#allocation10 + $0x68] sm:$0xff] %v3924_v5  ;;  %5258 = vlog2.f32 %v3626_v43  ;;  %v6884_v37 = vld [vmem:[#allocation19_spill] sm:$0xff] }
 0x800   :  { %v5249_v27 = vpop.eup %5248 }
 0x801   :  { %v3861_v38 = vsub.f32 %v6881_v34, %v3748_v26  ;;  %v3511_v2 = vmul.f32 1.442695, %v6623_v18  ;;  %v5251_v54 = vpop.eup %5250  ;;  %v3322_v25 = vpop.xlane.xlu1 %3321  ;;  %v3580_v39 = vsel %vm3142_vm0, %v5249_v27, 0.0 }
 0x802   :  { %v3628_v30 = vpop.xlane.xlu0 %3627  ;;  %v3750_v7 = vmul.f32 0.6931472, %v5251_v54  ;;  %v6632_v56 = vsub.f32 %v6882_v58, %v3322_v25  ;;  %3697 = vadd.xlane.f32.xlu1 %v3580_v39 }
 0x803   :  { %v3925_v50 = vsel %vm3142_vm0, %v3861_v38, 0.0  ;;  %5260 = vpow2.f32 %v3511_v2 }
 0x804   :  { %3989 = vst [vmem:[#allocation10 + $0x70] sm:$0xff] %v3925_v50  ;;  %5262 = vlog2.f32 %v3628_v30  ;;  %v3862_v49 = vsub.f32 %v6883_v45, %v3750_v7  ;;  %v3513_v46 = vmul.f32 1.442695, %v6632_v56  ;;  %v6885_v7 = vld [vmem:[#allocation20_spill] sm:$0xff] }
 0x805   :  { %v5253_v16 = vpop.eup %5252  ;;  %v3630_v40 = vpop.xlane.xlu1 %3629 }
 0x806   :  { %v5255_v14 = vpop.eup %5254  ;;  %v3324_v57 = vpop.xlane.xlu0 %3323  ;;  %v3581_v43 = vsel %vm3142_vm0, %v5253_v16, 0.0  ;;  %v3926_v28 = vsel %vm3142_vm0, %v3862_v49, 0.0  ;;  %5264 = vpow2.f32 %v3513_v46 }
 0x807   :  { %v3752_v32 = vmul.f32 0.6931472, %v5255_v14  ;;  %v6641_v5 = vsub.f32 %v6328_v53, %v3324_v57  ;;  %3699 = vadd.xlane.f32.xlu0 %v3581_v43  ;;  %3990 = vst [vmem:[#allocation10 + $0x78] sm:$0xff] %v3926_v28  ;;  %5266 = vlog2.f32 %v3630_v40 }
 0x808   :  { %v5257_v26 = vpop.eup %5256 }
 0x809   :  { %v3863_v27 = vsub.f32 %v6884_v37, %v3752_v32  ;;  %v3515_v34 = vmul.f32 1.442695, %v6641_v5  ;;  %v5259_v38 = vpop.eup %5258  ;;  %v3326_v2 = vpop.xlane.xlu1 %3325  ;;  %v3582_v54 = vsel %vm3142_vm0, %v5257_v26, 0.0 }
 0x80a   :  { %v3754_v30 = vmul.f32 0.6931472, %v5259_v38  ;;  %v6650_v53 = vsub.f32 %v6342_v42, %v3326_v2  ;;  %3701 = vadd.xlane.f32.xlu1 %v3582_v54  ;;  %v6887_v54 = vld [vmem:[#allocation22_spill] sm:$0xff] }
 0x80b   :  { %v3927_v25 = vsel %vm3142_vm0, %v3863_v27, 0.0  ;;  %5268 = vpow2.f32 %v3515_v34  ;;  %v3328_v39 = vpop.xlane.xlu0 %3327 }
 0x80c   :  { %3991 = vst [vmem:[#allocation10 + $0x80] sm:$0xff] %v3927_v25  ;;  %v3864_v58 = vsub.f32 %v6885_v7, %v3754_v30  ;;  %v3517_v16 = vmul.f32 1.442695, %v6650_v53  ;;  %v6655_v45 = vsub.f32 %v6358_v17, %v3328_v39  ;;  %v6886_v17 = vld [vmem:[#allocation21_spill] sm:$0xff] }
 0x80d   :  { %v5261_v50 = vpop.eup %5260  ;;  %v3330_v46 = vpop.xlane.xlu1 %3329 }
 0x80e   :  { %v5263_v49 = vpop.eup %5262  ;;  %v3583_v14 = vsel %vm3142_vm0, %v5261_v50, 0.0  ;;  %v3928_v42 = vsel %vm3142_vm0, %v3864_v58, 0.0  ;;  %5270 = vpow2.f32 %v3517_v16  ;;  %v3519_v57 = vmul.f32 1.442695, %v6655_v45 }
 0x80f   :  { %v3756_v40 = vmul.f32 0.6931472, %v5263_v49  ;;  %3703 = vadd.xlane.f32.xlu0 %v3583_v14  ;;  %3992 = vst [vmem:[#allocation10 + $0x88] sm:$0xff] %v3928_v42  ;;  %v6663_v43 = vsub.f32 %v6368_v10, %v3330_v46 }
 0x810   :  { %v5265_v28 = vpop.eup %5264  ;;  %5272 = vpow2.f32 %v3519_v57 }
 0x811   :  { %v3865_v32 = vsub.f32 %v6886_v17, %v3756_v40  ;;  %v5267_v26 = vpop.eup %5266  ;;  %v3521_v37 = vmul.f32 1.442695, %v6663_v43  ;;  %v3584_v27 = vsel %vm3142_vm0, %v5265_v28, 0.0 }
 0x812   :  { %v3758_v38 = vmul.f32 0.6931472, %v5267_v26  ;;  %3705 = vadd.xlane.f32.xlu1 %v3584_v27 }
 0x813   :  { %v3929_v34 = vsel %vm3142_vm0, %v3865_v32, 0.0  ;;  %5274 = vpow2.f32 %v3521_v37  ;;  %v3332_v2 = vpop.xlane.xlu0 %3331 }
 0x814   :  { %3993 = vst [vmem:[#allocation10 + $0x90] sm:$0xff] %v3929_v34  ;;  %v3866_v25 = vsub.f32 %v6887_v54, %v3758_v38  ;;  %v6673_v30 = vsub.f32 %v6383_v1, %v3332_v2 }
 0x815   :  { %v5269_v10 = vpop.eup %5268  ;;  %v3334_v39 = vpop.xlane.xlu1 %3333 }
 0x816   :  { %v3585_v50 = vsel %vm3142_vm0, %v5269_v10, 0.0  ;;  %v3930_v7 = vsel %vm3142_vm0, %v3866_v25, 0.0  ;;  %v3523_v58 = vmul.f32 1.442695, %v6673_v30  ;;  %v6681_v16 = vsub.f32 %v6389_v13, %v3334_v39 }
 0x817   :  { %3707 = vadd.xlane.f32.xlu0 %v3585_v50  ;;  %3994 = vst [vmem:[#allocation10 + $0x98] sm:$0xff] %v3930_v7  ;;  %v3632_v49 = vpop.xlane.xlu0 %3631 }
 0x818   :  { %v5271_v46 = vpop.eup %5270  ;;  %5276 = vpow2.f32 %v3523_v58  ;;  %v3525_v1 = vmul.f32 1.442695, %v6681_v16 }
 0x819   :  { %5278 = vlog2.f32 %v3632_v49  ;;  %v3634_v14 = vpop.xlane.xlu1 %3633  ;;  %v3586_v42 = vsel %vm3142_vm0, %v5271_v46, 0.0 }
 0x81a   :  { %v5273_v40 = vpop.eup %5272  ;;  %5280 = vpow2.f32 %v3525_v1  ;;  %3709 = vadd.xlane.f32.xlu1 %v3586_v42 }
 0x81b   :  { %5282 = vlog2.f32 %v3634_v14  ;;  %v3636_v57 = vpop.xlane.xlu0 %3635  ;;  %v3587_v13 = vsel %vm3142_vm0, %v5273_v40, 0.0 }
 0x81c   :  { %5284 = vlog2.f32 %v3636_v57  ;;  %3711 = vadd.xlane.f32.xlu0 %v3587_v13 }
 0x81d   :  { %v5275_v28 = vpop.eup %5274  ;;  %v3638_v17 = vpop.xlane.xlu1 %3637 }
 0x81e   :  { %5286 = vlog2.f32 %v3638_v17  ;;  %v3588_v32 = vsel %vm3142_vm0, %v5275_v28, 0.0 }
 0x81f   :  { %3713 = vadd.xlane.f32.xlu1 %v3588_v32  ;;  %v3640_v26 = vpop.xlane.xlu0 %3639  ;;  %v6888_v32 = vld [vmem:[#allocation26_spill] sm:$0xff] }
 0x820   :  { %5288 = vlog2.f32 %v3640_v26 }
 0x821   :  { %v3642_v37 = vpop.xlane.xlu1 %3641 }
 0x822   :  { %v5277_v27 = vpop.eup %5276  ;;  %5290 = vlog2.f32 %v3642_v37 }
 0x823   :  { %v5279_v34 = vpop.eup %5278  ;;  %v3644_v38 = vpop.xlane.xlu0 %3643  ;;  %v3589_v2 = vsel %vm3142_vm0, %v5277_v27, 0.0 }
 0x824   :  { %v5281_v10 = vpop.eup %5280  ;;  %v3760_v54 = vmul.f32 0.6931472, %v5279_v34  ;;  %5292 = vlog2.f32 %v3644_v38  ;;  %3715 = vadd.xlane.f32.xlu0 %v3589_v2 }
 0x825   :  { %v5283_v25 = vpop.eup %5282  ;;  %v3646_v39 = vpop.xlane.xlu1 %3645  ;;  %v3590_v50 = vsel %vm3142_vm0, %v5281_v10, 0.0 }
 0x826   :  { %v5285_v7 = vpop.eup %5284  ;;  %v3867_v58 = vsub.f32 %v6336_v55, %v3760_v54  ;;  %v3762_v49 = vmul.f32 0.6931472, %v5283_v25  ;;  %5294 = vlog2.f32 %v3646_v39  ;;  %3717 = vadd.xlane.f32.xlu1 %v3590_v50 }
 0x827   :  { %v3764_v46 = vmul.f32 0.6931472, %v5285_v7 }
 0x828   :  { %v5287_v1 = vpop.eup %5286  ;;  %v3931_v14 = vsel %vm3142_vm0, %v3867_v58, 0.0  ;;  %v3868_v42 = vsub.f32 %v6339_v29, %v3762_v49 }
 0x829   :  { %3995 = vst [vmem:[#allocation10 + $0xa0] sm:$0xff] %v3931_v14  ;;  %v3869_v40 = vsub.f32 %v6351_v36, %v3764_v46  ;;  %v3766_v57 = vmul.f32 0.6931472, %v5287_v1  ;;  %v3648_v13 = vpop.xlane.xlu0 %3647  ;;  %v6889_v36 = vld [vmem:[#allocation27_spill] sm:$0xff]  ;;  %v6890_v14 = vld [vmem:[#allocation28_spill] sm:$0xff] }
 0x82a   :  { %v5289_v28 = vpop.eup %5288  ;;  %v3932_v17 = vsel %vm3142_vm0, %v3868_v42, 0.0  ;;  %5296 = vlog2.f32 %v3648_v13 }
 0x82b   :  { %3996 = vst [vmem:[#allocation10 + $0xa8] sm:$0xff] %v3932_v17  ;;  %v3933_v55 = vsel %vm3142_vm0, %v3869_v40, 0.0  ;;  %v3870_v26 = vsub.f32 %v6888_v32, %v3766_v57  ;;  %v3768_v37 = vmul.f32 0.6931472, %v5289_v28  ;;  %v3650_v27 = vpop.xlane.xlu1 %3649 }
 0x82c   :  { %v5291_v34 = vpop.eup %5290  ;;  %3997 = vst [vmem:[#allocation10 + $0xb0] sm:$0xff] %v3933_v55  ;;  %5298 = vlog2.f32 %v3650_v27 }
 0x82d   :  { %v3934_v29 = vsel %vm3142_vm0, %v3870_v26, 0.0  ;;  %v3871_v38 = vsub.f32 %v6889_v36, %v3768_v37  ;;  %v3770_v2 = vmul.f32 0.6931472, %v5291_v34 }
 0x82e   :  { %v5293_v10 = vpop.eup %5292  ;;  %3998 = vst [vmem:[#allocation10 + $0xb8] sm:$0xff] %v3934_v29 }
 0x82f   :  { %v3935_v54 = vsel %vm3142_vm0, %v3871_v38, 0.0  ;;  %v3872_v25 = vsub.f32 %v6375_v20, %v3770_v2  ;;  %v3772_v39 = vmul.f32 0.6931472, %v5293_v10 }
 0x830   :  { %v5295_v50 = vpop.eup %5294  ;;  %3999 = vst [vmem:[#allocation10 + $0xc0] sm:$0xff] %v3935_v54 }
 0x831   :  { %v3936_v7 = vsel %vm3142_vm0, %v3872_v25, 0.0  ;;  %v3873_v58 = vsub.f32 %v6386_v22, %v3772_v39  ;;  %v3774_v49 = vmul.f32 0.6931472, %v5295_v50  ;;  %v3652_v46 = vpop.xlane.xlu0 %3651 }
 0x832   :  { %4000 = vst [vmem:[#allocation10 + $0xc8] sm:$0xff] %v3936_v7  ;;  %5300 = vlog2.f32 %v3652_v46 }
 0x833   :  { %v3937_v1 = vsel %vm3142_vm0, %v3873_v58, 0.0  ;;  %v3874_v42 = vsub.f32 %v6890_v14, %v3774_v49  ;;  %v3654_v40 = vpop.xlane.xlu1 %3653 }
 0x834   :  { %v5297_v57 = vpop.eup %5296  ;;  %4001 = vst [vmem:[#allocation10 + $0xd0] sm:$0xff] %v3937_v1  ;;  %5302 = vlog2.f32 %v3654_v40 }
 0x835   :  { %v3938_v20 = vsel %vm3142_vm0, %v3874_v42, 0.0  ;;  %v3776_v13 = vmul.f32 0.6931472, %v5297_v57 }
 0x836   :  { %v5299_v28 = vpop.eup %5298  ;;  %4002 = vst [vmem:[#allocation10 + $0xd8] sm:$0xff] %v3938_v20 }
 0x837   :  { %v3875_v22 = vsub.f32 %v6407_v8, %v3776_v13  ;;  %v3778_v17 = vmul.f32 0.6931472, %v5299_v28 }
 0x839   :  { %v3939_v55 = vsel %vm3142_vm0, %v3875_v22, 0.0  ;;  %v3876_v32 = vsub.f32 %v6413_v11, %v3778_v17  ;;  %v3656_v26 = vpop.xlane.xlu0 %3655 }
 0x83a   :  { %4003 = vst [vmem:[#allocation10 + $0xe0] sm:$0xff] %v3939_v55  ;;  %5304 = vlog2.f32 %v3656_v26 }
 0x83b   :  { %v3940_v37 = vsel %vm3142_vm0, %v3876_v32, 0.0  ;;  %v3658_v27 = vpop.xlane.xlu1 %3657 }
 0x83c   :  { %v5301_v34 = vpop.eup %5300  ;;  %4004 = vst [vmem:[#allocation10 + $0xe8] sm:$0xff] %v3940_v37  ;;  %5306 = vlog2.f32 %v3658_v27 }
 0x83d   :  { %v3780_v29 = vmul.f32 0.6931472, %v5301_v34 }
 0x83e   :  { %v5303_v36 = vpop.eup %5302 }
 0x83f   :  { %v3877_v8 = vsub.f32 %v6423_v19, %v3780_v29  ;;  %v3782_v38 = vmul.f32 0.6931472, %v5303_v36 }
 0x841   :  { %v3941_v2 = vsel %vm3142_vm0, %v3877_v8, 0.0  ;;  %v3878_v11 = vsub.f32 %v6429_v33, %v3782_v38  ;;  %v3660_v10 = vpop.xlane.xlu0 %3659 }
 0x842   :  { %4005 = vst [vmem:[#allocation10 + $0xf0] sm:$0xff] %v3941_v2  ;;  %5308 = vlog2.f32 %v3660_v10 }
 0x843   :  { %v3942_v54 = vsel %vm3142_vm0, %v3878_v11, 0.0  ;;  %v3662_v25 = vpop.xlane.xlu1 %3661 }
 0x844   :  { %v5305_v39 = vpop.eup %5304  ;;  %4006 = vst [vmem:[#allocation10 + $0xf8] sm:$0xff] %v3942_v54  ;;  %5310 = vlog2.f32 %v3662_v25 }
 0x845   :  { %v3784_v50 = vmul.f32 0.6931472, %v5305_v39 }
 0x846   :  { %v5307_v7 = vpop.eup %5306 }
 0x847   :  { %v3879_v19 = vsub.f32 %v6437_v62, %v3784_v50  ;;  %v3786_v58 = vmul.f32 0.6931472, %v5307_v7 }
 0x849   :  { %v3943_v49 = vsel %vm3142_vm0, %v3879_v19, 0.0  ;;  %v3880_v33 = vsub.f32 %v6443_v52, %v3786_v58  ;;  %v3664_v46 = vpop.xlane.xlu0 %3663 }
 0x84a   :  { %4007 = vst [vmem:[#allocation10 + $0x100] sm:$0xff] %v3943_v49  ;;  %5312 = vlog2.f32 %v3664_v46 }
 0x84b   :  { %v3944_v1 = vsel %vm3142_vm0, %v3880_v33, 0.0  ;;  %v3666_v14 = vpop.xlane.xlu1 %3665 }
 0x84c   :  { %v5309_v42 = vpop.eup %5308  ;;  %4008 = vst [vmem:[#allocation10 + $0x108] sm:$0xff] %v3944_v1  ;;  %5314 = vlog2.f32 %v3666_v14 }
 0x84d   :  { %v3788_v40 = vmul.f32 0.6931472, %v5309_v42 }
 0x84e   :  { %v5311_v57 = vpop.eup %5310 }
 0x84f   :  { %v3881_v62 = vsub.f32 %v6449_v59, %v3788_v40  ;;  %v3790_v20 = vmul.f32 0.6931472, %v5311_v57 }
 0x851   :  { %v3945_v13 = vsel %vm3142_vm0, %v3881_v62, 0.0  ;;  %v3882_v52 = vsub.f32 %v6455_v31, %v3790_v20  ;;  %v3668_v28 = vpop.xlane.xlu0 %3667 }
 0x852   :  { %4009 = vst [vmem:[#allocation10 + $0x110] sm:$0xff] %v3945_v13  ;;  %5316 = vlog2.f32 %v3668_v28 }
 0x853   :  { %v3946_v22 = vsel %vm3142_vm0, %v3882_v52, 0.0  ;;  %v3670_v17 = vpop.xlane.xlu1 %3669 }
 0x854   :  { %v5313_v55 = vpop.eup %5312  ;;  %4010 = vst [vmem:[#allocation10 + $0x118] sm:$0xff] %v3946_v22  ;;  %5318 = vlog2.f32 %v3670_v17 }
 0x855   :  { %v3792_v32 = vmul.f32 0.6931472, %v5313_v55 }
 0x856   :  { %v5315_v26 = vpop.eup %5314 }
 0x857   :  { %v3883_v59 = vsub.f32 %v6461_v48, %v3792_v32  ;;  %v3794_v37 = vmul.f32 0.6931472, %v5315_v26 }
 0x859   :  { %v3947_v27 = vsel %vm3142_vm0, %v3883_v59, 0.0  ;;  %v3884_v31 = vsub.f32 %v6467_v23, %v3794_v37 }
 0x85a   :  { %4011 = vst [vmem:[#allocation10 + $0x120] sm:$0xff] %v3947_v27 }
 0x85b   :  { %v3948_v34 = vsel %vm3142_vm0, %v3884_v31, 0.0  ;;  %v3672_v29 = vpop.xlane.xlu0 %3671 }
 0x85c   :  { %v5317_v36 = vpop.eup %5316  ;;  %4012 = vst [vmem:[#allocation10 + $0x128] sm:$0xff] %v3948_v34  ;;  %5320 = vlog2.f32 %v3672_v29 }
 0x85d   :  { %v3796_v8 = vmul.f32 0.6931472, %v5317_v36 }
 0x85e   :  { %v5319_v38 = vpop.eup %5318 }
 0x85f   :  { %v3885_v2 = vsub.f32 %v6473_v51, %v3796_v8  ;;  %v3798_v11 = vmul.f32 0.6931472, %v5319_v38  ;;  %v3674_v48 = vpop.xlane.xlu1 %3673  ;;  %v6891_v51 = vld [vmem:[#allocation29_spill] sm:$0xff] }
 0x860   :  { %5322 = vlog2.f32 %v3674_v48 }
 0x861   :  { %v3949_v10 = vsel %vm3142_vm0, %v3885_v2, 0.0  ;;  %v3886_v23 = vsub.f32 %v6479_v41, %v3798_v11  ;;  %v6892_v41 = vld [vmem:[#allocation30_spill] sm:$0xff] }
 0x862   :  { %4013 = vst [vmem:[#allocation10 + $0x130] sm:$0xff] %v3949_v10 }
 0x863   :  { %v3950_v54 = vsel %vm3142_vm0, %v3886_v23, 0.0 }
 0x864   :  { %v3676_v25 = vpop.xlane.xlu0 %3675  ;;  %4014 = vst [vmem:[#allocation10 + $0x138] sm:$0xff] %v3950_v54 }
 0x865   :  { %5324 = vlog2.f32 %v3676_v25 }
 0x866   :  { %v5321_v39 = vpop.eup %5320 }
 0x867   :  { %v3800_v50 = vmul.f32 0.6931472, %v5321_v39  ;;  %v3678_v7 = vpop.xlane.xlu1 %3677 }
 0x868   :  { %5326 = vlog2.f32 %v3678_v7 }
 0x869   :  { %v3887_v19 = vsub.f32 %v6891_v51, %v3800_v50 }
 0x86a   :  { %v5323_v58 = vpop.eup %5322 }
 0x86b   :  { %v3951_v49 = vsel %vm3142_vm0, %v3887_v19, 0.0  ;;  %v3802_v33 = vmul.f32 0.6931472, %v5323_v58 }
 0x86c   :  { %v3680_v46 = vpop.xlane.xlu0 %3679  ;;  %4015 = vst [vmem:[#allocation10 + $0x140] sm:$0xff] %v3951_v49 }
 0x86d   :  { %5328 = vlog2.f32 %v3680_v46  ;;  %v3888_v1 = vsub.f32 %v6892_v41, %v3802_v33 }
 0x86f   :  { %v5325_v14 = vpop.eup %5324  ;;  %v3952_v42 = vsel %vm3142_vm0, %v3888_v1, 0.0  ;;  %v3682_v57 = vpop.xlane.xlu1 %3681 }
 0x870   :  { %v3804_v40 = vmul.f32 0.6931472, %v5325_v14  ;;  %4016 = vst [vmem:[#allocation10 + $0x148] sm:$0xff] %v3952_v42  ;;  %5330 = vlog2.f32 %v3682_v57 }
 0x872   :  { %v3889_v62 = vsub.f32 %v6499_v0, %v3804_v40  ;;  %v5327_v20 = vpop.eup %5326 }
 0x873   :  { %v3806_v52 = vmul.f32 0.6931472, %v5327_v20 }
 0x874   :  { %v3953_v13 = vsel %vm3142_vm0, %v3889_v62, 0.0  ;;  %v3684_v28 = vpop.xlane.xlu0 %3683 }
 0x875   :  { %4017 = vst [vmem:[#allocation10 + $0x150] sm:$0xff] %v3953_v13  ;;  %5332 = vlog2.f32 %v3684_v28  ;;  %v3890_v22 = vsub.f32 %v6506_v9, %v3806_v52 }
 0x877   :  { %v5329_v17 = vpop.eup %5328  ;;  %v3954_v55 = vsel %vm3142_vm0, %v3890_v22, 0.0  ;;  %v3686_v26 = vpop.xlane.xlu1 %3685 }
 0x878   :  { %v3808_v32 = vmul.f32 0.6931472, %v5329_v17  ;;  %4018 = vst [vmem:[#allocation10 + $0x158] sm:$0xff] %v3954_v55  ;;  %5334 = vlog2.f32 %v3686_v26 }
 0x87a   :  { %v3891_v0 = vsub.f32 %v6515_v63, %v3808_v32  ;;  %v5331_v59 = vpop.eup %5330 }
 0x87b   :  { %v3810_v27 = vmul.f32 0.6931472, %v5331_v59 }
 0x87c   :  { %v3955_v37 = vsel %vm3142_vm0, %v3891_v0, 0.0  ;;  %v3688_v31 = vpop.xlane.xlu0 %3687 }
 0x87d   :  { %4019 = vst [vmem:[#allocation10 + $0x160] sm:$0xff] %v3955_v37  ;;  %5336 = vlog2.f32 %v3688_v31  ;;  %v3892_v9 = vsub.f32 %v6524_v60, %v3810_v27 }
 0x87f   :  { %v5333_v34 = vpop.eup %5332  ;;  %v3956_v29 = vsel %vm3142_vm0, %v3892_v9, 0.0  ;;  %v3690_v8 = vpop.xlane.xlu1 %3689 }
 0x880   :  { %v3812_v36 = vmul.f32 0.6931472, %v5333_v34  ;;  %4020 = vst [vmem:[#allocation10 + $0x168] sm:$0xff] %v3956_v29  ;;  %5338 = vlog2.f32 %v3690_v8 }
 0x882   :  { %v3893_v63 = vsub.f32 %v6533_v61, %v3812_v36  ;;  %v5335_v38 = vpop.eup %5334 }
 0x883   :  { %v3814_v11 = vmul.f32 0.6931472, %v5335_v38 }
 0x884   :  { %v3957_v2 = vsel %vm3142_vm0, %v3893_v63, 0.0  ;;  %v3692_v48 = vpop.xlane.xlu0 %3691 }
 0x885   :  { %4021 = vst [vmem:[#allocation10 + $0x170] sm:$0xff] %v3957_v2  ;;  %5340 = vlog2.f32 %v3692_v48  ;;  %v3894_v60 = vsub.f32 %v6542_v6, %v3814_v11 }
 0x887   :  { %v5337_v10 = vpop.eup %5336  ;;  %v3958_v23 = vsel %vm3142_vm0, %v3894_v60, 0.0  ;;  %v3694_v25 = vpop.xlane.xlu1 %3693 }
 0x888   :  { %v3816_v54 = vmul.f32 0.6931472, %v5337_v10  ;;  %4022 = vst [vmem:[#allocation10 + $0x178] sm:$0xff] %v3958_v23  ;;  %5342 = vlog2.f32 %v3694_v25 }
 0x88a   :  { %v3895_v61 = vsub.f32 %v6551_v3, %v3816_v54  ;;  %v5339_v39 = vpop.eup %5338 }
 0x88b   :  { %v3818_v7 = vmul.f32 0.6931472, %v5339_v39 }
 0x88c   :  { %v3959_v50 = vsel %vm3142_vm0, %v3895_v61, 0.0  ;;  %v3696_v51 = vpop.xlane.xlu0 %3695 }
 0x88d   :  { %4023 = vst [vmem:[#allocation10 + $0x180] sm:$0xff] %v3959_v50  ;;  %5344 = vlog2.f32 %v3696_v51  ;;  %v3896_v6 = vsub.f32 %v6560_v15, %v3818_v7 }
 0x88f   :  { %v5341_v19 = vpop.eup %5340  ;;  %v3960_v58 = vsel %vm3142_vm0, %v3896_v6, 0.0  ;;  %v3698_v33 = vpop.xlane.xlu1 %3697 }
 0x890   :  { %v3820_v49 = vmul.f32 0.6931472, %v5341_v19  ;;  %4024 = vst [vmem:[#allocation10 + $0x188] sm:$0xff] %v3960_v58  ;;  %5346 = vlog2.f32 %v3698_v33 }
 0x892   :  { %v3897_v3 = vsub.f32 %v6569_v47, %v3820_v49  ;;  %v5343_v46 = vpop.eup %5342 }
 0x893   :  { %v3822_v1 = vmul.f32 0.6931472, %v5343_v46 }
 0x894   :  { %v3961_v41 = vsel %vm3142_vm0, %v3897_v3, 0.0  ;;  %v3700_v14 = vpop.xlane.xlu0 %3699 }
 0x895   :  { %4025 = vst [vmem:[#allocation10 + $0x190] sm:$0xff] %v3961_v41  ;;  %5348 = vlog2.f32 %v3700_v14  ;;  %v3898_v15 = vsub.f32 %v6578_v24, %v3822_v1 }
 0x897   :  { %v5345_v42 = vpop.eup %5344  ;;  %v3962_v40 = vsel %vm3142_vm0, %v3898_v15, 0.0  ;;  %v3702_v62 = vpop.xlane.xlu1 %3701 }
 0x898   :  { %v3824_v57 = vmul.f32 0.6931472, %v5345_v42  ;;  %4026 = vst [vmem:[#allocation10 + $0x198] sm:$0xff] %v3962_v40  ;;  %5350 = vlog2.f32 %v3702_v62 }
 0x89a   :  { %v3899_v47 = vsub.f32 %v6587_v4, %v3824_v57  ;;  %v5347_v20 = vpop.eup %5346 }
 0x89b   :  { %v3826_v52 = vmul.f32 0.6931472, %v5347_v20 }
 0x89c   :  { %v3963_v13 = vsel %vm3142_vm0, %v3899_v47, 0.0  ;;  %v3704_v28 = vpop.xlane.xlu0 %3703 }
 0x89d   :  { %4027 = vst [vmem:[#allocation10 + $0x1a0] sm:$0xff] %v3963_v13  ;;  %5352 = vlog2.f32 %v3704_v28  ;;  %v3900_v24 = vsub.f32 %v6596_v35, %v3826_v52 }
 0x89f   :  { %v5349_v22 = vpop.eup %5348  ;;  %v3964_v17 = vsel %vm3142_vm0, %v3900_v24, 0.0  ;;  %v3706_v32 = vpop.xlane.xlu1 %3705 }
 0x8a0   :  { %v3828_v55 = vmul.f32 0.6931472, %v5349_v22  ;;  %4028 = vst [vmem:[#allocation10 + $0x1a8] sm:$0xff] %v3964_v17  ;;  %5354 = vlog2.f32 %v3706_v32 }
 0x8a2   :  { %v3901_v4 = vsub.f32 %v6605_v12, %v3828_v55  ;;  %v5351_v26 = vpop.eup %5350 }
 0x8a3   :  { %v3830_v59 = vmul.f32 0.6931472, %v5351_v26 }
 0x8a4   :  { %v3965_v0 = vsel %vm3142_vm0, %v3901_v4, 0.0  ;;  %v3708_v37 = vpop.xlane.xlu0 %3707 }
 0x8a5   :  { %4029 = vst [vmem:[#allocation10 + $0x1b0] sm:$0xff] %v3965_v0  ;;  %5356 = vlog2.f32 %v3708_v37  ;;  %v3902_v35 = vsub.f32 %v6614_v44, %v3830_v59 }
 0x8a7   :  { %v5353_v27 = vpop.eup %5352  ;;  %v3966_v31 = vsel %vm3142_vm0, %v3902_v35, 0.0  ;;  %v3710_v34 = vpop.xlane.xlu1 %3709 }
 0x8a8   :  { %v3832_v9 = vmul.f32 0.6931472, %v5353_v27  ;;  %4030 = vst [vmem:[#allocation10 + $0x1b8] sm:$0xff] %v3966_v31  ;;  %5358 = vlog2.f32 %v3710_v34 }
 0x8a9   :  { %v3712_v29 = vpop.xlane.xlu0 %3711 }
 0x8aa   :  { %v3903_v12 = vsub.f32 %v6623_v18, %v3832_v9  ;;  %v5355_v36 = vpop.eup %5354  ;;  %5360 = vlog2.f32 %v3712_v29 }
 0x8ab   :  { %v3834_v63 = vmul.f32 0.6931472, %v5355_v36 }
 0x8ac   :  { %v3967_v8 = vsel %vm3142_vm0, %v3903_v12, 0.0  ;;  %v3714_v38 = vpop.xlane.xlu1 %3713 }
 0x8ad   :  { %4031 = vst [vmem:[#allocation10 + $0x1c0] sm:$0xff] %v3967_v8  ;;  %v3904_v44 = vsub.f32 %v6632_v56, %v3834_v63  ;;  %5362 = vlog2.f32 %v3714_v38 }
 0x8af   :  { %v5357_v2 = vpop.eup %5356  ;;  %v3968_v11 = vsel %vm3142_vm0, %v3904_v44, 0.0 }
 0x8b0   :  { %v3836_v48 = vmul.f32 0.6931472, %v5357_v2  ;;  %4032 = vst [vmem:[#allocation10 + $0x1c8] sm:$0xff] %v3968_v11 }
 0x8b1   :  { %v3716_v60 = vpop.xlane.xlu0 %3715 }
 0x8b2   :  { %v3905_v18 = vsub.f32 %v6641_v5, %v3836_v48  ;;  %v5359_v10 = vpop.eup %5358  ;;  %5364 = vlog2.f32 %v3716_v60 }
 0x8b3   :  { %v3838_v54 = vmul.f32 0.6931472, %v5359_v10  ;;  %v3718_v25 = vpop.xlane.xlu1 %3717 }
 0x8b4   :  { %v3969_v23 = vsel %vm3142_vm0, %v3905_v18, 0.0  ;;  %v5361_v61 = vpop.eup %5360  ;;  %5366 = vlog2.f32 %v3718_v25 }
 0x8b5   :  { %4033 = vst [vmem:[#allocation10 + $0x1d0] sm:$0xff] %v3969_v23  ;;  %v3906_v56 = vsub.f32 %v6650_v53, %v3838_v54  ;;  %v3840_v39 = vmul.f32 0.6931472, %v5361_v61 }
 0x8b7   :  { %v5363_v50 = vpop.eup %5362  ;;  %v3970_v7 = vsel %vm3142_vm0, %v3906_v56, 0.0  ;;  %v3907_v5 = vsub.f32 %v6655_v45, %v3840_v39 }
 0x8b8   :  { %4034 = vst [vmem:[#allocation10 + $0x1d8] sm:$0xff] %v3970_v7  ;;  %v3842_v51 = vmul.f32 0.6931472, %v5363_v50 }
 0x8b9   :  { %v3971_v6 = vsel %vm3142_vm0, %v3907_v5, 0.0 }
 0x8ba   :  { %4035 = vst [vmem:[#allocation10 + $0x1e0] sm:$0xff] %v3971_v6  ;;  %v3908_v19 = vsub.f32 %v6663_v43, %v3842_v51 }
 0x8bc   :  { %v5365_v58 = vpop.eup %5364  ;;  %v3972_v49 = vsel %vm3142_vm0, %v3908_v19, 0.0 }
 0x8bd   :  { %4036 = vst [vmem:[#allocation10 + $0x1e8] sm:$0xff] %v3972_v49  ;;  %v3844_v53 = vmul.f32 0.6931472, %v5365_v58 }
 0x8be   :  { %v5367_v33 = vpop.eup %5366 }
 0x8bf   :  { %v3909_v3 = vsub.f32 %v6673_v30, %v3844_v53  ;;  %v3846_v46 = vmul.f32 0.6931472, %v5367_v33 }
 0x8c1   :  { %v3973_v45 = vsel %vm3142_vm0, %v3909_v3, 0.0  ;;  %v3910_v41 = vsub.f32 %v6681_v16, %v3846_v46 }
 0x8c2   :  { %4037 = vst [vmem:[#allocation10 + $0x1f0] sm:$0xff] %v3973_v45 }
 0x8c3   :  { %v3974_v43 = vsel %vm3142_vm0, %v3910_v41, 0.0 }
 0x8c4   :  { %4038 = vst [vmem:[#allocation10 + $0x1f8] sm:$0xff] %v3974_v43 }
 0x8c5   :  { %5595 = shalt.err (!%p5592_p8)
}
 0x8c6   :  { %s5596_s27 = scalar_lea.hbm %s6844_s6, 8192 }
 0x8c7   :  { %p5597_p9 = scmp.ne.s32.totalorder %s6844_s6, %s5596_s27  ;;  %p5600_p10 = scmp.lt.u32.totalorder %s5596_s27, %s6844_s6 }
 0x8c9   :  { %p5602_p11 = pnand %p5600_p10, %p5597_p9 }
 0x8cb   :  { %5605 = shalt.err (!%p5602_p11)
}
 0x8cc   :  { %s5624_s10 = smov 128   ;;  %s5625_s11 = smov 8  }
 0x8cd   :  { %4050 = dma.vmem_to_hbm [thread:$0]  %s4045_s23, 8192, %s6844_s6, [#allocation4], %s5624_s10, %s5624_s10, %s5625_s11  }
 0x8ce   :  { %5612 = dma.done.wait [#allocation4], 8192  }
 0x8cf   :  { %5613 = vsyncadd [#allocation4], 4294959104 }
 0x8d0   :  { %4054 = vsyncpa [#allocation3], 1 }
 0x8d1   :  { %4055 = vsyncpa [#allocation6], 1 }
 0x8d2   :  { %4056 = vsyncpa [#allocation9], 1 }
 0x8d3   :  { %4057 = vsyncpa [#allocation4], 1 }

</bundles_post_ra>
